<compile_context>
chip_gen: v6e
topology: v6e:2x2x1
jax: 0.10.0
libtpu: 0.0.40
codegen_flags: <defaults>
</compile_context>

<pallas_src>
import math

import jax
import jax.numpy as jnp
from jax.experimental import pallas as pl
from jax.experimental.pallas import tpu as pltpu

# ---- small synthetic config consistent with the BERT-GPT forward ----
B      = 2               # batch
S_ENC  = 8               # encoder sequence length
S_DEC  = 8               # decoder sequence length
S_TOT  = S_ENC + S_DEC   # decoder attends over encoder past + its own tokens
VOCAB  = 64
HIDDEN = 32
NHEAD  = 4
DHEAD  = HIDDEN // NHEAD
FFN    = 4 * HIDDEN
NLAYER = 2
NEG    = -1e9
LN_EPS = 1e-5
SCALE  = 1.0 / math.sqrt(DHEAD)
MXU_DT = jnp.bfloat16    # MXU input dtype (accumulation stays f32)


# ------------------------- in-kernel helpers (traced inside kernels) -------------------------
def _mm(a, b):
    """a @ b with bf16 MXU inputs, f32 accumulation."""
    return jnp.dot(a.astype(MXU_DT), b.astype(MXU_DT),
                   preferred_element_type=jnp.float32)


def _mm_tt(a, b):
    """a @ b^T (contract last dims), bf16 MXU inputs, f32 accumulation."""
    return jax.lax.dot_general(a.astype(MXU_DT), b.astype(MXU_DT),
                               (((1,), (1,)), ((), ())),
                               preferred_element_type=jnp.float32)


def _layernorm(x, g, b):
    mu = jnp.mean(x, axis=-1, keepdims=True)
    var = jnp.mean((x - mu) ** 2, axis=-1, keepdims=True)
    return (x - mu) * jax.lax.rsqrt(var + LN_EPS) * g + b


def _gelu(x):
    # tanh-approximation GELU (matches the GPT-style reference implementation)
    return 0.5 * x * (1.0 + jnp.tanh(0.7978845608028654 * (x + 0.044715 * x * x * x)))


def _mha(q, k, v, bias, wo):
    """Multi-head attention + output projection, fully in-register.

    q: (Sq, H), k/v: (Sk, H), bias: broadcastable to (Sq, Sk) additive, wo: (H, H).
    Returns concat_heads(softmax(qk^T/sqrt(d)+bias) v) @ wo  as (Sq, H), without ever
    materializing per-head (Sq, DHEAD) tensors in HBM or concatenating heads:
    the per-head output is folded directly into the Wo row-block matmul and summed.
    """
    out = None
    for hh in range(NHEAD):
        sl = slice(hh * DHEAD, (hh + 1) * DHEAD)
        s = _mm_tt(q[:, sl], k[:, sl]) * SCALE + bias          # (Sq, Sk) f32
        s = s - jnp.max(s, axis=-1, keepdims=True)
        p = jnp.exp(s)
        p = p * pl.reciprocal(jnp.sum(p, axis=-1, keepdims=True), approx=True)
        o_h = _mm(p, v[:, sl])                                  # (Sq, DHEAD)
        term = _mm(o_h, wo[sl, :])                              # (Sq, H)
        out = term if out is None else out + term
    return out


# ------------------------- fused per-layer kernels -------------------------
def _enc_layer_kernel(mask_ref, h_ref, wqkv_ref, bqkv_ref, wo_ref, bo_ref,
                      ln1g_ref, ln1b_ref, w1_ref, b1_ref, w2_ref, b2_ref,
                      ln2g_ref, ln2b_ref,
                      h_out_ref, k_out_ref, v_out_ref):
    """One BERT encoder layer for one batch element (post-LN), emitting the k/v past."""
    h = h_ref[0].astype(jnp.float32)                            # (S_ENC, H)
    # additive key-padding mask built in-kernel from the (1, S_ENC) key mask
    bias = (1.0 - mask_ref[0].astype(jnp.float32)) * NEG        # (1, S_ENC)

    qkv = _mm(h, wqkv_ref[...]) + bqkv_ref[...]                 # fused QKV: (S_ENC, 3H)
    q = qkv[:, 0:HIDDEN]
    k = qkv[:, HIDDEN:2 * HIDDEN]
    v = qkv[:, 2 * HIDDEN:3 * HIDDEN]

    a = _mha(q, k, v, bias, wo_ref[...]) + bo_ref[...]
    h1 = _layernorm(h + a, ln1g_ref[...], ln1b_ref[...])        # residual + LN epilogue

    f = _gelu(_mm(h1, w1_ref[...]) + b1_ref[...])
    f = _mm(f, w2_ref[...]) + b2_ref[...]
    h2 = _layernorm(h1 + f, ln2g_ref[...], ln2b_ref[...])

    h_out_ref[0] = h2.astype(h_out_ref.dtype)
    k_out_ref[0] = k.astype(k_out_ref.dtype)                    # per-layer past K (heads packed on lanes)
    v_out_ref[0] = v.astype(v_out_ref.dtype)                    # per-layer past V


def _dec_layer_kernel(mask_ref, h_ref, pk_ref, pv_ref, wqkv_ref, bqkv_ref,
                      wo_ref, bo_ref, ln1g_ref, ln1b_ref, w1_ref, b1_ref,
                      w2_ref, b2_ref, ln2g_ref, ln2b_ref,
                      h_out_ref):
    """One GPT decoder layer (pre-LN) for one batch element, attending over
    [encoder past keys ++ decoder keys] with pad + causal mask built in-kernel."""
    h = h_ref[0].astype(jnp.float32)                            # (S_DEC, H)

    # additive mask: key padding (1, S_TOT) + causal over the decoder span (past_length=0)
    pad = (1.0 - mask_ref[0].astype(jnp.float32)) * NEG         # (1, S_TOT)
    col = jax.lax.broadcasted_iota(jnp.int32, (S_DEC, S_TOT), 1)
    row = jax.lax.broadcasted_iota(jnp.int32, (S_DEC, S_TOT), 0)
    causal = jnp.where(col <= (S_ENC + row), 0.0, NEG)
    bias = pad + causal                                         # (S_DEC, S_TOT)

    a_in = _layernorm(h, ln1g_ref[...], ln1b_ref[...])
    qkv = _mm(a_in, wqkv_ref[...]) + bqkv_ref[...]              # fused QKV: (S_DEC, 3H)
    q = qkv[:, 0:HIDDEN]
    k_new = qkv[:, HIDDEN:2 * HIDDEN]
    v_new = qkv[:, 2 * HIDDEN:3 * HIDDEN]

    # full key/value = encoder past ++ current decoder projections (all in VMEM)
    k_full = jnp.concatenate([pk_ref[0].astype(jnp.float32), k_new], axis=0)  # (S_TOT, H)
    v_full = jnp.concatenate([pv_ref[0].astype(jnp.float32), v_new], axis=0)  # (S_TOT, H)

    a = _mha(q, k_full, v_full, bias, wo_ref[...]) + bo_ref[...]
    h = h + a

    m_in = _layernorm(h, ln2g_ref[...], ln2b_ref[...])
    f = _gelu(_mm(m_in, w1_ref[...]) + b1_ref[...])
    f = _mm(f, w2_ref[...]) + b2_ref[...]
    h_out_ref[0] = (h + f).astype(h_out_ref.dtype)


def _lnf_lmhead_kernel(h_ref, g_ref, b_ref, wte_ref, o_ref):
    """Final LayerNorm + weight-tied LM head (contracts wte's last dim in-kernel,
    no transposed embedding table materialized in HBM, no zero-bias add)."""
    h = _layernorm(h_ref[0].astype(jnp.float32), g_ref[...], b_ref[...])
    o_ref[0] = _mm_tt(h, wte_ref[...]).astype(o_ref.dtype)      # (S_DEC, VOCAB)


# ------------------------- pallas_call wrappers -------------------------
def _rep_spec(x):
    """Whole-array block, shared (not re-fetched) across the batch grid axis."""
    nd = x.ndim
    return pl.BlockSpec(x.shape, lambda b: (0,) * nd)


def _batch_spec(shape):
    """(1, *rest) block indexed by the batch grid axis."""
    nd = len(shape)
    return pl.BlockSpec((1,) + tuple(shape[1:]), lambda b: (b,) + (0,) * (nd - 1))


_CPARAMS = pltpu.CompilerParams(dimension_semantics=("parallel",))


def encoder_layer(h, key_mask3, lyr):
    args = (key_mask3, h, lyr["Wqkv"], lyr["bqkv"], lyr["Wo"], lyr["bo"],
            lyr["ln1_g"], lyr["ln1_b"], lyr["W1"], lyr["b1"],
            lyr["W2"], lyr["b2"], lyr["ln2_g"], lyr["ln2_b"])
    in_specs = [_batch_spec(key_mask3.shape), _batch_spec(h.shape)] + \
               [_rep_spec(a) for a in args[2:]]
    out_shape = tuple(jax.ShapeDtypeStruct((B, S_ENC, HIDDEN), jnp.float32)
                      for _ in range(3))
    out_specs = tuple(_batch_spec((B, S_ENC, HIDDEN)) for _ in range(3))
    return pl.pallas_call(
        _enc_layer_kernel,
        out_shape=out_shape,
        grid=(B,),
        in_specs=in_specs,
        out_specs=out_specs,
        compiler_params=_CPARAMS,
    )(*args)


def decoder_layer(h, past_k, past_v, key_mask3, lyr):
    args = (key_mask3, h, past_k, past_v, lyr["Wqkv"], lyr["bqkv"],
            lyr["Wo"], lyr["bo"], lyr["ln1_g"], lyr["ln1_b"],
            lyr["W1"], lyr["b1"], lyr["W2"], lyr["b2"],
            lyr["ln2_g"], lyr["ln2_b"])
    in_specs = [_batch_spec(key_mask3.shape), _batch_spec(h.shape),
                _batch_spec(past_k.shape), _batch_spec(past_v.shape)] + \
               [_rep_spec(a) for a in args[4:]]
    return pl.pallas_call(
        _dec_layer_kernel,
        out_shape=jax.ShapeDtypeStruct((B, S_DEC, HIDDEN), jnp.float32),
        grid=(B,),
        in_specs=in_specs,
        out_specs=_batch_spec((B, S_DEC, HIDDEN)),
        compiler_params=_CPARAMS,
    )(*args)


def lm_head(h, g, b, wte):
    return pl.pallas_call(
        _lnf_lmhead_kernel,
        out_shape=jax.ShapeDtypeStruct((B, S_DEC, VOCAB), jnp.float32),
        grid=(B,),
        in_specs=[_batch_spec(h.shape), _rep_spec(g), _rep_spec(b), _rep_spec(wte)],
        out_specs=_batch_spec((B, S_DEC, VOCAB)),
        compiler_params=_CPARAMS,
    )(h, g, b, wte)


# ------------------------- model forward (thin JAX glue) -------------------------
def bert_gpt_forward(params, encoder_input, mask_encoder_input,
                     decoder_input, mask_decoder_input):
    # ---- BERT encoder ----
    # TODO(synk): embedding-table gathers (nn.Embedding) stay in plain JAX glue.
    h = params["enc_wte"][encoder_input] + params["enc_wpe"][None, :, :]
    enc_mask3 = mask_encoder_input.astype(jnp.float32).reshape(B, 1, S_ENC)
    past = []
    for lyr in params["enc_layers"]:
        h, k_cache, v_cache = encoder_layer(h, enc_mask3, lyr)
        past.append((k_cache, v_cache))          # per-layer K/V handed to the decoder

    # ---- GPT decoder with encoder past ----
    h = params["dec_wte"][decoder_input] + params["dec_wpe"][None, :, :]
    key_mask = jnp.concatenate([mask_encoder_input, mask_decoder_input], axis=1)
    key_mask3 = key_mask.astype(jnp.float32).reshape(B, 1, S_TOT)
    for lyr, (k_cache, v_cache) in zip(params["dec_layers"], past):
        h = decoder_layer(h, k_cache, v_cache, key_mask3, lyr)

    return lm_head(h, params["dec_lnf_g"], params["dec_lnf_b"], params["dec_wte"])


# ------------------------- deterministic parameter init -------------------------
def init_params(key):
    keys = iter(jax.random.split(key, 64))

    def w(shape):
        return jax.random.normal(next(keys), shape, jnp.float32) * 0.02

    def zeros(shape):
        return jnp.zeros(shape, jnp.float32)

    def ones(shape):
        return jnp.ones(shape, jnp.float32)

    def layer():
        return dict(
            Wqkv=w((HIDDEN, 3 * HIDDEN)), bqkv=zeros((1, 3 * HIDDEN)),   # fused Q/K/V
            Wo=w((HIDDEN, HIDDEN)), bo=zeros((1, HIDDEN)),
            W1=w((HIDDEN, FFN)), b1=zeros((1, FFN)),
            W2=w((FFN, HIDDEN)), b2=zeros((1, HIDDEN)),
            ln1_g=ones((1, HIDDEN)), ln1_b=zeros((1, HIDDEN)),
            ln2_g=ones((1, HIDDEN)), ln2_b=zeros((1, HIDDEN)),
        )

    return dict(
        enc_wte=w((VOCAB, HIDDEN)), enc_wpe=w((S_ENC, HIDDEN)),
        dec_wte=w((VOCAB, HIDDEN)), dec_wpe=w((S_DEC, HIDDEN)),
        enc_layers=[layer() for _ in range(NLAYER)],
        dec_layers=[layer() for _ in range(NLAYER)],
        dec_lnf_g=ones((1, HIDDEN)), dec_lnf_b=zeros((1, HIDDEN)),
    )


if __name__ == "__main__":
    key = jax.random.PRNGKey(0)
    kp, k1, k2 = jax.random.split(key, 3)
    params = init_params(kp)

    encoder_input = jax.random.randint(k1, (B, S_ENC), 0, VOCAB)
    decoder_input = jax.random.randint(k2, (B, S_DEC), 0, VOCAB)
    mask_encoder_input = jnp.ones((B, S_ENC), jnp.float32).at[1, -2:].set(0.0)
    mask_decoder_input = jnp.ones((B, S_DEC), jnp.float32)

    logits = jax.jit(bert_gpt_forward)(params, encoder_input, mask_encoder_input,
                                       decoder_input, mask_decoder_input)
    jax.block_until_ready(logits)

    assert logits.shape == (B, S_DEC, VOCAB), logits.shape
    assert bool(jnp.all(jnp.isfinite(logits)))
    print("KERNEL_OK")
</pallas_src>

<mosaic_0001>
module attributes {stable_mosaic.version = 11 : i64} {
  func.func @_enc_layer_kernel(%arg0: i32, %arg1: memref<1x1x8xf32, #tpu.memory_space<vmem>>, %arg2: memref<1x8x32xf32, #tpu.memory_space<vmem>>, %arg3: memref<32x96xf32, #tpu.memory_space<vmem>>, %arg4: memref<1x96xf32, #tpu.memory_space<vmem>>, %arg5: memref<32x32xf32, #tpu.memory_space<vmem>>, %arg6: memref<1x32xf32, #tpu.memory_space<vmem>>, %arg7: memref<1x32xf32, #tpu.memory_space<vmem>>, %arg8: memref<1x32xf32, #tpu.memory_space<vmem>>, %arg9: memref<32x128xf32, #tpu.memory_space<vmem>>, %arg10: memref<1x128xf32, #tpu.memory_space<vmem>>, %arg11: memref<128x32xf32, #tpu.memory_space<vmem>>, %arg12: memref<1x32xf32, #tpu.memory_space<vmem>>, %arg13: memref<1x32xf32, #tpu.memory_space<vmem>>, %arg14: memref<1x32xf32, #tpu.memory_space<vmem>>, %arg15: memref<1x8x32xf32, #tpu.memory_space<vmem>>, %arg16: memref<1x8x32xf32, #tpu.memory_space<vmem>>, %arg17: memref<1x8x32xf32, #tpu.memory_space<vmem>>) attributes {dimension_semantics = [#tpu.dimension_semantics<parallel>], iteration_bounds = array<i64: 2>, scalar_prefetch = 0 : i64, scratch_operands = 0 : i64, tpu.core_type = #tpu.core_type<tc>, window_params = [{transform_indices = @transform_0, window_bounds = array<i64: 1, 1, 8>}, {transform_indices = @transform_1, window_bounds = array<i64: 1, 8, 32>}, {pipeline_mode = #tpu.pipeline_mode<synchronous>, transform_indices = @transform_2, window_bounds = array<i64: 32, 96>}, {pipeline_mode = #tpu.pipeline_mode<synchronous>, transform_indices = @transform_3, window_bounds = array<i64: 1, 96>}, {pipeline_mode = #tpu.pipeline_mode<synchronous>, transform_indices = @transform_4, window_bounds = array<i64: 32, 32>}, {pipeline_mode = #tpu.pipeline_mode<synchronous>, transform_indices = @transform_5, window_bounds = array<i64: 1, 32>}, {pipeline_mode = #tpu.pipeline_mode<synchronous>, transform_indices = @transform_6, window_bounds = array<i64: 1, 32>}, {pipeline_mode = #tpu.pipeline_mode<synchronous>, transform_indices = @transform_7, window_bounds = array<i64: 1, 32>}, {pipeline_mode = #tpu.pipeline_mode<synchronous>, transform_indices = @transform_8, window_bounds = array<i64: 32, 128>}, {pipeline_mode = #tpu.pipeline_mode<synchronous>, transform_indices = @transform_9, window_bounds = array<i64: 1, 128>}, {pipeline_mode = #tpu.pipeline_mode<synchronous>, transform_indices = @transform_10, window_bounds = array<i64: 128, 32>}, {pipeline_mode = #tpu.pipeline_mode<synchronous>, transform_indices = @transform_11, window_bounds = array<i64: 1, 32>}, {pipeline_mode = #tpu.pipeline_mode<synchronous>, transform_indices = @transform_12, window_bounds = array<i64: 1, 32>}, {pipeline_mode = #tpu.pipeline_mode<synchronous>, transform_indices = @transform_13, window_bounds = array<i64: 1, 32>}, {transform_indices = @transform_14, window_bounds = array<i64: 1, 8, 32>}, {transform_indices = @transform_15, window_bounds = array<i64: 1, 8, 32>}, {transform_indices = @transform_16, window_bounds = array<i64: 1, 8, 32>}]} {
    %c0 = arith.constant 0 : index
    %c0_0 = arith.constant 0 : index
    %c0_1 = arith.constant 0 : index
    %0 = vector.load %arg2[%c0, %c0_0, %c0_1] : memref<1x8x32xf32, #tpu.memory_space<vmem>>, vector<1x8x32xf32>
    %1 = vector.shape_cast %0 : vector<1x8x32xf32> to vector<8x32xf32>
    %c0_2 = arith.constant 0 : index
    %c0_3 = arith.constant 0 : index
    %c0_4 = arith.constant 0 : index
    %2 = vector.load %arg1[%c0_2, %c0_3, %c0_4] : memref<1x1x8xf32, #tpu.memory_space<vmem>>, vector<1x1x8xf32>
    %3 = vector.shape_cast %2 : vector<1x1x8xf32> to vector<1x8xf32>
    %cst = arith.constant 1.000000e+00 : f32
    %4 = vector.broadcast %cst : f32 to vector<1x8xf32>
    %5 = arith.subf %4, %3 : vector<1x8xf32>
    %cst_5 = arith.constant -1.000000e+09 : f32
    %6 = vector.broadcast %cst_5 : f32 to vector<1x8xf32>
    %7 = arith.mulf %5, %6 : vector<1x8xf32>
    %c0_6 = arith.constant 0 : index
    %c0_7 = arith.constant 0 : index
    %8 = vector.load %arg3[%c0_6, %c0_7] : memref<32x96xf32, #tpu.memory_space<vmem>>, vector<32x96xf32>
    %9 = arith.truncf %1 : vector<8x32xf32> to vector<8x32xbf16>
    %10 = arith.truncf %8 : vector<32x96xf32> to vector<32x96xbf16>
    %cst_8 = arith.constant dense<0.000000e+00> : vector<8x96xf32>
    %11 = tpu.matmul %9, %10, %cst_8 {dimension_numbers = #tpu.dot_dimension_numbers<[1], [0], [0], [1], [0, 0, 1, 1], [], []>} : vector<8x32xbf16>, vector<32x96xbf16>, vector<8x96xf32> -> vector<8x96xf32>
    %c0_9 = arith.constant 0 : index
    %c0_10 = arith.constant 0 : index
    %12 = vector.load %arg4[%c0_9, %c0_10] : memref<1x96xf32, #tpu.memory_space<vmem>>, vector<1x96xf32>
    %13 = vector.broadcast %12 : vector<1x96xf32> to vector<8x96xf32>
    %14 = arith.addf %11, %13 : vector<8x96xf32>
    %15 = vector.extract_strided_slice %14 {offsets = [0, 0], sizes = [8, 32], strides = [1, 1]} : vector<8x96xf32> to vector<8x32xf32>
    %16 = vector.extract_strided_slice %14 {offsets = [0, 32], sizes = [8, 32], strides = [1, 1]} : vector<8x96xf32> to vector<8x32xf32>
    %17 = vector.extract_strided_slice %14 {offsets = [0, 64], sizes = [8, 32], strides = [1, 1]} : vector<8x96xf32> to vector<8x32xf32>
    %c0_11 = arith.constant 0 : index
    %c0_12 = arith.constant 0 : index
    %18 = vector.load %arg5[%c0_11, %c0_12] : memref<32x32xf32, #tpu.memory_space<vmem>>, vector<32x32xf32>
    %19 = vector.extract_strided_slice %15 {offsets = [0, 0], sizes = [8, 8], strides = [1, 1]} : vector<8x32xf32> to vector<8x8xf32>
    %20 = vector.extract_strided_slice %16 {offsets = [0, 0], sizes = [8, 8], strides = [1, 1]} : vector<8x32xf32> to vector<8x8xf32>
    %21 = arith.truncf %19 : vector<8x8xf32> to vector<8x8xbf16>
    %22 = arith.truncf %20 : vector<8x8xf32> to vector<8x8xbf16>
    %cst_13 = arith.constant dense<0.000000e+00> : vector<8x8xf32>
    %23 = tpu.matmul %21, %22, %cst_13 {dimension_numbers = #tpu.dot_dimension_numbers<[1], [1], [0], [0], [0, 0, 1, 0], [], []>} : vector<8x8xbf16>, vector<8x8xbf16>, vector<8x8xf32> -> vector<8x8xf32>
    %cst_14 = arith.constant 0.353553385 : f32
    %24 = vector.broadcast %cst_14 : f32 to vector<8x8xf32>
    %25 = arith.mulf %23, %24 : vector<8x8xf32>
    %26 = vector.broadcast %7 : vector<1x8xf32> to vector<8x8xf32>
    %27 = arith.addf %25, %26 : vector<8x8xf32>
    %cst_15 = arith.constant dense<0xFF800000> : vector<8xf32>
    %28 = vector.multi_reduction <maximumf>, %27, %cst_15 [1] : vector<8x8xf32> to vector<8xf32>
    %29 = vector.shape_cast %28 : vector<8xf32> to vector<8x1xf32>
    %30 = vector.broadcast %29 : vector<8x1xf32> to vector<8x8xf32>
    %31 = arith.subf %27, %30 : vector<8x8xf32>
    %32 = math.exp %31 : vector<8x8xf32>
    %cst_16 = arith.constant dense<0.000000e+00> : vector<8xf32>
    %33 = vector.multi_reduction <add>, %32, %cst_16 [1] : vector<8x8xf32> to vector<8xf32>
    %34 = vector.shape_cast %33 : vector<8xf32> to vector<8x1xf32>
    %35 = tpu.reciprocal %34 {approx = true} : vector<8x1xf32> -> vector<8x1xf32>
    %36 = vector.broadcast %35 : vector<8x1xf32> to vector<8x8xf32>
    %37 = arith.mulf %32, %36 : vector<8x8xf32>
    %38 = vector.extract_strided_slice %17 {offsets = [0, 0], sizes = [8, 8], strides = [1, 1]} : vector<8x32xf32> to vector<8x8xf32>
    %39 = arith.truncf %37 : vector<8x8xf32> to vector<8x8xbf16>
    %40 = arith.truncf %38 : vector<8x8xf32> to vector<8x8xbf16>
    %cst_17 = arith.constant dense<0.000000e+00> : vector<8x8xf32>
    %41 = tpu.matmul %39, %40, %cst_17 {dimension_numbers = #tpu.dot_dimension_numbers<[1], [0], [0], [1], [0, 0, 1, 1], [], []>} : vector<8x8xbf16>, vector<8x8xbf16>, vector<8x8xf32> -> vector<8x8xf32>
    %42 = vector.extract_strided_slice %18 {offsets = [0, 0], sizes = [8, 32], strides = [1, 1]} : vector<32x32xf32> to vector<8x32xf32>
    %43 = arith.truncf %41 : vector<8x8xf32> to vector<8x8xbf16>
    %44 = arith.truncf %42 : vector<8x32xf32> to vector<8x32xbf16>
    %cst_18 = arith.constant dense<0.000000e+00> : vector<8x32xf32>
    %45 = tpu.matmul %43, %44, %cst_18 {dimension_numbers = #tpu.dot_dimension_numbers<[1], [0], [0], [1], [0, 0, 1, 1], [], []>} : vector<8x8xbf16>, vector<8x32xbf16>, vector<8x32xf32> -> vector<8x32xf32>
    %46 = vector.extract_strided_slice %15 {offsets = [0, 8], sizes = [8, 8], strides = [1, 1]} : vector<8x32xf32> to vector<8x8xf32>
    %47 = vector.extract_strided_slice %16 {offsets = [0, 8], sizes = [8, 8], strides = [1, 1]} : vector<8x32xf32> to vector<8x8xf32>
    %48 = arith.truncf %46 : vector<8x8xf32> to vector<8x8xbf16>
    %49 = arith.truncf %47 : vector<8x8xf32> to vector<8x8xbf16>
    %cst_19 = arith.constant dense<0.000000e+00> : vector<8x8xf32>
    %50 = tpu.matmul %48, %49, %cst_19 {dimension_numbers = #tpu.dot_dimension_numbers<[1], [1], [0], [0], [0, 0, 1, 0], [], []>} : vector<8x8xbf16>, vector<8x8xbf16>, vector<8x8xf32> -> vector<8x8xf32>
    %cst_20 = arith.constant 0.353553385 : f32
    %51 = vector.broadcast %cst_20 : f32 to vector<8x8xf32>
    %52 = arith.mulf %50, %51 : vector<8x8xf32>
    %53 = vector.broadcast %7 : vector<1x8xf32> to vector<8x8xf32>
    %54 = arith.addf %52, %53 : vector<8x8xf32>
    %cst_21 = arith.constant dense<0xFF800000> : vector<8xf32>
    %55 = vector.multi_reduction <maximumf>, %54, %cst_21 [1] : vector<8x8xf32> to vector<8xf32>
    %56 = vector.shape_cast %55 : vector<8xf32> to vector<8x1xf32>
    %57 = vector.broadcast %56 : vector<8x1xf32> to vector<8x8xf32>
    %58 = arith.subf %54, %57 : vector<8x8xf32>
    %59 = math.exp %58 : vector<8x8xf32>
    %cst_22 = arith.constant dense<0.000000e+00> : vector<8xf32>
    %60 = vector.multi_reduction <add>, %59, %cst_22 [1] : vector<8x8xf32> to vector<8xf32>
    %61 = vector.shape_cast %60 : vector<8xf32> to vector<8x1xf32>
    %62 = tpu.reciprocal %61 {approx = true} : vector<8x1xf32> -> vector<8x1xf32>
    %63 = vector.broadcast %62 : vector<8x1xf32> to vector<8x8xf32>
    %64 = arith.mulf %59, %63 : vector<8x8xf32>
    %65 = vector.extract_strided_slice %17 {offsets = [0, 8], sizes = [8, 8], strides = [1, 1]} : vector<8x32xf32> to vector<8x8xf32>
    %66 = arith.truncf %64 : vector<8x8xf32> to vector<8x8xbf16>
    %67 = arith.truncf %65 : vector<8x8xf32> to vector<8x8xbf16>
    %cst_23 = arith.constant dense<0.000000e+00> : vector<8x8xf32>
    %68 = tpu.matmul %66, %67, %cst_23 {dimension_numbers = #tpu.dot_dimension_numbers<[1], [0], [0], [1], [0, 0, 1, 1], [], []>} : vector<8x8xbf16>, vector<8x8xbf16>, vector<8x8xf32> -> vector<8x8xf32>
    %69 = vector.extract_strided_slice %18 {offsets = [8, 0], sizes = [8, 32], strides = [1, 1]} : vector<32x32xf32> to vector<8x32xf32>
    %70 = arith.truncf %68 : vector<8x8xf32> to vector<8x8xbf16>
    %71 = arith.truncf %69 : vector<8x32xf32> to vector<8x32xbf16>
    %cst_24 = arith.constant dense<0.000000e+00> : vector<8x32xf32>
    %72 = tpu.matmul %70, %71, %cst_24 {dimension_numbers = #tpu.dot_dimension_numbers<[1], [0], [0], [1], [0, 0, 1, 1], [], []>} : vector<8x8xbf16>, vector<8x32xbf16>, vector<8x32xf32> -> vector<8x32xf32>
    %73 = arith.addf %45, %72 : vector<8x32xf32>
    %74 = vector.extract_strided_slice %15 {offsets = [0, 16], sizes = [8, 8], strides = [1, 1]} : vector<8x32xf32> to vector<8x8xf32>
    %75 = vector.extract_strided_slice %16 {offsets = [0, 16], sizes = [8, 8], strides = [1, 1]} : vector<8x32xf32> to vector<8x8xf32>
    %76 = arith.truncf %74 : vector<8x8xf32> to vector<8x8xbf16>
    %77 = arith.truncf %75 : vector<8x8xf32> to vector<8x8xbf16>
    %cst_25 = arith.constant dense<0.000000e+00> : vector<8x8xf32>
    %78 = tpu.matmul %76, %77, %cst_25 {dimension_numbers = #tpu.dot_dimension_numbers<[1], [1], [0], [0], [0, 0, 1, 0], [], []>} : vector<8x8xbf16>, vector<8x8xbf16>, vector<8x8xf32> -> vector<8x8xf32>
    %cst_26 = arith.constant 0.353553385 : f32
    %79 = vector.broadcast %cst_26 : f32 to vector<8x8xf32>
    %80 = arith.mulf %78, %79 : vector<8x8xf32>
    %81 = vector.broadcast %7 : vector<1x8xf32> to vector<8x8xf32>
    %82 = arith.addf %80, %81 : vector<8x8xf32>
    %cst_27 = arith.constant dense<0xFF800000> : vector<8xf32>
    %83 = vector.multi_reduction <maximumf>, %82, %cst_27 [1] : vector<8x8xf32> to vector<8xf32>
    %84 = vector.shape_cast %83 : vector<8xf32> to vector<8x1xf32>
    %85 = vector.broadcast %84 : vector<8x1xf32> to vector<8x8xf32>
    %86 = arith.subf %82, %85 : vector<8x8xf32>
    %87 = math.exp %86 : vector<8x8xf32>
    %cst_28 = arith.constant dense<0.000000e+00> : vector<8xf32>
    %88 = vector.multi_reduction <add>, %87, %cst_28 [1] : vector<8x8xf32> to vector<8xf32>
    %89 = vector.shape_cast %88 : vector<8xf32> to vector<8x1xf32>
    %90 = tpu.reciprocal %89 {approx = true} : vector<8x1xf32> -> vector<8x1xf32>
    %91 = vector.broadcast %90 : vector<8x1xf32> to vector<8x8xf32>
    %92 = arith.mulf %87, %91 : vector<8x8xf32>
    %93 = vector.extract_strided_slice %17 {offsets = [0, 16], sizes = [8, 8], strides = [1, 1]} : vector<8x32xf32> to vector<8x8xf32>
    %94 = arith.truncf %92 : vector<8x8xf32> to vector<8x8xbf16>
    %95 = arith.truncf %93 : vector<8x8xf32> to vector<8x8xbf16>
    %cst_29 = arith.constant dense<0.000000e+00> : vector<8x8xf32>
    %96 = tpu.matmul %94, %95, %cst_29 {dimension_numbers = #tpu.dot_dimension_numbers<[1], [0], [0], [1], [0, 0, 1, 1], [], []>} : vector<8x8xbf16>, vector<8x8xbf16>, vector<8x8xf32> -> vector<8x8xf32>
    %97 = vector.extract_strided_slice %18 {offsets = [16, 0], sizes = [8, 32], strides = [1, 1]} : vector<32x32xf32> to vector<8x32xf32>
    %98 = arith.truncf %96 : vector<8x8xf32> to vector<8x8xbf16>
    %99 = arith.truncf %97 : vector<8x32xf32> to vector<8x32xbf16>
    %cst_30 = arith.constant dense<0.000000e+00> : vector<8x32xf32>
    %100 = tpu.matmul %98, %99, %cst_30 {dimension_numbers = #tpu.dot_dimension_numbers<[1], [0], [0], [1], [0, 0, 1, 1], [], []>} : vector<8x8xbf16>, vector<8x32xbf16>, vector<8x32xf32> -> vector<8x32xf32>
    %101 = arith.addf %73, %100 : vector<8x32xf32>
    %102 = vector.extract_strided_slice %15 {offsets = [0, 24], sizes = [8, 8], strides = [1, 1]} : vector<8x32xf32> to vector<8x8xf32>
    %103 = vector.extract_strided_slice %16 {offsets = [0, 24], sizes = [8, 8], strides = [1, 1]} : vector<8x32xf32> to vector<8x8xf32>
    %104 = arith.truncf %102 : vector<8x8xf32> to vector<8x8xbf16>
    %105 = arith.truncf %103 : vector<8x8xf32> to vector<8x8xbf16>
    %cst_31 = arith.constant dense<0.000000e+00> : vector<8x8xf32>
    %106 = tpu.matmul %104, %105, %cst_31 {dimension_numbers = #tpu.dot_dimension_numbers<[1], [1], [0], [0], [0, 0, 1, 0], [], []>} : vector<8x8xbf16>, vector<8x8xbf16>, vector<8x8xf32> -> vector<8x8xf32>
    %cst_32 = arith.constant 0.353553385 : f32
    %107 = vector.broadcast %cst_32 : f32 to vector<8x8xf32>
    %108 = arith.mulf %106, %107 : vector<8x8xf32>
    %109 = vector.broadcast %7 : vector<1x8xf32> to vector<8x8xf32>
    %110 = arith.addf %108, %109 : vector<8x8xf32>
    %cst_33 = arith.constant dense<0xFF800000> : vector<8xf32>
    %111 = vector.multi_reduction <maximumf>, %110, %cst_33 [1] : vector<8x8xf32> to vector<8xf32>
    %112 = vector.shape_cast %111 : vector<8xf32> to vector<8x1xf32>
    %113 = vector.broadcast %112 : vector<8x1xf32> to vector<8x8xf32>
    %114 = arith.subf %110, %113 : vector<8x8xf32>
    %115 = math.exp %114 : vector<8x8xf32>
    %cst_34 = arith.constant dense<0.000000e+00> : vector<8xf32>
    %116 = vector.multi_reduction <add>, %115, %cst_34 [1] : vector<8x8xf32> to vector<8xf32>
    %117 = vector.shape_cast %116 : vector<8xf32> to vector<8x1xf32>
    %118 = tpu.reciprocal %117 {approx = true} : vector<8x1xf32> -> vector<8x1xf32>
    %119 = vector.broadcast %118 : vector<8x1xf32> to vector<8x8xf32>
    %120 = arith.mulf %115, %119 : vector<8x8xf32>
    %121 = vector.extract_strided_slice %17 {offsets = [0, 24], sizes = [8, 8], strides = [1, 1]} : vector<8x32xf32> to vector<8x8xf32>
    %122 = arith.truncf %120 : vector<8x8xf32> to vector<8x8xbf16>
    %123 = arith.truncf %121 : vector<8x8xf32> to vector<8x8xbf16>
    %cst_35 = arith.constant dense<0.000000e+00> : vector<8x8xf32>
    %124 = tpu.matmul %122, %123, %cst_35 {dimension_numbers = #tpu.dot_dimension_numbers<[1], [0], [0], [1], [0, 0, 1, 1], [], []>} : vector<8x8xbf16>, vector<8x8xbf16>, vector<8x8xf32> -> vector<8x8xf32>
    %125 = vector.extract_strided_slice %18 {offsets = [24, 0], sizes = [8, 32], strides = [1, 1]} : vector<32x32xf32> to vector<8x32xf32>
    %126 = arith.truncf %124 : vector<8x8xf32> to vector<8x8xbf16>
    %127 = arith.truncf %125 : vector<8x32xf32> to vector<8x32xbf16>
    %cst_36 = arith.constant dense<0.000000e+00> : vector<8x32xf32>
    %128 = tpu.matmul %126, %127, %cst_36 {dimension_numbers = #tpu.dot_dimension_numbers<[1], [0], [0], [1], [0, 0, 1, 1], [], []>} : vector<8x8xbf16>, vector<8x32xbf16>, vector<8x32xf32> -> vector<8x32xf32>
    %129 = arith.addf %101, %128 : vector<8x32xf32>
    %c0_37 = arith.constant 0 : index
    %c0_38 = arith.constant 0 : index
    %130 = vector.load %arg6[%c0_37, %c0_38] : memref<1x32xf32, #tpu.memory_space<vmem>>, vector<1x32xf32>
    %131 = vector.broadcast %130 : vector<1x32xf32> to vector<8x32xf32>
    %132 = arith.addf %129, %131 : vector<8x32xf32>
    %133 = arith.addf %1, %132 : vector<8x32xf32>
    %c0_39 = arith.constant 0 : index
    %c0_40 = arith.constant 0 : index
    %134 = vector.load %arg7[%c0_39, %c0_40] : memref<1x32xf32, #tpu.memory_space<vmem>>, vector<1x32xf32>
    %c0_41 = arith.constant 0 : index
    %c0_42 = arith.constant 0 : index
    %135 = vector.load %arg8[%c0_41, %c0_42] : memref<1x32xf32, #tpu.memory_space<vmem>>, vector<1x32xf32>
    %cst_43 = arith.constant dense<0.000000e+00> : vector<8xf32>
    %136 = vector.multi_reduction <add>, %133, %cst_43 [1] : vector<8x32xf32> to vector<8xf32>
    %137 = vector.shape_cast %136 : vector<8xf32> to vector<8x1xf32>
    %cst_44 = arith.constant 3.200000e+01 : f32
    %138 = vector.broadcast %cst_44 : f32 to vector<8x1xf32>
    %139 = arith.divf %137, %138 : vector<8x1xf32>
    %140 = vector.broadcast %139 : vector<8x1xf32> to vector<8x32xf32>
    %141 = arith.subf %133, %140 : vector<8x32xf32>
    %142 = arith.mulf %141, %141 : vector<8x32xf32>
    %cst_45 = arith.constant dense<0.000000e+00> : vector<8xf32>
    %143 = vector.multi_reduction <add>, %142, %cst_45 [1] : vector<8x32xf32> to vector<8xf32>
    %144 = vector.shape_cast %143 : vector<8xf32> to vector<8x1xf32>
    %cst_46 = arith.constant 3.200000e+01 : f32
    %145 = vector.broadcast %cst_46 : f32 to vector<8x1xf32>
    %146 = arith.divf %144, %145 : vector<8x1xf32>
    %147 = vector.broadcast %139 : vector<8x1xf32> to vector<8x32xf32>
    %148 = arith.subf %133, %147 : vector<8x32xf32>
    %cst_47 = arith.constant 9.99999974E-6 : f32
    %149 = vector.broadcast %cst_47 : f32 to vector<8x1xf32>
    %150 = arith.addf %146, %149 : vector<8x1xf32>
    %151 = math.rsqrt %150 : vector<8x1xf32>
    %152 = vector.broadcast %151 : vector<8x1xf32> to vector<8x32xf32>
    %153 = arith.mulf %148, %152 : vector<8x32xf32>
    %154 = vector.broadcast %134 : vector<1x32xf32> to vector<8x32xf32>
    %155 = arith.mulf %153, %154 : vector<8x32xf32>
    %156 = vector.broadcast %135 : vector<1x32xf32> to vector<8x32xf32>
    %157 = arith.addf %155, %156 : vector<8x32xf32>
    %c0_48 = arith.constant 0 : index
    %c0_49 = arith.constant 0 : index
    %158 = vector.load %arg9[%c0_48, %c0_49] : memref<32x128xf32, #tpu.memory_space<vmem>>, vector<32x128xf32>
    %159 = arith.truncf %157 : vector<8x32xf32> to vector<8x32xbf16>
    %160 = arith.truncf %158 : vector<32x128xf32> to vector<32x128xbf16>
    %cst_50 = arith.constant dense<0.000000e+00> : vector<8x128xf32>
    %161 = tpu.matmul %159, %160, %cst_50 {dimension_numbers = #tpu.dot_dimension_numbers<[1], [0], [0], [1], [0, 0, 1, 1], [], []>} : vector<8x32xbf16>, vector<32x128xbf16>, vector<8x128xf32> -> vector<8x128xf32>
    %c0_51 = arith.constant 0 : index
    %c0_52 = arith.constant 0 : index
    %162 = vector.load %arg10[%c0_51, %c0_52] : memref<1x128xf32, #tpu.memory_space<vmem>>, vector<1x128xf32>
    %163 = vector.broadcast %162 : vector<1x128xf32> to vector<8x128xf32>
    %164 = arith.addf %161, %163 : vector<8x128xf32>
    %cst_53 = arith.constant 5.000000e-01 : f32
    %165 = vector.broadcast %cst_53 : f32 to vector<8x128xf32>
    %166 = arith.mulf %165, %164 : vector<8x128xf32>
    %cst_54 = arith.constant 4.471500e-02 : f32
    %167 = vector.broadcast %cst_54 : f32 to vector<8x128xf32>
    %168 = arith.mulf %167, %164 : vector<8x128xf32>
    %169 = arith.mulf %168, %164 : vector<8x128xf32>
    %170 = arith.mulf %169, %164 : vector<8x128xf32>
    %171 = arith.addf %164, %170 : vector<8x128xf32>
    %cst_55 = arith.constant 0.797884583 : f32
    %172 = vector.broadcast %cst_55 : f32 to vector<8x128xf32>
    %173 = arith.mulf %172, %171 : vector<8x128xf32>
    %174 = math.tanh %173 : vector<8x128xf32>
    %cst_56 = arith.constant 1.000000e+00 : f32
    %175 = vector.broadcast %cst_56 : f32 to vector<8x128xf32>
    %176 = arith.addf %175, %174 : vector<8x128xf32>
    %177 = arith.mulf %166, %176 : vector<8x128xf32>
    %c0_57 = arith.constant 0 : index
    %c0_58 = arith.constant 0 : index
    %178 = vector.load %arg11[%c0_57, %c0_58] : memref<128x32xf32, #tpu.memory_space<vmem>>, vector<128x32xf32>
    %179 = arith.truncf %177 : vector<8x128xf32> to vector<8x128xbf16>
    %180 = arith.truncf %178 : vector<128x32xf32> to vector<128x32xbf16>
    %cst_59 = arith.constant dense<0.000000e+00> : vector<8x32xf32>
    %181 = tpu.matmul %179, %180, %cst_59 {dimension_numbers = #tpu.dot_dimension_numbers<[1], [0], [0], [1], [0, 0, 1, 1], [], []>} : vector<8x128xbf16>, vector<128x32xbf16>, vector<8x32xf32> -> vector<8x32xf32>
    %c0_60 = arith.constant 0 : index
    %c0_61 = arith.constant 0 : index
    %182 = vector.load %arg12[%c0_60, %c0_61] : memref<1x32xf32, #tpu.memory_space<vmem>>, vector<1x32xf32>
    %183 = vector.broadcast %182 : vector<1x32xf32> to vector<8x32xf32>
    %184 = arith.addf %181, %183 : vector<8x32xf32>
    %185 = arith.addf %157, %184 : vector<8x32xf32>
    %c0_62 = arith.constant 0 : index
    %c0_63 = arith.constant 0 : index
    %186 = vector.load %arg13[%c0_62, %c0_63] : memref<1x32xf32, #tpu.memory_space<vmem>>, vector<1x32xf32>
    %c0_64 = arith.constant 0 : index
    %c0_65 = arith.constant 0 : index
    %187 = vector.load %arg14[%c0_64, %c0_65] : memref<1x32xf32, #tpu.memory_space<vmem>>, vector<1x32xf32>
    %cst_66 = arith.constant dense<0.000000e+00> : vector<8xf32>
    %188 = vector.multi_reduction <add>, %185, %cst_66 [1] : vector<8x32xf32> to vector<8xf32>
    %189 = vector.shape_cast %188 : vector<8xf32> to vector<8x1xf32>
    %cst_67 = arith.constant 3.200000e+01 : f32
    %190 = vector.broadcast %cst_67 : f32 to vector<8x1xf32>
    %191 = arith.divf %189, %190 : vector<8x1xf32>
    %192 = vector.broadcast %191 : vector<8x1xf32> to vector<8x32xf32>
    %193 = arith.subf %185, %192 : vector<8x32xf32>
    %194 = arith.mulf %193, %193 : vector<8x32xf32>
    %cst_68 = arith.constant dense<0.000000e+00> : vector<8xf32>
    %195 = vector.multi_reduction <add>, %194, %cst_68 [1] : vector<8x32xf32> to vector<8xf32>
    %196 = vector.shape_cast %195 : vector<8xf32> to vector<8x1xf32>
    %cst_69 = arith.constant 3.200000e+01 : f32
    %197 = vector.broadcast %cst_69 : f32 to vector<8x1xf32>
    %198 = arith.divf %196, %197 : vector<8x1xf32>
    %199 = vector.broadcast %191 : vector<8x1xf32> to vector<8x32xf32>
    %200 = arith.subf %185, %199 : vector<8x32xf32>
    %cst_70 = arith.constant 9.99999974E-6 : f32
    %201 = vector.broadcast %cst_70 : f32 to vector<8x1xf32>
    %202 = arith.addf %198, %201 : vector<8x1xf32>
    %203 = math.rsqrt %202 : vector<8x1xf32>
    %204 = vector.broadcast %203 : vector<8x1xf32> to vector<8x32xf32>
    %205 = arith.mulf %200, %204 : vector<8x32xf32>
    %206 = vector.broadcast %186 : vector<1x32xf32> to vector<8x32xf32>
    %207 = arith.mulf %205, %206 : vector<8x32xf32>
    %208 = vector.broadcast %187 : vector<1x32xf32> to vector<8x32xf32>
    %209 = arith.addf %207, %208 : vector<8x32xf32>
    %c0_71 = arith.constant 0 : index
    %c0_72 = arith.constant 0 : index
    %c0_73 = arith.constant 0 : index
    %210 = vector.load %arg15[%c0_71, %c0_72, %c0_73] : memref<1x8x32xf32, #tpu.memory_space<vmem>>, vector<1x8x32xf32>
    %211 = vector.shape_cast %210 : vector<1x8x32xf32> to vector<8x32xf32>
    %212 = vector.shape_cast %209 : vector<8x32xf32> to vector<1x8x32xf32>
    tpu.vector_store %arg15[%c0_71, %c0_72, %c0_73], %212 {strides = array<i32>} : memref<1x8x32xf32, #tpu.memory_space<vmem>>, vector<1x8x32xf32>,
    %c0_74 = arith.constant 0 : index
    %c0_75 = arith.constant 0 : index
    %c0_76 = arith.constant 0 : index
    %213 = vector.load %arg16[%c0_74, %c0_75, %c0_76] : memref<1x8x32xf32, #tpu.memory_space<vmem>>, vector<1x8x32xf32>
    %214 = vector.shape_cast %213 : vector<1x8x32xf32> to vector<8x32xf32>
    %215 = vector.shape_cast %16 : vector<8x32xf32> to vector<1x8x32xf32>
    tpu.vector_store %arg16[%c0_74, %c0_75, %c0_76], %215 {strides = array<i32>} : memref<1x8x32xf32, #tpu.memory_space<vmem>>, vector<1x8x32xf32>,
    %c0_77 = arith.constant 0 : index
    %c0_78 = arith.constant 0 : index
    %c0_79 = arith.constant 0 : index
    %216 = vector.load %arg17[%c0_77, %c0_78, %c0_79] : memref<1x8x32xf32, #tpu.memory_space<vmem>>, vector<1x8x32xf32>
    %217 = vector.shape_cast %216 : vector<1x8x32xf32> to vector<8x32xf32>
    %218 = vector.shape_cast %17 : vector<8x32xf32> to vector<1x8x32xf32>
    tpu.vector_store %arg17[%c0_77, %c0_78, %c0_79], %218 {strides = array<i32>} : memref<1x8x32xf32, #tpu.memory_space<vmem>>, vector<1x8x32xf32>,
    return
  }
  func.func @transform_0(%arg0: i32) -> (i32, i32, i32) {
    %c0_i32 = arith.constant 0 : i32
    %c0_i32_0 = arith.constant 0 : i32
    %c0_i32_1 = arith.constant 0 : i32
    return %arg0, %c0_i32, %c0_i32_0 : i32, i32, i32
  }
  func.func @transform_1(%arg0: i32) -> (i32, i32, i32) {
    %c0_i32 = arith.constant 0 : i32
    %c0_i32_0 = arith.constant 0 : i32
    %c0_i32_1 = arith.constant 0 : i32
    return %arg0, %c0_i32, %c0_i32_0 : i32, i32, i32
  }
  func.func @transform_2(%arg0: i32) -> (i32, i32) {
    %c0_i32 = arith.constant 0 : i32
    %c0_i32_0 = arith.constant 0 : i32
    %c0_i32_1 = arith.constant 0 : i32
    return %c0_i32, %c0_i32_0 : i32, i32
  }
  func.func @transform_3(%arg0: i32) -> (i32, i32) {
    %c0_i32 = arith.constant 0 : i32
    %c0_i32_0 = arith.constant 0 : i32
    %c0_i32_1 = arith.constant 0 : i32
    return %c0_i32, %c0_i32_0 : i32, i32
  }
  func.func @transform_4(%arg0: i32) -> (i32, i32) {
    %c0_i32 = arith.constant 0 : i32
    %c0_i32_0 = arith.constant 0 : i32
    %c0_i32_1 = arith.constant 0 : i32
    return %c0_i32, %c0_i32_0 : i32, i32
  }
  func.func @transform_5(%arg0: i32) -> (i32, i32) {
    %c0_i32 = arith.constant 0 : i32
    %c0_i32_0 = arith.constant 0 : i32
    %c0_i32_1 = arith.constant 0 : i32
    return %c0_i32, %c0_i32_0 : i32, i32
  }
  func.func @transform_6(%arg0: i32) -> (i32, i32) {
    %c0_i32 = arith.constant 0 : i32
    %c0_i32_0 = arith.constant 0 : i32
    %c0_i32_1 = arith.constant 0 : i32
    return %c0_i32, %c0_i32_0 : i32, i32
  }
  func.func @transform_7(%arg0: i32) -> (i32, i32) {
    %c0_i32 = arith.constant 0 : i32
    %c0_i32_0 = arith.constant 0 : i32
    %c0_i32_1 = arith.constant 0 : i32
    return %c0_i32, %c0_i32_0 : i32, i32
  }
  func.func @transform_8(%arg0: i32) -> (i32, i32) {
    %c0_i32 = arith.constant 0 : i32
    %c0_i32_0 = arith.constant 0 : i32
    %c0_i32_1 = arith.constant 0 : i32
    return %c0_i32, %c0_i32_0 : i32, i32
  }
  func.func @transform_9(%arg0: i32) -> (i32, i32) {
    %c0_i32 = arith.constant 0 : i32
    %c0_i32_0 = arith.constant 0 : i32
    %c0_i32_1 = arith.constant 0 : i32
    return %c0_i32, %c0_i32_0 : i32, i32
  }
  func.func @transform_10(%arg0: i32) -> (i32, i32) {
    %c0_i32 = arith.constant 0 : i32
    %c0_i32_0 = arith.constant 0 : i32
    %c0_i32_1 = arith.constant 0 : i32
    return %c0_i32, %c0_i32_0 : i32, i32
  }
  func.func @transform_11(%arg0: i32) -> (i32, i32) {
    %c0_i32 = arith.constant 0 : i32
    %c0_i32_0 = arith.constant 0 : i32
    %c0_i32_1 = arith.constant 0 : i32
    return %c0_i32, %c0_i32_0 : i32, i32
  }
  func.func @transform_12(%arg0: i32) -> (i32, i32) {
    %c0_i32 = arith.constant 0 : i32
    %c0_i32_0 = arith.constant 0 : i32
    %c0_i32_1 = arith.constant 0 : i32
    return %c0_i32, %c0_i32_0 : i32, i32
  }
  func.func @transform_13(%arg0: i32) -> (i32, i32) {
    %c0_i32 = arith.constant 0 : i32
    %c0_i32_0 = arith.constant 0 : i32
    %c0_i32_1 = arith.constant 0 : i32
    return %c0_i32, %c0_i32_0 : i32, i32
  }
  func.func @transform_14(%arg0: i32) -> (i32, i32, i32) {
    %c0_i32 = arith.constant 0 : i32
    %c0_i32_0 = arith.constant 0 : i32
    %c0_i32_1 = arith.constant 0 : i32
    return %arg0, %c0_i32, %c0_i32_0 : i32, i32, i32
  }
  func.func @transform_15(%arg0: i32) -> (i32, i32, i32) {
    %c0_i32 = arith.constant 0 : i32
    %c0_i32_0 = arith.constant 0 : i32
    %c0_i32_1 = arith.constant 0 : i32
    return %arg0, %c0_i32, %c0_i32_0 : i32, i32, i32
  }
  func.func @transform_16(%arg0: i32) -> (i32, i32, i32) {
    %c0_i32 = arith.constant 0 : i32
    %c0_i32_0 = arith.constant 0 : i32
    %c0_i32_1 = arith.constant 0 : i32
    return %arg0, %c0_i32, %c0_i32_0 : i32, i32, i32
  }
}

module attributes {stable_mosaic.version = 11 : i64} {
  func.func @_dec_layer_kernel(%arg0: i32, %arg1: memref<1x1x16xf32, #tpu.memory_space<vmem>>, %arg2: memref<1x8x32xf32, #tpu.memory_space<vmem>>, %arg3: memref<1x8x32xf32, #tpu.memory_space<vmem>>, %arg4: memref<1x8x32xf32, #tpu.memory_space<vmem>>, %arg5: memref<32x96xf32, #tpu.memory_space<vmem>>, %arg6: memref<1x96xf32, #tpu.memory_space<vmem>>, %arg7: memref<32x32xf32, #tpu.memory_space<vmem>>, %arg8: memref<1x32xf32, #tpu.memory_space<vmem>>, %arg9: memref<1x32xf32, #tpu.memory_space<vmem>>, %arg10: memref<1x32xf32, #tpu.memory_space<vmem>>, %arg11: memref<32x128xf32, #tpu.memory_space<vmem>>, %arg12: memref<1x128xf32, #tpu.memory_space<vmem>>, %arg13: memref<128x32xf32, #tpu.memory_space<vmem>>, %arg14: memref<1x32xf32, #tpu.memory_space<vmem>>, %arg15: memref<1x32xf32, #tpu.memory_space<vmem>>, %arg16: memref<1x32xf32, #tpu.memory_space<vmem>>, %arg17: memref<1x8x32xf32, #tpu.memory_space<vmem>>) attributes {dimension_semantics = [#tpu.dimension_semantics<parallel>], iteration_bounds = array<i64: 2>, scalar_prefetch = 0 : i64, scratch_operands = 0 : i64, tpu.core_type = #tpu.core_type<tc>, window_params = [{transform_indices = @transform_0, window_bounds = array<i64: 1, 1, 16>}, {transform_indices = @transform_1, window_bounds = array<i64: 1, 8, 32>}, {transform_indices = @transform_2, window_bounds = array<i64: 1, 8, 32>}, {transform_indices = @transform_3, window_bounds = array<i64: 1, 8, 32>}, {pipeline_mode = #tpu.pipeline_mode<synchronous>, transform_indices = @transform_4, window_bounds = array<i64: 32, 96>}, {pipeline_mode = #tpu.pipeline_mode<synchronous>, transform_indices = @transform_5, window_bounds = array<i64: 1, 96>}, {pipeline_mode = #tpu.pipeline_mode<synchronous>, transform_indices = @transform_6, window_bounds = array<i64: 32, 32>}, {pipeline_mode = #tpu.pipeline_mode<synchronous>, transform_indices = @transform_7, window_bounds = array<i64: 1, 32>}, {pipeline_mode = #tpu.pipeline_mode<synchronous>, transform_indices = @transform_8, window_bounds = array<i64: 1, 32>}, {pipeline_mode = #tpu.pipeline_mode<synchronous>, transform_indices = @transform_9, window_bounds = array<i64: 1, 32>}, {pipeline_mode = #tpu.pipeline_mode<synchronous>, transform_indices = @transform_10, window_bounds = array<i64: 32, 128>}, {pipeline_mode = #tpu.pipeline_mode<synchronous>, transform_indices = @transform_11, window_bounds = array<i64: 1, 128>}, {pipeline_mode = #tpu.pipeline_mode<synchronous>, transform_indices = @transform_12, window_bounds = array<i64: 128, 32>}, {pipeline_mode = #tpu.pipeline_mode<synchronous>, transform_indices = @transform_13, window_bounds = array<i64: 1, 32>}, {pipeline_mode = #tpu.pipeline_mode<synchronous>, transform_indices = @transform_14, window_bounds = array<i64: 1, 32>}, {pipeline_mode = #tpu.pipeline_mode<synchronous>, transform_indices = @transform_15, window_bounds = array<i64: 1, 32>}, {transform_indices = @transform_16, window_bounds = array<i64: 1, 8, 32>}]} {
    %c0 = arith.constant 0 : index
    %c0_0 = arith.constant 0 : index
    %c0_1 = arith.constant 0 : index
    %0 = vector.load %arg2[%c0, %c0_0, %c0_1] : memref<1x8x32xf32, #tpu.memory_space<vmem>>, vector<1x8x32xf32>
    %1 = vector.shape_cast %0 : vector<1x8x32xf32> to vector<8x32xf32>
    %c0_2 = arith.constant 0 : index
    %c0_3 = arith.constant 0 : index
    %c0_4 = arith.constant 0 : index
    %2 = vector.load %arg1[%c0_2, %c0_3, %c0_4] : memref<1x1x16xf32, #tpu.memory_space<vmem>>, vector<1x1x16xf32>
    %3 = vector.shape_cast %2 : vector<1x1x16xf32> to vector<1x16xf32>
    %cst = arith.constant 1.000000e+00 : f32
    %4 = vector.broadcast %cst : f32 to vector<1x16xf32>
    %5 = arith.subf %4, %3 : vector<1x16xf32>
    %cst_5 = arith.constant -1.000000e+09 : f32
    %6 = vector.broadcast %cst_5 : f32 to vector<1x16xf32>
    %7 = arith.mulf %5, %6 : vector<1x16xf32>
    %8 = tpu.iota {dimensions = array<i32: 1>} : vector<8x16xi32>
    %9 = tpu.iota {dimensions = array<i32: 0>} : vector<8x16xi32>
    %c8_i32 = arith.constant 8 : i32
    %10 = vector.broadcast %c8_i32 : i32 to vector<8x16xi32>
    %11 = arith.addi %10, %9 : vector<8x16xi32>
    %12 = arith.cmpi sle, %8, %11 : vector<8x16xi32>
    %cst_6 = arith.constant 0.000000e+00 : f32
    %cst_7 = arith.constant -1.000000e+09 : f32
    %13 = vector.broadcast %cst_6 : f32 to vector<8x16xf32>
    %14 = vector.broadcast %cst_7 : f32 to vector<8x16xf32>
    %15 = arith.select %12, %13, %14 : vector<8x16xi1>, vector<8x16xf32>
    %16 = vector.broadcast %7 : vector<1x16xf32> to vector<8x16xf32>
    %17 = arith.addf %16, %15 : vector<8x16xf32>
    %c0_8 = arith.constant 0 : index
    %c0_9 = arith.constant 0 : index
    %18 = vector.load %arg9[%c0_8, %c0_9] : memref<1x32xf32, #tpu.memory_space<vmem>>, vector<1x32xf32>
    %c0_10 = arith.constant 0 : index
    %c0_11 = arith.constant 0 : index
    %19 = vector.load %arg10[%c0_10, %c0_11] : memref<1x32xf32, #tpu.memory_space<vmem>>, vector<1x32xf32>
    %cst_12 = arith.constant dense<0.000000e+00> : vector<8xf32>
    %20 = vector.multi_reduction <add>, %1, %cst_12 [1] : vector<8x32xf32> to vector<8xf32>
    %21 = vector.shape_cast %20 : vector<8xf32> to vector<8x1xf32>
    %cst_13 = arith.constant 3.200000e+01 : f32
    %22 = vector.broadcast %cst_13 : f32 to vector<8x1xf32>
    %23 = arith.divf %21, %22 : vector<8x1xf32>
    %24 = vector.broadcast %23 : vector<8x1xf32> to vector<8x32xf32>
    %25 = arith.subf %1, %24 : vector<8x32xf32>
    %26 = arith.mulf %25, %25 : vector<8x32xf32>
    %cst_14 = arith.constant dense<0.000000e+00> : vector<8xf32>
    %27 = vector.multi_reduction <add>, %26, %cst_14 [1] : vector<8x32xf32> to vector<8xf32>
    %28 = vector.shape_cast %27 : vector<8xf32> to vector<8x1xf32>
    %cst_15 = arith.constant 3.200000e+01 : f32
    %29 = vector.broadcast %cst_15 : f32 to vector<8x1xf32>
    %30 = arith.divf %28, %29 : vector<8x1xf32>
    %31 = vector.broadcast %23 : vector<8x1xf32> to vector<8x32xf32>
    %32 = arith.subf %1, %31 : vector<8x32xf32>
    %cst_16 = arith.constant 9.99999974E-6 : f32
    %33 = vector.broadcast %cst_16 : f32 to vector<8x1xf32>
    %34 = arith.addf %30, %33 : vector<8x1xf32>
    %35 = math.rsqrt %34 : vector<8x1xf32>
    %36 = vector.broadcast %35 : vector<8x1xf32> to vector<8x32xf32>
    %37 = arith.mulf %32, %36 : vector<8x32xf32>
    %38 = vector.broadcast %18 : vector<1x32xf32> to vector<8x32xf32>
    %39 = arith.mulf %37, %38 : vector<8x32xf32>
    %40 = vector.broadcast %19 : vector<1x32xf32> to vector<8x32xf32>
    %41 = arith.addf %39, %40 : vector<8x32xf32>
    %c0_17 = arith.constant 0 : index
    %c0_18 = arith.constant 0 : index
    %42 = vector.load %arg5[%c0_17, %c0_18] : memref<32x96xf32, #tpu.memory_space<vmem>>, vector<32x96xf32>
    %43 = arith.truncf %41 : vector<8x32xf32> to vector<8x32xbf16>
    %44 = arith.truncf %42 : vector<32x96xf32> to vector<32x96xbf16>
    %cst_19 = arith.constant dense<0.000000e+00> : vector<8x96xf32>
    %45 = tpu.matmul %43, %44, %cst_19 {dimension_numbers = #tpu.dot_dimension_numbers<[1], [0], [0], [1], [0, 0, 1, 1], [], []>} : vector<8x32xbf16>, vector<32x96xbf16>, vector<8x96xf32> -> vector<8x96xf32>
    %c0_20 = arith.constant 0 : index
    %c0_21 = arith.constant 0 : index
    %46 = vector.load %arg6[%c0_20, %c0_21] : memref<1x96xf32, #tpu.memory_space<vmem>>, vector<1x96xf32>
    %47 = vector.broadcast %46 : vector<1x96xf32> to vector<8x96xf32>
    %48 = arith.addf %45, %47 : vector<8x96xf32>
    %49 = vector.extract_strided_slice %48 {offsets = [0, 0], sizes = [8, 32], strides = [1, 1]} : vector<8x96xf32> to vector<8x32xf32>
    %50 = vector.extract_strided_slice %48 {offsets = [0, 32], sizes = [8, 32], strides = [1, 1]} : vector<8x96xf32> to vector<8x32xf32>
    %51 = vector.extract_strided_slice %48 {offsets = [0, 64], sizes = [8, 32], strides = [1, 1]} : vector<8x96xf32> to vector<8x32xf32>
    %c0_22 = arith.constant 0 : index
    %c0_23 = arith.constant 0 : index
    %c0_24 = arith.constant 0 : index
    %52 = vector.load %arg3[%c0_22, %c0_23, %c0_24] : memref<1x8x32xf32, #tpu.memory_space<vmem>>, vector<1x8x32xf32>
    %53 = vector.shape_cast %52 : vector<1x8x32xf32> to vector<8x32xf32>
    %54 = tpu.concatenate %53, %50 in 0 : vector<8x32xf32>, vector<8x32xf32> -> vector<16x32xf32>
    %c0_25 = arith.constant 0 : index
    %c0_26 = arith.constant 0 : index
    %c0_27 = arith.constant 0 : index
    %55 = vector.load %arg4[%c0_25, %c0_26, %c0_27] : memref<1x8x32xf32, #tpu.memory_space<vmem>>, vector<1x8x32xf32>
    %56 = vector.shape_cast %55 : vector<1x8x32xf32> to vector<8x32xf32>
    %57 = tpu.concatenate %56, %51 in 0 : vector<8x32xf32>, vector<8x32xf32> -> vector<16x32xf32>
    %c0_28 = arith.constant 0 : index
    %c0_29 = arith.constant 0 : index
    %58 = vector.load %arg7[%c0_28, %c0_29] : memref<32x32xf32, #tpu.memory_space<vmem>>, vector<32x32xf32>
    %59 = vector.extract_strided_slice %49 {offsets = [0, 0], sizes = [8, 8], strides = [1, 1]} : vector<8x32xf32> to vector<8x8xf32>
    %60 = vector.extract_strided_slice %54 {offsets = [0, 0], sizes = [16, 8], strides = [1, 1]} : vector<16x32xf32> to vector<16x8xf32>
    %61 = arith.truncf %59 : vector<8x8xf32> to vector<8x8xbf16>
    %62 = arith.truncf %60 : vector<16x8xf32> to vector<16x8xbf16>
    %cst_30 = arith.constant dense<0.000000e+00> : vector<8x16xf32>
    %63 = tpu.matmul %61, %62, %cst_30 {dimension_numbers = #tpu.dot_dimension_numbers<[1], [1], [0], [0], [0, 0, 1, 0], [], []>} : vector<8x8xbf16>, vector<16x8xbf16>, vector<8x16xf32> -> vector<8x16xf32>
    %cst_31 = arith.constant 0.353553385 : f32
    %64 = vector.broadcast %cst_31 : f32 to vector<8x16xf32>
    %65 = arith.mulf %63, %64 : vector<8x16xf32>
    %66 = arith.addf %65, %17 : vector<8x16xf32>
    %cst_32 = arith.constant dense<0xFF800000> : vector<8xf32>
    %67 = vector.multi_reduction <maximumf>, %66, %cst_32 [1] : vector<8x16xf32> to vector<8xf32>
    %68 = vector.shape_cast %67 : vector<8xf32> to vector<8x1xf32>
    %69 = vector.broadcast %68 : vector<8x1xf32> to vector<8x16xf32>
    %70 = arith.subf %66, %69 : vector<8x16xf32>
    %71 = math.exp %70 : vector<8x16xf32>
    %cst_33 = arith.constant dense<0.000000e+00> : vector<8xf32>
    %72 = vector.multi_reduction <add>, %71, %cst_33 [1] : vector<8x16xf32> to vector<8xf32>
    %73 = vector.shape_cast %72 : vector<8xf32> to vector<8x1xf32>
    %74 = tpu.reciprocal %73 {approx = true} : vector<8x1xf32> -> vector<8x1xf32>
    %75 = vector.broadcast %74 : vector<8x1xf32> to vector<8x16xf32>
    %76 = arith.mulf %71, %75 : vector<8x16xf32>
    %77 = vector.extract_strided_slice %57 {offsets = [0, 0], sizes = [16, 8], strides = [1, 1]} : vector<16x32xf32> to vector<16x8xf32>
    %78 = arith.truncf %76 : vector<8x16xf32> to vector<8x16xbf16>
    %79 = arith.truncf %77 : vector<16x8xf32> to vector<16x8xbf16>
    %cst_34 = arith.constant dense<0.000000e+00> : vector<8x8xf32>
    %80 = tpu.matmul %78, %79, %cst_34 {dimension_numbers = #tpu.dot_dimension_numbers<[1], [0], [0], [1], [0, 0, 1, 1], [], []>} : vector<8x16xbf16>, vector<16x8xbf16>, vector<8x8xf32> -> vector<8x8xf32>
    %81 = vector.extract_strided_slice %58 {offsets = [0, 0], sizes = [8, 32], strides = [1, 1]} : vector<32x32xf32> to vector<8x32xf32>
    %82 = arith.truncf %80 : vector<8x8xf32> to vector<8x8xbf16>
    %83 = arith.truncf %81 : vector<8x32xf32> to vector<8x32xbf16>
    %cst_35 = arith.constant dense<0.000000e+00> : vector<8x32xf32>
    %84 = tpu.matmul %82, %83, %cst_35 {dimension_numbers = #tpu.dot_dimension_numbers<[1], [0], [0], [1], [0, 0, 1, 1], [], []>} : vector<8x8xbf16>, vector<8x32xbf16>, vector<8x32xf32> -> vector<8x32xf32>
    %85 = vector.extract_strided_slice %49 {offsets = [0, 8], sizes = [8, 8], strides = [1, 1]} : vector<8x32xf32> to vector<8x8xf32>
    %86 = vector.extract_strided_slice %54 {offsets = [0, 8], sizes = [16, 8], strides = [1, 1]} : vector<16x32xf32> to vector<16x8xf32>
    %87 = arith.truncf %85 : vector<8x8xf32> to vector<8x8xbf16>
    %88 = arith.truncf %86 : vector<16x8xf32> to vector<16x8xbf16>
    %cst_36 = arith.constant dense<0.000000e+00> : vector<8x16xf32>
    %89 = tpu.matmul %87, %88, %cst_36 {dimension_numbers = #tpu.dot_dimension_numbers<[1], [1], [0], [0], [0, 0, 1, 0], [], []>} : vector<8x8xbf16>, vector<16x8xbf16>, vector<8x16xf32> -> vector<8x16xf32>
    %cst_37 = arith.constant 0.353553385 : f32
    %90 = vector.broadcast %cst_37 : f32 to vector<8x16xf32>
    %91 = arith.mulf %89, %90 : vector<8x16xf32>
    %92 = arith.addf %91, %17 : vector<8x16xf32>
    %cst_38 = arith.constant dense<0xFF800000> : vector<8xf32>
    %93 = vector.multi_reduction <maximumf>, %92, %cst_38 [1] : vector<8x16xf32> to vector<8xf32>
    %94 = vector.shape_cast %93 : vector<8xf32> to vector<8x1xf32>
    %95 = vector.broadcast %94 : vector<8x1xf32> to vector<8x16xf32>
    %96 = arith.subf %92, %95 : vector<8x16xf32>
    %97 = math.exp %96 : vector<8x16xf32>
    %cst_39 = arith.constant dense<0.000000e+00> : vector<8xf32>
    %98 = vector.multi_reduction <add>, %97, %cst_39 [1] : vector<8x16xf32> to vector<8xf32>
    %99 = vector.shape_cast %98 : vector<8xf32> to vector<8x1xf32>
    %100 = tpu.reciprocal %99 {approx = true} : vector<8x1xf32> -> vector<8x1xf32>
    %101 = vector.broadcast %100 : vector<8x1xf32> to vector<8x16xf32>
    %102 = arith.mulf %97, %101 : vector<8x16xf32>
    %103 = vector.extract_strided_slice %57 {offsets = [0, 8], sizes = [16, 8], strides = [1, 1]} : vector<16x32xf32> to vector<16x8xf32>
    %104 = arith.truncf %102 : vector<8x16xf32> to vector<8x16xbf16>
    %105 = arith.truncf %103 : vector<16x8xf32> to vector<16x8xbf16>
    %cst_40 = arith.constant dense<0.000000e+00> : vector<8x8xf32>
    %106 = tpu.matmul %104, %105, %cst_40 {dimension_numbers = #tpu.dot_dimension_numbers<[1], [0], [0], [1], [0, 0, 1, 1], [], []>} : vector<8x16xbf16>, vector<16x8xbf16>, vector<8x8xf32> -> vector<8x8xf32>
    %107 = vector.extract_strided_slice %58 {offsets = [8, 0], sizes = [8, 32], strides = [1, 1]} : vector<32x32xf32> to vector<8x32xf32>
    %108 = arith.truncf %106 : vector<8x8xf32> to vector<8x8xbf16>
    %109 = arith.truncf %107 : vector<8x32xf32> to vector<8x32xbf16>
    %cst_41 = arith.constant dense<0.000000e+00> : vector<8x32xf32>
    %110 = tpu.matmul %108, %109, %cst_41 {dimension_numbers = #tpu.dot_dimension_numbers<[1], [0], [0], [1], [0, 0, 1, 1], [], []>} : vector<8x8xbf16>, vector<8x32xbf16>, vector<8x32xf32> -> vector<8x32xf32>
    %111 = arith.addf %84, %110 : vector<8x32xf32>
    %112 = vector.extract_strided_slice %49 {offsets = [0, 16], sizes = [8, 8], strides = [1, 1]} : vector<8x32xf32> to vector<8x8xf32>
    %113 = vector.extract_strided_slice %54 {offsets = [0, 16], sizes = [16, 8], strides = [1, 1]} : vector<16x32xf32> to vector<16x8xf32>
    %114 = arith.truncf %112 : vector<8x8xf32> to vector<8x8xbf16>
    %115 = arith.truncf %113 : vector<16x8xf32> to vector<16x8xbf16>
    %cst_42 = arith.constant dense<0.000000e+00> : vector<8x16xf32>
    %116 = tpu.matmul %114, %115, %cst_42 {dimension_numbers = #tpu.dot_dimension_numbers<[1], [1], [0], [0], [0, 0, 1, 0], [], []>} : vector<8x8xbf16>, vector<16x8xbf16>, vector<8x16xf32> -> vector<8x16xf32>
    %cst_43 = arith.constant 0.353553385 : f32
    %117 = vector.broadcast %cst_43 : f32 to vector<8x16xf32>
    %118 = arith.mulf %116, %117 : vector<8x16xf32>
    %119 = arith.addf %118, %17 : vector<8x16xf32>
    %cst_44 = arith.constant dense<0xFF800000> : vector<8xf32>
    %120 = vector.multi_reduction <maximumf>, %119, %cst_44 [1] : vector<8x16xf32> to vector<8xf32>
    %121 = vector.shape_cast %120 : vector<8xf32> to vector<8x1xf32>
    %122 = vector.broadcast %121 : vector<8x1xf32> to vector<8x16xf32>
    %123 = arith.subf %119, %122 : vector<8x16xf32>
    %124 = math.exp %123 : vector<8x16xf32>
    %cst_45 = arith.constant dense<0.000000e+00> : vector<8xf32>
    %125 = vector.multi_reduction <add>, %124, %cst_45 [1] : vector<8x16xf32> to vector<8xf32>
    %126 = vector.shape_cast %125 : vector<8xf32> to vector<8x1xf32>
    %127 = tpu.reciprocal %126 {approx = true} : vector<8x1xf32> -> vector<8x1xf32>
    %128 = vector.broadcast %127 : vector<8x1xf32> to vector<8x16xf32>
    %129 = arith.mulf %124, %128 : vector<8x16xf32>
    %130 = vector.extract_strided_slice %57 {offsets = [0, 16], sizes = [16, 8], strides = [1, 1]} : vector<16x32xf32> to vector<16x8xf32>
    %131 = arith.truncf %129 : vector<8x16xf32> to vector<8x16xbf16>
    %132 = arith.truncf %130 : vector<16x8xf32> to vector<16x8xbf16>
    %cst_46 = arith.constant dense<0.000000e+00> : vector<8x8xf32>
    %133 = tpu.matmul %131, %132, %cst_46 {dimension_numbers = #tpu.dot_dimension_numbers<[1], [0], [0], [1], [0, 0, 1, 1], [], []>} : vector<8x16xbf16>, vector<16x8xbf16>, vector<8x8xf32> -> vector<8x8xf32>
    %134 = vector.extract_strided_slice %58 {offsets = [16, 0], sizes = [8, 32], strides = [1, 1]} : vector<32x32xf32> to vector<8x32xf32>
    %135 = arith.truncf %133 : vector<8x8xf32> to vector<8x8xbf16>
    %136 = arith.truncf %134 : vector<8x32xf32> to vector<8x32xbf16>
    %cst_47 = arith.constant dense<0.000000e+00> : vector<8x32xf32>
    %137 = tpu.matmul %135, %136, %cst_47 {dimension_numbers = #tpu.dot_dimension_numbers<[1], [0], [0], [1], [0, 0, 1, 1], [], []>} : vector<8x8xbf16>, vector<8x32xbf16>, vector<8x32xf32> -> vector<8x32xf32>
    %138 = arith.addf %111, %137 : vector<8x32xf32>
    %139 = vector.extract_strided_slice %49 {offsets = [0, 24], sizes = [8, 8], strides = [1, 1]} : vector<8x32xf32> to vector<8x8xf32>
    %140 = vector.extract_strided_slice %54 {offsets = [0, 24], sizes = [16, 8], strides = [1, 1]} : vector<16x32xf32> to vector<16x8xf32>
    %141 = arith.truncf %139 : vector<8x8xf32> to vector<8x8xbf16>
    %142 = arith.truncf %140 : vector<16x8xf32> to vector<16x8xbf16>
    %cst_48 = arith.constant dense<0.000000e+00> : vector<8x16xf32>
    %143 = tpu.matmul %141, %142, %cst_48 {dimension_numbers = #tpu.dot_dimension_numbers<[1], [1], [0], [0], [0, 0, 1, 0], [], []>} : vector<8x8xbf16>, vector<16x8xbf16>, vector<8x16xf32> -> vector<8x16xf32>
    %cst_49 = arith.constant 0.353553385 : f32
    %144 = vector.broadcast %cst_49 : f32 to vector<8x16xf32>
    %145 = arith.mulf %143, %144 : vector<8x16xf32>
    %146 = arith.addf %145, %17 : vector<8x16xf32>
    %cst_50 = arith.constant dense<0xFF800000> : vector<8xf32>
    %147 = vector.multi_reduction <maximumf>, %146, %cst_50 [1] : vector<8x16xf32> to vector<8xf32>
    %148 = vector.shape_cast %147 : vector<8xf32> to vector<8x1xf32>
    %149 = vector.broadcast %148 : vector<8x1xf32> to vector<8x16xf32>
    %150 = arith.subf %146, %149 : vector<8x16xf32>
    %151 = math.exp %150 : vector<8x16xf32>
    %cst_51 = arith.constant dense<0.000000e+00> : vector<8xf32>
    %152 = vector.multi_reduction <add>, %151, %cst_51 [1] : vector<8x16xf32> to vector<8xf32>
    %153 = vector.shape_cast %152 : vector<8xf32> to vector<8x1xf32>
    %154 = tpu.reciprocal %153 {approx = true} : vector<8x1xf32> -> vector<8x1xf32>
    %155 = vector.broadcast %154 : vector<8x1xf32> to vector<8x16xf32>
    %156 = arith.mulf %151, %155 : vector<8x16xf32>
    %157 = vector.extract_strided_slice %57 {offsets = [0, 24], sizes = [16, 8], strides = [1, 1]} : vector<16x32xf32> to vector<16x8xf32>
    %158 = arith.truncf %156 : vector<8x16xf32> to vector<8x16xbf16>
    %159 = arith.truncf %157 : vector<16x8xf32> to vector<16x8xbf16>
    %cst_52 = arith.constant dense<0.000000e+00> : vector<8x8xf32>
    %160 = tpu.matmul %158, %159, %cst_52 {dimension_numbers = #tpu.dot_dimension_numbers<[1], [0], [0], [1], [0, 0, 1, 1], [], []>} : vector<8x16xbf16>, vector<16x8xbf16>, vector<8x8xf32> -> vector<8x8xf32>
    %161 = vector.extract_strided_slice %58 {offsets = [24, 0], sizes = [8, 32], strides = [1, 1]} : vector<32x32xf32> to vector<8x32xf32>
    %162 = arith.truncf %160 : vector<8x8xf32> to vector<8x8xbf16>
    %163 = arith.truncf %161 : vector<8x32xf32> to vector<8x32xbf16>
    %cst_53 = arith.constant dense<0.000000e+00> : vector<8x32xf32>
    %164 = tpu.matmul %162, %163, %cst_53 {dimension_numbers = #tpu.dot_dimension_numbers<[1], [0], [0], [1], [0, 0, 1, 1], [], []>} : vector<8x8xbf16>, vector<8x32xbf16>, vector<8x32xf32> -> vector<8x32xf32>
    %165 = arith.addf %138, %164 : vector<8x32xf32>
    %c0_54 = arith.constant 0 : index
    %c0_55 = arith.constant 0 : index
    %166 = vector.load %arg8[%c0_54, %c0_55] : memref<1x32xf32, #tpu.memory_space<vmem>>, vector<1x32xf32>
    %167 = vector.broadcast %166 : vector<1x32xf32> to vector<8x32xf32>
    %168 = arith.addf %165, %167 : vector<8x32xf32>
    %169 = arith.addf %1, %168 : vector<8x32xf32>
    %c0_56 = arith.constant 0 : index
    %c0_57 = arith.constant 0 : index
    %170 = vector.load %arg15[%c0_56, %c0_57] : memref<1x32xf32, #tpu.memory_space<vmem>>, vector<1x32xf32>
    %c0_58 = arith.constant 0 : index
    %c0_59 = arith.constant 0 : index
    %171 = vector.load %arg16[%c0_58, %c0_59] : memref<1x32xf32, #tpu.memory_space<vmem>>, vector<1x32xf32>
    %cst_60 = arith.constant dense<0.000000e+00> : vector<8xf32>
    %172 = vector.multi_reduction <add>, %169, %cst_60 [1] : vector<8x32xf32> to vector<8xf32>
    %173 = vector.shape_cast %172 : vector<8xf32> to vector<8x1xf32>
    %cst_61 = arith.constant 3.200000e+01 : f32
    %174 = vector.broadcast %cst_61 : f32 to vector<8x1xf32>
    %175 = arith.divf %173, %174 : vector<8x1xf32>
    %176 = vector.broadcast %175 : vector<8x1xf32> to vector<8x32xf32>
    %177 = arith.subf %169, %176 : vector<8x32xf32>
    %178 = arith.mulf %177, %177 : vector<8x32xf32>
    %cst_62 = arith.constant dense<0.000000e+00> : vector<8xf32>
    %179 = vector.multi_reduction <add>, %178, %cst_62 [1] : vector<8x32xf32> to vector<8xf32>
    %180 = vector.shape_cast %179 : vector<8xf32> to vector<8x1xf32>
    %cst_63 = arith.constant 3.200000e+01 : f32
    %181 = vector.broadcast %cst_63 : f32 to vector<8x1xf32>
    %182 = arith.divf %180, %181 : vector<8x1xf32>
    %183 = vector.broadcast %175 : vector<8x1xf32> to vector<8x32xf32>
    %184 = arith.subf %169, %183 : vector<8x32xf32>
    %cst_64 = arith.constant 9.99999974E-6 : f32
    %185 = vector.broadcast %cst_64 : f32 to vector<8x1xf32>
    %186 = arith.addf %182, %185 : vector<8x1xf32>
    %187 = math.rsqrt %186 : vector<8x1xf32>
    %188 = vector.broadcast %187 : vector<8x1xf32> to vector<8x32xf32>
    %189 = arith.mulf %184, %188 : vector<8x32xf32>
    %190 = vector.broadcast %170 : vector<1x32xf32> to vector<8x32xf32>
    %191 = arith.mulf %189, %190 : vector<8x32xf32>
    %192 = vector.broadcast %171 : vector<1x32xf32> to vector<8x32xf32>
    %193 = arith.addf %191, %192 : vector<8x32xf32>
    %c0_65 = arith.constant 0 : index
    %c0_66 = arith.constant 0 : index
    %194 = vector.load %arg11[%c0_65, %c0_66] : memref<32x128xf32, #tpu.memory_space<vmem>>, vector<32x128xf32>
    %195 = arith.truncf %193 : vector<8x32xf32> to vector<8x32xbf16>
    %196 = arith.truncf %194 : vector<32x128xf32> to vector<32x128xbf16>
    %cst_67 = arith.constant dense<0.000000e+00> : vector<8x128xf32>
    %197 = tpu.matmul %195, %196, %cst_67 {dimension_numbers = #tpu.dot_dimension_numbers<[1], [0], [0], [1], [0, 0, 1, 1], [], []>} : vector<8x32xbf16>, vector<32x128xbf16>, vector<8x128xf32> -> vector<8x128xf32>
    %c0_68 = arith.constant 0 : index
    %c0_69 = arith.constant 0 : index
    %198 = vector.load %arg12[%c0_68, %c0_69] : memref<1x128xf32, #tpu.memory_space<vmem>>, vector<1x128xf32>
    %199 = vector.broadcast %198 : vector<1x128xf32> to vector<8x128xf32>
    %200 = arith.addf %197, %199 : vector<8x128xf32>
    %cst_70 = arith.constant 5.000000e-01 : f32
    %201 = vector.broadcast %cst_70 : f32 to vector<8x128xf32>
    %202 = arith.mulf %201, %200 : vector<8x128xf32>
    %cst_71 = arith.constant 4.471500e-02 : f32
    %203 = vector.broadcast %cst_71 : f32 to vector<8x128xf32>
    %204 = arith.mulf %203, %200 : vector<8x128xf32>
    %205 = arith.mulf %204, %200 : vector<8x128xf32>
    %206 = arith.mulf %205, %200 : vector<8x128xf32>
    %207 = arith.addf %200, %206 : vector<8x128xf32>
    %cst_72 = arith.constant 0.797884583 : f32
    %208 = vector.broadcast %cst_72 : f32 to vector<8x128xf32>
    %209 = arith.mulf %208, %207 : vector<8x128xf32>
    %210 = math.tanh %209 : vector<8x128xf32>
    %cst_73 = arith.constant 1.000000e+00 : f32
    %211 = vector.broadcast %cst_73 : f32 to vector<8x128xf32>
    %212 = arith.addf %211, %210 : vector<8x128xf32>
    %213 = arith.mulf %202, %212 : vector<8x128xf32>
    %c0_74 = arith.constant 0 : index
    %c0_75 = arith.constant 0 : index
    %214 = vector.load %arg13[%c0_74, %c0_75] : memref<128x32xf32, #tpu.memory_space<vmem>>, vector<128x32xf32>
    %215 = arith.truncf %213 : vector<8x128xf32> to vector<8x128xbf16>
    %216 = arith.truncf %214 : vector<128x32xf32> to vector<128x32xbf16>
    %cst_76 = arith.constant dense<0.000000e+00> : vector<8x32xf32>
    %217 = tpu.matmul %215, %216, %cst_76 {dimension_numbers = #tpu.dot_dimension_numbers<[1], [0], [0], [1], [0, 0, 1, 1], [], []>} : vector<8x128xbf16>, vector<128x32xbf16>, vector<8x32xf32> -> vector<8x32xf32>
    %c0_77 = arith.constant 0 : index
    %c0_78 = arith.constant 0 : index
    %218 = vector.load %arg14[%c0_77, %c0_78] : memref<1x32xf32, #tpu.memory_space<vmem>>, vector<1x32xf32>
    %219 = vector.broadcast %218 : vector<1x32xf32> to vector<8x32xf32>
    %220 = arith.addf %217, %219 : vector<8x32xf32>
    %221 = arith.addf %169, %220 : vector<8x32xf32>
    %c0_79 = arith.constant 0 : index
    %c0_80 = arith.constant 0 : index
    %c0_81 = arith.constant 0 : index
    %222 = vector.load %arg17[%c0_79, %c0_80, %c0_81] : memref<1x8x32xf32, #tpu.memory_space<vmem>>, vector<1x8x32xf32>
    %223 = vector.shape_cast %222 : vector<1x8x32xf32> to vector<8x32xf32>
    %224 = vector.shape_cast %221 : vector<8x32xf32> to vector<1x8x32xf32>
    tpu.vector_store %arg17[%c0_79, %c0_80, %c0_81], %224 {strides = array<i32>} : memref<1x8x32xf32, #tpu.memory_space<vmem>>, vector<1x8x32xf32>,
    return
  }
  func.func @transform_0(%arg0: i32) -> (i32, i32, i32) {
    %c0_i32 = arith.constant 0 : i32
    %c0_i32_0 = arith.constant 0 : i32
    %c0_i32_1 = arith.constant 0 : i32
    return %arg0, %c0_i32, %c0_i32_0 : i32, i32, i32
  }
  func.func @transform_1(%arg0: i32) -> (i32, i32, i32) {
    %c0_i32 = arith.constant 0 : i32
    %c0_i32_0 = arith.constant 0 : i32
    %c0_i32_1 = arith.constant 0 : i32
    return %arg0, %c0_i32, %c0_i32_0 : i32, i32, i32
  }
  func.func @transform_2(%arg0: i32) -> (i32, i32, i32) {
    %c0_i32 = arith.constant 0 : i32
    %c0_i32_0 = arith.constant 0 : i32
    %c0_i32_1 = arith.constant 0 : i32
    return %arg0, %c0_i32, %c0_i32_0 : i32, i32, i32
  }
  func.func @transform_3(%arg0: i32) -> (i32, i32, i32) {
    %c0_i32 = arith.constant 0 : i32
    %c0_i32_0 = arith.constant 0 : i32
    %c0_i32_1 = arith.constant 0 : i32
    return %arg0, %c0_i32, %c0_i32_0 : i32, i32, i32
  }
  func.func @transform_4(%arg0: i32) -> (i32, i32) {
    %c0_i32 = arith.constant 0 : i32
    %c0_i32_0 = arith.constant 0 : i32
    %c0_i32_1 = arith.constant 0 : i32
    return %c0_i32, %c0_i32_0 : i32, i32
  }
  func.func @transform_5(%arg0: i32) -> (i32, i32) {
    %c0_i32 = arith.constant 0 : i32
    %c0_i32_0 = arith.constant 0 : i32
    %c0_i32_1 = arith.constant 0 : i32
    return %c0_i32, %c0_i32_0 : i32, i32
  }
  func.func @transform_6(%arg0: i32) -> (i32, i32) {
    %c0_i32 = arith.constant 0 : i32
    %c0_i32_0 = arith.constant 0 : i32
    %c0_i32_1 = arith.constant 0 : i32
    return %c0_i32, %c0_i32_0 : i32, i32
  }
  func.func @transform_7(%arg0: i32) -> (i32, i32) {
    %c0_i32 = arith.constant 0 : i32
    %c0_i32_0 = arith.constant 0 : i32
    %c0_i32_1 = arith.constant 0 : i32
    return %c0_i32, %c0_i32_0 : i32, i32
  }
  func.func @transform_8(%arg0: i32) -> (i32, i32) {
    %c0_i32 = arith.constant 0 : i32
    %c0_i32_0 = arith.constant 0 : i32
    %c0_i32_1 = arith.constant 0 : i32
    return %c0_i32, %c0_i32_0 : i32, i32
  }
  func.func @transform_9(%arg0: i32) -> (i32, i32) {
    %c0_i32 = arith.constant 0 : i32
    %c0_i32_0 = arith.constant 0 : i32
    %c0_i32_1 = arith.constant 0 : i32
    return %c0_i32, %c0_i32_0 : i32, i32
  }
  func.func @transform_10(%arg0: i32) -> (i32, i32) {
    %c0_i32 = arith.constant 0 : i32
    %c0_i32_0 = arith.constant 0 : i32
    %c0_i32_1 = arith.constant 0 : i32
    return %c0_i32, %c0_i32_0 : i32, i32
  }
  func.func @transform_11(%arg0: i32) -> (i32, i32) {
    %c0_i32 = arith.constant 0 : i32
    %c0_i32_0 = arith.constant 0 : i32
    %c0_i32_1 = arith.constant 0 : i32
    return %c0_i32, %c0_i32_0 : i32, i32
  }
  func.func @transform_12(%arg0: i32) -> (i32, i32) {
    %c0_i32 = arith.constant 0 : i32
    %c0_i32_0 = arith.constant 0 : i32
    %c0_i32_1 = arith.constant 0 : i32
    return %c0_i32, %c0_i32_0 : i32, i32
  }
  func.func @transform_13(%arg0: i32) -> (i32, i32) {
    %c0_i32 = arith.constant 0 : i32
    %c0_i32_0 = arith.constant 0 : i32
    %c0_i32_1 = arith.constant 0 : i32
    return %c0_i32, %c0_i32_0 : i32, i32
  }
  func.func @transform_14(%arg0: i32) -> (i32, i32) {
    %c0_i32 = arith.constant 0 : i32
    %c0_i32_0 = arith.constant 0 : i32
    %c0_i32_1 = arith.constant 0 : i32
    return %c0_i32, %c0_i32_0 : i32, i32
  }
  func.func @transform_15(%arg0: i32) -> (i32, i32) {
    %c0_i32 = arith.constant 0 : i32
    %c0_i32_0 = arith.constant 0 : i32
    %c0_i32_1 = arith.constant 0 : i32
    return %c0_i32, %c0_i32_0 : i32, i32
  }
  func.func @transform_16(%arg0: i32) -> (i32, i32, i32) {
    %c0_i32 = arith.constant 0 : i32
    %c0_i32_0 = arith.constant 0 : i32
    %c0_i32_1 = arith.constant 0 : i32
    return %arg0, %c0_i32, %c0_i32_0 : i32, i32, i32
  }
}

module attributes {stable_mosaic.version = 11 : i64} {
  func.func @_lnf_lmhead_kernel(%arg0: i32, %arg1: memref<1x8x32xf32, #tpu.memory_space<vmem>>, %arg2: memref<1x32xf32, #tpu.memory_space<vmem>>, %arg3: memref<1x32xf32, #tpu.memory_space<vmem>>, %arg4: memref<64x32xf32, #tpu.memory_space<vmem>>, %arg5: memref<1x8x64xf32, #tpu.memory_space<vmem>>) attributes {dimension_semantics = [#tpu.dimension_semantics<parallel>], iteration_bounds = array<i64: 2>, scalar_prefetch = 0 : i64, scratch_operands = 0 : i64, tpu.core_type = #tpu.core_type<tc>, window_params = [{transform_indices = @transform_0, window_bounds = array<i64: 1, 8, 32>}, {pipeline_mode = #tpu.pipeline_mode<synchronous>, transform_indices = @transform_1, window_bounds = array<i64: 1, 32>}, {pipeline_mode = #tpu.pipeline_mode<synchronous>, transform_indices = @transform_2, window_bounds = array<i64: 1, 32>}, {pipeline_mode = #tpu.pipeline_mode<synchronous>, transform_indices = @transform_3, window_bounds = array<i64: 64, 32>}, {transform_indices = @transform_4, window_bounds = array<i64: 1, 8, 64>}]} {
    %c0 = arith.constant 0 : index
    %c0_0 = arith.constant 0 : index
    %c0_1 = arith.constant 0 : index
    %0 = vector.load %arg1[%c0, %c0_0, %c0_1] : memref<1x8x32xf32, #tpu.memory_space<vmem>>, vector<1x8x32xf32>
    %1 = vector.shape_cast %0 : vector<1x8x32xf32> to vector<8x32xf32>
    %c0_2 = arith.constant 0 : index
    %c0_3 = arith.constant 0 : index
    %2 = vector.load %arg2[%c0_2, %c0_3] : memref<1x32xf32, #tpu.memory_space<vmem>>, vector<1x32xf32>
    %c0_4 = arith.constant 0 : index
    %c0_5 = arith.constant 0 : index
    %3 = vector.load %arg3[%c0_4, %c0_5] : memref<1x32xf32, #tpu.memory_space<vmem>>, vector<1x32xf32>
    %cst = arith.constant dense<0.000000e+00> : vector<8xf32>
    %4 = vector.multi_reduction <add>, %1, %cst [1] : vector<8x32xf32> to vector<8xf32>
    %5 = vector.shape_cast %4 : vector<8xf32> to vector<8x1xf32>
    %cst_6 = arith.constant 3.200000e+01 : f32
    %6 = vector.broadcast %cst_6 : f32 to vector<8x1xf32>
    %7 = arith.divf %5, %6 : vector<8x1xf32>
    %8 = vector.broadcast %7 : vector<8x1xf32> to vector<8x32xf32>
    %9 = arith.subf %1, %8 : vector<8x32xf32>
    %10 = arith.mulf %9, %9 : vector<8x32xf32>
    %cst_7 = arith.constant dense<0.000000e+00> : vector<8xf32>
    %11 = vector.multi_reduction <add>, %10, %cst_7 [1] : vector<8x32xf32> to vector<8xf32>
    %12 = vector.shape_cast %11 : vector<8xf32> to vector<8x1xf32>
    %cst_8 = arith.constant 3.200000e+01 : f32
    %13 = vector.broadcast %cst_8 : f32 to vector<8x1xf32>
    %14 = arith.divf %12, %13 : vector<8x1xf32>
    %15 = vector.broadcast %7 : vector<8x1xf32> to vector<8x32xf32>
    %16 = arith.subf %1, %15 : vector<8x32xf32>
    %cst_9 = arith.constant 9.99999974E-6 : f32
    %17 = vector.broadcast %cst_9 : f32 to vector<8x1xf32>
    %18 = arith.addf %14, %17 : vector<8x1xf32>
    %19 = math.rsqrt %18 : vector<8x1xf32>
    %20 = vector.broadcast %19 : vector<8x1xf32> to vector<8x32xf32>
    %21 = arith.mulf %16, %20 : vector<8x32xf32>
    %22 = vector.broadcast %2 : vector<1x32xf32> to vector<8x32xf32>
    %23 = arith.mulf %21, %22 : vector<8x32xf32>
    %24 = vector.broadcast %3 : vector<1x32xf32> to vector<8x32xf32>
    %25 = arith.addf %23, %24 : vector<8x32xf32>
    %c0_10 = arith.constant 0 : index
    %c0_11 = arith.constant 0 : index
    %26 = vector.load %arg4[%c0_10, %c0_11] : memref<64x32xf32, #tpu.memory_space<vmem>>, vector<64x32xf32>
    %27 = arith.truncf %25 : vector<8x32xf32> to vector<8x32xbf16>
    %28 = arith.truncf %26 : vector<64x32xf32> to vector<64x32xbf16>
    %cst_12 = arith.constant dense<0.000000e+00> : vector<8x64xf32>
    %29 = tpu.matmul %27, %28, %cst_12 {dimension_numbers = #tpu.dot_dimension_numbers<[1], [1], [0], [0], [0, 0, 1, 0], [], []>} : vector<8x32xbf16>, vector<64x32xbf16>, vector<8x64xf32> -> vector<8x64xf32>
    %c0_13 = arith.constant 0 : index
    %c0_14 = arith.constant 0 : index
    %c0_15 = arith.constant 0 : index
    %30 = vector.load %arg5[%c0_13, %c0_14, %c0_15] : memref<1x8x64xf32, #tpu.memory_space<vmem>>, vector<1x8x64xf32>
    %31 = vector.shape_cast %30 : vector<1x8x64xf32> to vector<8x64xf32>
    %32 = vector.shape_cast %29 : vector<8x64xf32> to vector<1x8x64xf32>
    tpu.vector_store %arg5[%c0_13, %c0_14, %c0_15], %32 {strides = array<i32>} : memref<1x8x64xf32, #tpu.memory_space<vmem>>, vector<1x8x64xf32>,
    return
  }
  func.func @transform_0(%arg0: i32) -> (i32, i32, i32) {
    %c0_i32 = arith.constant 0 : i32
    %c0_i32_0 = arith.constant 0 : i32
    %c0_i32_1 = arith.constant 0 : i32
    return %arg0, %c0_i32, %c0_i32_0 : i32, i32, i32
  }
  func.func @transform_1(%arg0: i32) -> (i32, i32) {
    %c0_i32 = arith.constant 0 : i32
    %c0_i32_0 = arith.constant 0 : i32
    %c0_i32_1 = arith.constant 0 : i32
    return %c0_i32, %c0_i32_0 : i32, i32
  }
  func.func @transform_2(%arg0: i32) -> (i32, i32) {
    %c0_i32 = arith.constant 0 : i32
    %c0_i32_0 = arith.constant 0 : i32
    %c0_i32_1 = arith.constant 0 : i32
    return %c0_i32, %c0_i32_0 : i32, i32
  }
  func.func @transform_3(%arg0: i32) -> (i32, i32) {
    %c0_i32 = arith.constant 0 : i32
    %c0_i32_0 = arith.constant 0 : i32
    %c0_i32_1 = arith.constant 0 : i32
    return %c0_i32, %c0_i32_0 : i32, i32
  }
  func.func @transform_4(%arg0: i32) -> (i32, i32, i32) {
    %c0_i32 = arith.constant 0 : i32
    %c0_i32_0 = arith.constant 0 : i32
    %c0_i32_1 = arith.constant 0 : i32
    return %arg0, %c0_i32, %c0_i32_0 : i32, i32, i32
  }
}

module attributes {stable_mosaic.version = 11 : i64} {
  func.func @_enc_layer_kernel(%arg0: i32, %arg1: memref<1x1x8xf32, #tpu.memory_space<vmem>>, %arg2: memref<1x8x32xf32, #tpu.memory_space<vmem>>, %arg3: memref<32x96xf32, #tpu.memory_space<vmem>>, %arg4: memref<1x96xf32, #tpu.memory_space<vmem>>, %arg5: memref<32x32xf32, #tpu.memory_space<vmem>>, %arg6: memref<1x32xf32, #tpu.memory_space<vmem>>, %arg7: memref<1x32xf32, #tpu.memory_space<vmem>>, %arg8: memref<1x32xf32, #tpu.memory_space<vmem>>, %arg9: memref<32x128xf32, #tpu.memory_space<vmem>>, %arg10: memref<1x128xf32, #tpu.memory_space<vmem>>, %arg11: memref<128x32xf32, #tpu.memory_space<vmem>>, %arg12: memref<1x32xf32, #tpu.memory_space<vmem>>, %arg13: memref<1x32xf32, #tpu.memory_space<vmem>>, %arg14: memref<1x32xf32, #tpu.memory_space<vmem>>, %arg15: memref<1x8x32xf32, #tpu.memory_space<vmem>>, %arg16: memref<1x8x32xf32, #tpu.memory_space<vmem>>, %arg17: memref<1x8x32xf32, #tpu.memory_space<vmem>>) attributes {dimension_semantics = [#tpu.dimension_semantics<parallel>], iteration_bounds = array<i64: 2>, scalar_prefetch = 0 : i64, scratch_operands = 0 : i64, tpu.core_type = #tpu.core_type<tc>, window_params = [{transform_indices = @transform_0, window_bounds = array<i64: 1, 1, 8>}, {transform_indices = @transform_1, window_bounds = array<i64: 1, 8, 32>}, {pipeline_mode = #tpu.pipeline_mode<synchronous>, transform_indices = @transform_2, window_bounds = array<i64: 32, 96>}, {pipeline_mode = #tpu.pipeline_mode<synchronous>, transform_indices = @transform_3, window_bounds = array<i64: 1, 96>}, {pipeline_mode = #tpu.pipeline_mode<synchronous>, transform_indices = @transform_4, window_bounds = array<i64: 32, 32>}, {pipeline_mode = #tpu.pipeline_mode<synchronous>, transform_indices = @transform_5, window_bounds = array<i64: 1, 32>}, {pipeline_mode = #tpu.pipeline_mode<synchronous>, transform_indices = @transform_6, window_bounds = array<i64: 1, 32>}, {pipeline_mode = #tpu.pipeline_mode<synchronous>, transform_indices = @transform_7, window_bounds = array<i64: 1, 32>}, {pipeline_mode = #tpu.pipeline_mode<synchronous>, transform_indices = @transform_8, window_bounds = array<i64: 32, 128>}, {pipeline_mode = #tpu.pipeline_mode<synchronous>, transform_indices = @transform_9, window_bounds = array<i64: 1, 128>}, {pipeline_mode = #tpu.pipeline_mode<synchronous>, transform_indices = @transform_10, window_bounds = array<i64: 128, 32>}, {pipeline_mode = #tpu.pipeline_mode<synchronous>, transform_indices = @transform_11, window_bounds = array<i64: 1, 32>}, {pipeline_mode = #tpu.pipeline_mode<synchronous>, transform_indices = @transform_12, window_bounds = array<i64: 1, 32>}, {pipeline_mode = #tpu.pipeline_mode<synchronous>, transform_indices = @transform_13, window_bounds = array<i64: 1, 32>}, {transform_indices = @transform_14, window_bounds = array<i64: 1, 8, 32>}, {transform_indices = @transform_15, window_bounds = array<i64: 1, 8, 32>}, {transform_indices = @transform_16, window_bounds = array<i64: 1, 8, 32>}]} {
    %c0 = arith.constant 0 : index
    %c0_0 = arith.constant 0 : index
    %c0_1 = arith.constant 0 : index
    %0 = vector.load %arg2[%c0, %c0_0, %c0_1] : memref<1x8x32xf32, #tpu.memory_space<vmem>>, vector<1x8x32xf32>
    %1 = vector.shape_cast %0 : vector<1x8x32xf32> to vector<8x32xf32>
    %c0_2 = arith.constant 0 : index
    %c0_3 = arith.constant 0 : index
    %c0_4 = arith.constant 0 : index
    %2 = vector.load %arg1[%c0_2, %c0_3, %c0_4] : memref<1x1x8xf32, #tpu.memory_space<vmem>>, vector<1x1x8xf32>
    %3 = vector.shape_cast %2 : vector<1x1x8xf32> to vector<1x8xf32>
    %cst = arith.constant 1.000000e+00 : f32
    %4 = vector.broadcast %cst : f32 to vector<1x8xf32>
    %5 = arith.subf %4, %3 : vector<1x8xf32>
    %cst_5 = arith.constant -1.000000e+09 : f32
    %6 = vector.broadcast %cst_5 : f32 to vector<1x8xf32>
    %7 = arith.mulf %5, %6 : vector<1x8xf32>
    %c0_6 = arith.constant 0 : index
    %c0_7 = arith.constant 0 : index
    %8 = vector.load %arg3[%c0_6, %c0_7] : memref<32x96xf32, #tpu.memory_space<vmem>>, vector<32x96xf32>
    %9 = arith.truncf %1 : vector<8x32xf32> to vector<8x32xbf16>
    %10 = arith.truncf %8 : vector<32x96xf32> to vector<32x96xbf16>
    %cst_8 = arith.constant dense<0.000000e+00> : vector<8x96xf32>
    %11 = tpu.matmul %9, %10, %cst_8 {dimension_numbers = #tpu.dot_dimension_numbers<[1], [0], [0], [1], [0, 0, 1, 1], [], []>} : vector<8x32xbf16>, vector<32x96xbf16>, vector<8x96xf32> -> vector<8x96xf32>
    %c0_9 = arith.constant 0 : index
    %c0_10 = arith.constant 0 : index
    %12 = vector.load %arg4[%c0_9, %c0_10] : memref<1x96xf32, #tpu.memory_space<vmem>>, vector<1x96xf32>
    %13 = vector.broadcast %12 : vector<1x96xf32> to vector<8x96xf32>
    %14 = arith.addf %11, %13 : vector<8x96xf32>
    %15 = vector.extract_strided_slice %14 {offsets = [0, 0], sizes = [8, 32], strides = [1, 1]} : vector<8x96xf32> to vector<8x32xf32>
    %16 = vector.extract_strided_slice %14 {offsets = [0, 32], sizes = [8, 32], strides = [1, 1]} : vector<8x96xf32> to vector<8x32xf32>
    %17 = vector.extract_strided_slice %14 {offsets = [0, 64], sizes = [8, 32], strides = [1, 1]} : vector<8x96xf32> to vector<8x32xf32>
    %c0_11 = arith.constant 0 : index
    %c0_12 = arith.constant 0 : index
    %18 = vector.load %arg5[%c0_11, %c0_12] : memref<32x32xf32, #tpu.memory_space<vmem>>, vector<32x32xf32>
    %19 = vector.extract_strided_slice %15 {offsets = [0, 0], sizes = [8, 8], strides = [1, 1]} : vector<8x32xf32> to vector<8x8xf32>
    %20 = vector.extract_strided_slice %16 {offsets = [0, 0], sizes = [8, 8], strides = [1, 1]} : vector<8x32xf32> to vector<8x8xf32>
    %21 = arith.truncf %19 : vector<8x8xf32> to vector<8x8xbf16>
    %22 = arith.truncf %20 : vector<8x8xf32> to vector<8x8xbf16>
    %cst_13 = arith.constant dense<0.000000e+00> : vector<8x8xf32>
    %23 = tpu.matmul %21, %22, %cst_13 {dimension_numbers = #tpu.dot_dimension_numbers<[1], [1], [0], [0], [0, 0, 1, 0], [], []>} : vector<8x8xbf16>, vector<8x8xbf16>, vector<8x8xf32> -> vector<8x8xf32>
    %cst_14 = arith.constant 0.353553385 : f32
    %24 = vector.broadcast %cst_14 : f32 to vector<8x8xf32>
    %25 = arith.mulf %23, %24 : vector<8x8xf32>
    %26 = vector.broadcast %7 : vector<1x8xf32> to vector<8x8xf32>
    %27 = arith.addf %25, %26 : vector<8x8xf32>
    %cst_15 = arith.constant dense<0xFF800000> : vector<8xf32>
    %28 = vector.multi_reduction <maximumf>, %27, %cst_15 [1] : vector<8x8xf32> to vector<8xf32>
    %29 = vector.shape_cast %28 : vector<8xf32> to vector<8x1xf32>
    %30 = vector.broadcast %29 : vector<8x1xf32> to vector<8x8xf32>
    %31 = arith.subf %27, %30 : vector<8x8xf32>
    %32 = math.exp %31 : vector<8x8xf32>
    %cst_16 = arith.constant dense<0.000000e+00> : vector<8xf32>
    %33 = vector.multi_reduction <add>, %32, %cst_16 [1] : vector<8x8xf32> to vector<8xf32>
    %34 = vector.shape_cast %33 : vector<8xf32> to vector<8x1xf32>
    %35 = tpu.reciprocal %34 {approx = true} : vector<8x1xf32> -> vector<8x1xf32>
    %36 = vector.broadcast %35 : vector<8x1xf32> to vector<8x8xf32>
    %37 = arith.mulf %32, %36 : vector<8x8xf32>
    %38 = vector.extract_strided_slice %17 {offsets = [0, 0], sizes = [8, 8], strides = [1, 1]} : vector<8x32xf32> to vector<8x8xf32>
    %39 = arith.truncf %37 : vector<8x8xf32> to vector<8x8xbf16>
    %40 = arith.truncf %38 : vector<8x8xf32> to vector<8x8xbf16>
    %cst_17 = arith.constant dense<0.000000e+00> : vector<8x8xf32>
    %41 = tpu.matmul %39, %40, %cst_17 {dimension_numbers = #tpu.dot_dimension_numbers<[1], [0], [0], [1], [0, 0, 1, 1], [], []>} : vector<8x8xbf16>, vector<8x8xbf16>, vector<8x8xf32> -> vector<8x8xf32>
    %42 = vector.extract_strided_slice %18 {offsets = [0, 0], sizes = [8, 32], strides = [1, 1]} : vector<32x32xf32> to vector<8x32xf32>
    %43 = arith.truncf %41 : vector<8x8xf32> to vector<8x8xbf16>
    %44 = arith.truncf %42 : vector<8x32xf32> to vector<8x32xbf16>
    %cst_18 = arith.constant dense<0.000000e+00> : vector<8x32xf32>
    %45 = tpu.matmul %43, %44, %cst_18 {dimension_numbers = #tpu.dot_dimension_numbers<[1], [0], [0], [1], [0, 0, 1, 1], [], []>} : vector<8x8xbf16>, vector<8x32xbf16>, vector<8x32xf32> -> vector<8x32xf32>
    %46 = vector.extract_strided_slice %15 {offsets = [0, 8], sizes = [8, 8], strides = [1, 1]} : vector<8x32xf32> to vector<8x8xf32>
    %47 = vector.extract_strided_slice %16 {offsets = [0, 8], sizes = [8, 8], strides = [1, 1]} : vector<8x32xf32> to vector<8x8xf32>
    %48 = arith.truncf %46 : vector<8x8xf32> to vector<8x8xbf16>
    %49 = arith.truncf %47 : vector<8x8xf32> to vector<8x8xbf16>
    %cst_19 = arith.constant dense<0.000000e+00> : vector<8x8xf32>
    %50 = tpu.matmul %48, %49, %cst_19 {dimension_numbers = #tpu.dot_dimension_numbers<[1], [1], [0], [0], [0, 0, 1, 0], [], []>} : vector<8x8xbf16>, vector<8x8xbf16>, vector<8x8xf32> -> vector<8x8xf32>
    %cst_20 = arith.constant 0.353553385 : f32
    %51 = vector.broadcast %cst_20 : f32 to vector<8x8xf32>
    %52 = arith.mulf %50, %51 : vector<8x8xf32>
    %53 = vector.broadcast %7 : vector<1x8xf32> to vector<8x8xf32>
    %54 = arith.addf %52, %53 : vector<8x8xf32>
    %cst_21 = arith.constant dense<0xFF800000> : vector<8xf32>
    %55 = vector.multi_reduction <maximumf>, %54, %cst_21 [1] : vector<8x8xf32> to vector<8xf32>
    %56 = vector.shape_cast %55 : vector<8xf32> to vector<8x1xf32>
    %57 = vector.broadcast %56 : vector<8x1xf32> to vector<8x8xf32>
    %58 = arith.subf %54, %57 : vector<8x8xf32>
    %59 = math.exp %58 : vector<8x8xf32>
    %cst_22 = arith.constant dense<0.000000e+00> : vector<8xf32>
    %60 = vector.multi_reduction <add>, %59, %cst_22 [1] : vector<8x8xf32> to vector<8xf32>
    %61 = vector.shape_cast %60 : vector<8xf32> to vector<8x1xf32>
    %62 = tpu.reciprocal %61 {approx = true} : vector<8x1xf32> -> vector<8x1xf32>
    %63 = vector.broadcast %62 : vector<8x1xf32> to vector<8x8xf32>
    %64 = arith.mulf %59, %63 : vector<8x8xf32>
    %65 = vector.extract_strided_slice %17 {offsets = [0, 8], sizes = [8, 8], strides = [1, 1]} : vector<8x32xf32> to vector<8x8xf32>
    %66 = arith.truncf %64 : vector<8x8xf32> to vector<8x8xbf16>
    %67 = arith.truncf %65 : vector<8x8xf32> to vector<8x8xbf16>
    %cst_23 = arith.constant dense<0.000000e+00> : vector<8x8xf32>
    %68 = tpu.matmul %66, %67, %cst_23 {dimension_numbers = #tpu.dot_dimension_numbers<[1], [0], [0], [1], [0, 0, 1, 1], [], []>} : vector<8x8xbf16>, vector<8x8xbf16>, vector<8x8xf32> -> vector<8x8xf32>
    %69 = vector.extract_strided_slice %18 {offsets = [8, 0], sizes = [8, 32], strides = [1, 1]} : vector<32x32xf32> to vector<8x32xf32>
    %70 = arith.truncf %68 : vector<8x8xf32> to vector<8x8xbf16>
    %71 = arith.truncf %69 : vector<8x32xf32> to vector<8x32xbf16>
    %cst_24 = arith.constant dense<0.000000e+00> : vector<8x32xf32>
    %72 = tpu.matmul %70, %71, %cst_24 {dimension_numbers = #tpu.dot_dimension_numbers<[1], [0], [0], [1], [0, 0, 1, 1], [], []>} : vector<8x8xbf16>, vector<8x32xbf16>, vector<8x32xf32> -> vector<8x32xf32>
    %73 = arith.addf %45, %72 : vector<8x32xf32>
    %74 = vector.extract_strided_slice %15 {offsets = [0, 16], sizes = [8, 8], strides = [1, 1]} : vector<8x32xf32> to vector<8x8xf32>
    %75 = vector.extract_strided_slice %16 {offsets = [0, 16], sizes = [8, 8], strides = [1, 1]} : vector<8x32xf32> to vector<8x8xf32>
    %76 = arith.truncf %74 : vector<8x8xf32> to vector<8x8xbf16>
    %77 = arith.truncf %75 : vector<8x8xf32> to vector<8x8xbf16>
    %cst_25 = arith.constant dense<0.000000e+00> : vector<8x8xf32>
    %78 = tpu.matmul %76, %77, %cst_25 {dimension_numbers = #tpu.dot_dimension_numbers<[1], [1], [0], [0], [0, 0, 1, 0], [], []>} : vector<8x8xbf16>, vector<8x8xbf16>, vector<8x8xf32> -> vector<8x8xf32>
    %cst_26 = arith.constant 0.353553385 : f32
    %79 = vector.broadcast %cst_26 : f32 to vector<8x8xf32>
    %80 = arith.mulf %78, %79 : vector<8x8xf32>
    %81 = vector.broadcast %7 : vector<1x8xf32> to vector<8x8xf32>
    %82 = arith.addf %80, %81 : vector<8x8xf32>
    %cst_27 = arith.constant dense<0xFF800000> : vector<8xf32>
    %83 = vector.multi_reduction <maximumf>, %82, %cst_27 [1] : vector<8x8xf32> to vector<8xf32>
    %84 = vector.shape_cast %83 : vector<8xf32> to vector<8x1xf32>
    %85 = vector.broadcast %84 : vector<8x1xf32> to vector<8x8xf32>
    %86 = arith.subf %82, %85 : vector<8x8xf32>
    %87 = math.exp %86 : vector<8x8xf32>
    %cst_28 = arith.constant dense<0.000000e+00> : vector<8xf32>
    %88 = vector.multi_reduction <add>, %87, %cst_28 [1] : vector<8x8xf32> to vector<8xf32>
    %89 = vector.shape_cast %88 : vector<8xf32> to vector<8x1xf32>
    %90 = tpu.reciprocal %89 {approx = true} : vector<8x1xf32> -> vector<8x1xf32>
    %91 = vector.broadcast %90 : vector<8x1xf32> to vector<8x8xf32>
    %92 = arith.mulf %87, %91 : vector<8x8xf32>
    %93 = vector.extract_strided_slice %17 {offsets = [0, 16], sizes = [8, 8], strides = [1, 1]} : vector<8x32xf32> to vector<8x8xf32>
    %94 = arith.truncf %92 : vector<8x8xf32> to vector<8x8xbf16>
    %95 = arith.truncf %93 : vector<8x8xf32> to vector<8x8xbf16>
    %cst_29 = arith.constant dense<0.000000e+00> : vector<8x8xf32>
    %96 = tpu.matmul %94, %95, %cst_29 {dimension_numbers = #tpu.dot_dimension_numbers<[1], [0], [0], [1], [0, 0, 1, 1], [], []>} : vector<8x8xbf16>, vector<8x8xbf16>, vector<8x8xf32> -> vector<8x8xf32>
    %97 = vector.extract_strided_slice %18 {offsets = [16, 0], sizes = [8, 32], strides = [1, 1]} : vector<32x32xf32> to vector<8x32xf32>
    %98 = arith.truncf %96 : vector<8x8xf32> to vector<8x8xbf16>
    %99 = arith.truncf %97 : vector<8x32xf32> to vector<8x32xbf16>
    %cst_30 = arith.constant dense<0.000000e+00> : vector<8x32xf32>
    %100 = tpu.matmul %98, %99, %cst_30 {dimension_numbers = #tpu.dot_dimension_numbers<[1], [0], [0], [1], [0, 0, 1, 1], [], []>} : vector<8x8xbf16>, vector<8x32xbf16>, vector<8x32xf32> -> vector<8x32xf32>
    %101 = arith.addf %73, %100 : vector<8x32xf32>
    %102 = vector.extract_strided_slice %15 {offsets = [0, 24], sizes = [8, 8], strides = [1, 1]} : vector<8x32xf32> to vector<8x8xf32>
    %103 = vector.extract_strided_slice %16 {offsets = [0, 24], sizes = [8, 8], strides = [1, 1]} : vector<8x32xf32> to vector<8x8xf32>
    %104 = arith.truncf %102 : vector<8x8xf32> to vector<8x8xbf16>
    %105 = arith.truncf %103 : vector<8x8xf32> to vector<8x8xbf16>
    %cst_31 = arith.constant dense<0.000000e+00> : vector<8x8xf32>
    %106 = tpu.matmul %104, %105, %cst_31 {dimension_numbers = #tpu.dot_dimension_numbers<[1], [1], [0], [0], [0, 0, 1, 0], [], []>} : vector<8x8xbf16>, vector<8x8xbf16>, vector<8x8xf32> -> vector<8x8xf32>
    %cst_32 = arith.constant 0.353553385 : f32
    %107 = vector.broadcast %cst_32 : f32 to vector<8x8xf32>
    %108 = arith.mulf %106, %107 : vector<8x8xf32>
    %109 = vector.broadcast %7 : vector<1x8xf32> to vector<8x8xf32>
    %110 = arith.addf %108, %109 : vector<8x8xf32>
    %cst_33 = arith.constant dense<0xFF800000> : vector<8xf32>
    %111 = vector.multi_reduction <maximumf>, %110, %cst_33 [1] : vector<8x8xf32> to vector<8xf32>
    %112 = vector.shape_cast %111 : vector<8xf32> to vector<8x1xf32>
    %113 = vector.broadcast %112 : vector<8x1xf32> to vector<8x8xf32>
    %114 = arith.subf %110, %113 : vector<8x8xf32>
    %115 = math.exp %114 : vector<8x8xf32>
    %cst_34 = arith.constant dense<0.000000e+00> : vector<8xf32>
    %116 = vector.multi_reduction <add>, %115, %cst_34 [1] : vector<8x8xf32> to vector<8xf32>
    %117 = vector.shape_cast %116 : vector<8xf32> to vector<8x1xf32>
    %118 = tpu.reciprocal %117 {approx = true} : vector<8x1xf32> -> vector<8x1xf32>
    %119 = vector.broadcast %118 : vector<8x1xf32> to vector<8x8xf32>
    %120 = arith.mulf %115, %119 : vector<8x8xf32>
    %121 = vector.extract_strided_slice %17 {offsets = [0, 24], sizes = [8, 8], strides = [1, 1]} : vector<8x32xf32> to vector<8x8xf32>
    %122 = arith.truncf %120 : vector<8x8xf32> to vector<8x8xbf16>
    %123 = arith.truncf %121 : vector<8x8xf32> to vector<8x8xbf16>
    %cst_35 = arith.constant dense<0.000000e+00> : vector<8x8xf32>
    %124 = tpu.matmul %122, %123, %cst_35 {dimension_numbers = #tpu.dot_dimension_numbers<[1], [0], [0], [1], [0, 0, 1, 1], [], []>} : vector<8x8xbf16>, vector<8x8xbf16>, vector<8x8xf32> -> vector<8x8xf32>
    %125 = vector.extract_strided_slice %18 {offsets = [24, 0], sizes = [8, 32], strides = [1, 1]} : vector<32x32xf32> to vector<8x32xf32>
    %126 = arith.truncf %124 : vector<8x8xf32> to vector<8x8xbf16>
    %127 = arith.truncf %125 : vector<8x32xf32> to vector<8x32xbf16>
    %cst_36 = arith.constant dense<0.000000e+00> : vector<8x32xf32>
    %128 = tpu.matmul %126, %127, %cst_36 {dimension_numbers = #tpu.dot_dimension_numbers<[1], [0], [0], [1], [0, 0, 1, 1], [], []>} : vector<8x8xbf16>, vector<8x32xbf16>, vector<8x32xf32> -> vector<8x32xf32>
    %129 = arith.addf %101, %128 : vector<8x32xf32>
    %c0_37 = arith.constant 0 : index
    %c0_38 = arith.constant 0 : index
    %130 = vector.load %arg6[%c0_37, %c0_38] : memref<1x32xf32, #tpu.memory_space<vmem>>, vector<1x32xf32>
    %131 = vector.broadcast %130 : vector<1x32xf32> to vector<8x32xf32>
    %132 = arith.addf %129, %131 : vector<8x32xf32>
    %133 = arith.addf %1, %132 : vector<8x32xf32>
    %c0_39 = arith.constant 0 : index
    %c0_40 = arith.constant 0 : index
    %134 = vector.load %arg7[%c0_39, %c0_40] : memref<1x32xf32, #tpu.memory_space<vmem>>, vector<1x32xf32>
    %c0_41 = arith.constant 0 : index
    %c0_42 = arith.constant 0 : index
    %135 = vector.load %arg8[%c0_41, %c0_42] : memref<1x32xf32, #tpu.memory_space<vmem>>, vector<1x32xf32>
    %cst_43 = arith.constant dense<0.000000e+00> : vector<8xf32>
    %136 = vector.multi_reduction <add>, %133, %cst_43 [1] : vector<8x32xf32> to vector<8xf32>
    %137 = vector.shape_cast %136 : vector<8xf32> to vector<8x1xf32>
    %cst_44 = arith.constant 3.200000e+01 : f32
    %138 = vector.broadcast %cst_44 : f32 to vector<8x1xf32>
    %139 = arith.divf %137, %138 : vector<8x1xf32>
    %140 = vector.broadcast %139 : vector<8x1xf32> to vector<8x32xf32>
    %141 = arith.subf %133, %140 : vector<8x32xf32>
    %142 = arith.mulf %141, %141 : vector<8x32xf32>
    %cst_45 = arith.constant dense<0.000000e+00> : vector<8xf32>
    %143 = vector.multi_reduction <add>, %142, %cst_45 [1] : vector<8x32xf32> to vector<8xf32>
    %144 = vector.shape_cast %143 : vector<8xf32> to vector<8x1xf32>
    %cst_46 = arith.constant 3.200000e+01 : f32
    %145 = vector.broadcast %cst_46 : f32 to vector<8x1xf32>
    %146 = arith.divf %144, %145 : vector<8x1xf32>
    %147 = vector.broadcast %139 : vector<8x1xf32> to vector<8x32xf32>
    %148 = arith.subf %133, %147 : vector<8x32xf32>
    %cst_47 = arith.constant 9.99999974E-6 : f32
    %149 = vector.broadcast %cst_47 : f32 to vector<8x1xf32>
    %150 = arith.addf %146, %149 : vector<8x1xf32>
    %151 = math.rsqrt %150 : vector<8x1xf32>
    %152 = vector.broadcast %151 : vector<8x1xf32> to vector<8x32xf32>
    %153 = arith.mulf %148, %152 : vector<8x32xf32>
    %154 = vector.broadcast %134 : vector<1x32xf32> to vector<8x32xf32>
    %155 = arith.mulf %153, %154 : vector<8x32xf32>
    %156 = vector.broadcast %135 : vector<1x32xf32> to vector<8x32xf32>
    %157 = arith.addf %155, %156 : vector<8x32xf32>
    %c0_48 = arith.constant 0 : index
    %c0_49 = arith.constant 0 : index
    %158 = vector.load %arg9[%c0_48, %c0_49] : memref<32x128xf32, #tpu.memory_space<vmem>>, vector<32x128xf32>
    %159 = arith.truncf %157 : vector<8x32xf32> to vector<8x32xbf16>
    %160 = arith.truncf %158 : vector<32x128xf32> to vector<32x128xbf16>
    %cst_50 = arith.constant dense<0.000000e+00> : vector<8x128xf32>
    %161 = tpu.matmul %159, %160, %cst_50 {dimension_numbers = #tpu.dot_dimension_numbers<[1], [0], [0], [1], [0, 0, 1, 1], [], []>} : vector<8x32xbf16>, vector<32x128xbf16>, vector<8x128xf32> -> vector<8x128xf32>
    %c0_51 = arith.constant 0 : index
    %c0_52 = arith.constant 0 : index
    %162 = vector.load %arg10[%c0_51, %c0_52] : memref<1x128xf32, #tpu.memory_space<vmem>>, vector<1x128xf32>
    %163 = vector.broadcast %162 : vector<1x128xf32> to vector<8x128xf32>
    %164 = arith.addf %161, %163 : vector<8x128xf32>
    %cst_53 = arith.constant 5.000000e-01 : f32
    %165 = vector.broadcast %cst_53 : f32 to vector<8x128xf32>
    %166 = arith.mulf %165, %164 : vector<8x128xf32>
    %cst_54 = arith.constant 4.471500e-02 : f32
    %167 = vector.broadcast %cst_54 : f32 to vector<8x128xf32>
    %168 = arith.mulf %167, %164 : vector<8x128xf32>
    %169 = arith.mulf %168, %164 : vector<8x128xf32>
    %170 = arith.mulf %169, %164 : vector<8x128xf32>
    %171 = arith.addf %164, %170 : vector<8x128xf32>
    %cst_55 = arith.constant 0.797884583 : f32
    %172 = vector.broadcast %cst_55 : f32 to vector<8x128xf32>
    %173 = arith.mulf %172, %171 : vector<8x128xf32>
    %174 = math.tanh %173 : vector<8x128xf32>
    %cst_56 = arith.constant 1.000000e+00 : f32
    %175 = vector.broadcast %cst_56 : f32 to vector<8x128xf32>
    %176 = arith.addf %175, %174 : vector<8x128xf32>
    %177 = arith.mulf %166, %176 : vector<8x128xf32>
    %c0_57 = arith.constant 0 : index
    %c0_58 = arith.constant 0 : index
    %178 = vector.load %arg11[%c0_57, %c0_58] : memref<128x32xf32, #tpu.memory_space<vmem>>, vector<128x32xf32>
    %179 = arith.truncf %177 : vector<8x128xf32> to vector<8x128xbf16>
    %180 = arith.truncf %178 : vector<128x32xf32> to vector<128x32xbf16>
    %cst_59 = arith.constant dense<0.000000e+00> : vector<8x32xf32>
    %181 = tpu.matmul %179, %180, %cst_59 {dimension_numbers = #tpu.dot_dimension_numbers<[1], [0], [0], [1], [0, 0, 1, 1], [], []>} : vector<8x128xbf16>, vector<128x32xbf16>, vector<8x32xf32> -> vector<8x32xf32>
    %c0_60 = arith.constant 0 : index
    %c0_61 = arith.constant 0 : index
    %182 = vector.load %arg12[%c0_60, %c0_61] : memref<1x32xf32, #tpu.memory_space<vmem>>, vector<1x32xf32>
    %183 = vector.broadcast %182 : vector<1x32xf32> to vector<8x32xf32>
    %184 = arith.addf %181, %183 : vector<8x32xf32>
    %185 = arith.addf %157, %184 : vector<8x32xf32>
    %c0_62 = arith.constant 0 : index
    %c0_63 = arith.constant 0 : index
    %186 = vector.load %arg13[%c0_62, %c0_63] : memref<1x32xf32, #tpu.memory_space<vmem>>, vector<1x32xf32>
    %c0_64 = arith.constant 0 : index
    %c0_65 = arith.constant 0 : index
    %187 = vector.load %arg14[%c0_64, %c0_65] : memref<1x32xf32, #tpu.memory_space<vmem>>, vector<1x32xf32>
    %cst_66 = arith.constant dense<0.000000e+00> : vector<8xf32>
    %188 = vector.multi_reduction <add>, %185, %cst_66 [1] : vector<8x32xf32> to vector<8xf32>
    %189 = vector.shape_cast %188 : vector<8xf32> to vector<8x1xf32>
    %cst_67 = arith.constant 3.200000e+01 : f32
    %190 = vector.broadcast %cst_67 : f32 to vector<8x1xf32>
    %191 = arith.divf %189, %190 : vector<8x1xf32>
    %192 = vector.broadcast %191 : vector<8x1xf32> to vector<8x32xf32>
    %193 = arith.subf %185, %192 : vector<8x32xf32>
    %194 = arith.mulf %193, %193 : vector<8x32xf32>
    %cst_68 = arith.constant dense<0.000000e+00> : vector<8xf32>
    %195 = vector.multi_reduction <add>, %194, %cst_68 [1] : vector<8x32xf32> to vector<8xf32>
    %196 = vector.shape_cast %195 : vector<8xf32> to vector<8x1xf32>
    %cst_69 = arith.constant 3.200000e+01 : f32
    %197 = vector.broadcast %cst_69 : f32 to vector<8x1xf32>
    %198 = arith.divf %196, %197 : vector<8x1xf32>
    %199 = vector.broadcast %191 : vector<8x1xf32> to vector<8x32xf32>
    %200 = arith.subf %185, %199 : vector<8x32xf32>
    %cst_70 = arith.constant 9.99999974E-6 : f32
    %201 = vector.broadcast %cst_70 : f32 to vector<8x1xf32>
    %202 = arith.addf %198, %201 : vector<8x1xf32>
    %203 = math.rsqrt %202 : vector<8x1xf32>
    %204 = vector.broadcast %203 : vector<8x1xf32> to vector<8x32xf32>
    %205 = arith.mulf %200, %204 : vector<8x32xf32>
    %206 = vector.broadcast %186 : vector<1x32xf32> to vector<8x32xf32>
    %207 = arith.mulf %205, %206 : vector<8x32xf32>
    %208 = vector.broadcast %187 : vector<1x32xf32> to vector<8x32xf32>
    %209 = arith.addf %207, %208 : vector<8x32xf32>
    %c0_71 = arith.constant 0 : index
    %c0_72 = arith.constant 0 : index
    %c0_73 = arith.constant 0 : index
    %210 = vector.load %arg15[%c0_71, %c0_72, %c0_73] : memref<1x8x32xf32, #tpu.memory_space<vmem>>, vector<1x8x32xf32>
    %211 = vector.shape_cast %210 : vector<1x8x32xf32> to vector<8x32xf32>
    %212 = vector.shape_cast %209 : vector<8x32xf32> to vector<1x8x32xf32>
    tpu.vector_store %arg15[%c0_71, %c0_72, %c0_73], %212 {strides = array<i32>} : memref<1x8x32xf32, #tpu.memory_space<vmem>>, vector<1x8x32xf32>,
    %c0_74 = arith.constant 0 : index
    %c0_75 = arith.constant 0 : index
    %c0_76 = arith.constant 0 : index
    %213 = vector.load %arg16[%c0_74, %c0_75, %c0_76] : memref<1x8x32xf32, #tpu.memory_space<vmem>>, vector<1x8x32xf32>
    %214 = vector.shape_cast %213 : vector<1x8x32xf32> to vector<8x32xf32>
    %215 = vector.shape_cast %16 : vector<8x32xf32> to vector<1x8x32xf32>
    tpu.vector_store %arg16[%c0_74, %c0_75, %c0_76], %215 {strides = array<i32>} : memref<1x8x32xf32, #tpu.memory_space<vmem>>, vector<1x8x32xf32>,
    %c0_77 = arith.constant 0 : index
    %c0_78 = arith.constant 0 : index
    %c0_79 = arith.constant 0 : index
    %216 = vector.load %arg17[%c0_77, %c0_78, %c0_79] : memref<1x8x32xf32, #tpu.memory_space<vmem>>, vector<1x8x32xf32>
    %217 = vector.shape_cast %216 : vector<1x8x32xf32> to vector<8x32xf32>
    %218 = vector.shape_cast %17 : vector<8x32xf32> to vector<1x8x32xf32>
    tpu.vector_store %arg17[%c0_77, %c0_78, %c0_79], %218 {strides = array<i32>} : memref<1x8x32xf32, #tpu.memory_space<vmem>>, vector<1x8x32xf32>,
    return
  }
  func.func @transform_0(%arg0: i32) -> (i32, i32, i32) {
    %c0_i32 = arith.constant 0 : i32
    %c0_i32_0 = arith.constant 0 : i32
    %c0_i32_1 = arith.constant 0 : i32
    return %arg0, %c0_i32, %c0_i32_0 : i32, i32, i32
  }
  func.func @transform_1(%arg0: i32) -> (i32, i32, i32) {
    %c0_i32 = arith.constant 0 : i32
    %c0_i32_0 = arith.constant 0 : i32
    %c0_i32_1 = arith.constant 0 : i32
    return %arg0, %c0_i32, %c0_i32_0 : i32, i32, i32
  }
  func.func @transform_2(%arg0: i32) -> (i32, i32) {
    %c0_i32 = arith.constant 0 : i32
    %c0_i32_0 = arith.constant 0 : i32
    %c0_i32_1 = arith.constant 0 : i32
    return %c0_i32, %c0_i32_0 : i32, i32
  }
  func.func @transform_3(%arg0: i32) -> (i32, i32) {
    %c0_i32 = arith.constant 0 : i32
    %c0_i32_0 = arith.constant 0 : i32
    %c0_i32_1 = arith.constant 0 : i32
    return %c0_i32, %c0_i32_0 : i32, i32
  }
  func.func @transform_4(%arg0: i32) -> (i32, i32) {
    %c0_i32 = arith.constant 0 : i32
    %c0_i32_0 = arith.constant 0 : i32
    %c0_i32_1 = arith.constant 0 : i32
    return %c0_i32, %c0_i32_0 : i32, i32
  }
  func.func @transform_5(%arg0: i32) -> (i32, i32) {
    %c0_i32 = arith.constant 0 : i32
    %c0_i32_0 = arith.constant 0 : i32
    %c0_i32_1 = arith.constant 0 : i32
    return %c0_i32, %c0_i32_0 : i32, i32
  }
  func.func @transform_6(%arg0: i32) -> (i32, i32) {
    %c0_i32 = arith.constant 0 : i32
    %c0_i32_0 = arith.constant 0 : i32
    %c0_i32_1 = arith.constant 0 : i32
    return %c0_i32, %c0_i32_0 : i32, i32
  }
  func.func @transform_7(%arg0: i32) -> (i32, i32) {
    %c0_i32 = arith.constant 0 : i32
    %c0_i32_0 = arith.constant 0 : i32
    %c0_i32_1 = arith.constant 0 : i32
    return %c0_i32, %c0_i32_0 : i32, i32
  }
  func.func @transform_8(%arg0: i32) -> (i32, i32) {
    %c0_i32 = arith.constant 0 : i32
    %c0_i32_0 = arith.constant 0 : i32
    %c0_i32_1 = arith.constant 0 : i32
    return %c0_i32, %c0_i32_0 : i32, i32
  }
  func.func @transform_9(%arg0: i32) -> (i32, i32) {
    %c0_i32 = arith.constant 0 : i32
    %c0_i32_0 = arith.constant 0 : i32
    %c0_i32_1 = arith.constant 0 : i32
    return %c0_i32, %c0_i32_0 : i32, i32
  }
  func.func @transform_10(%arg0: i32) -> (i32, i32) {
    %c0_i32 = arith.constant 0 : i32
    %c0_i32_0 = arith.constant 0 : i32
    %c0_i32_1 = arith.constant 0 : i32
    return %c0_i32, %c0_i32_0 : i32, i32
  }
  func.func @transform_11(%arg0: i32) -> (i32, i32) {
    %c0_i32 = arith.constant 0 : i32
    %c0_i32_0 = arith.constant 0 : i32
    %c0_i32_1 = arith.constant 0 : i32
    return %c0_i32, %c0_i32_0 : i32, i32
  }
  func.func @transform_12(%arg0: i32) -> (i32, i32) {
    %c0_i32 = arith.constant 0 : i32
    %c0_i32_0 = arith.constant 0 : i32
    %c0_i32_1 = arith.constant 0 : i32
    return %c0_i32, %c0_i32_0 : i32, i32
  }
  func.func @transform_13(%arg0: i32) -> (i32, i32) {
    %c0_i32 = arith.constant 0 : i32
    %c0_i32_0 = arith.constant 0 : i32
    %c0_i32_1 = arith.constant 0 : i32
    return %c0_i32, %c0_i32_0 : i32, i32
  }
  func.func @transform_14(%arg0: i32) -> (i32, i32, i32) {
    %c0_i32 = arith.constant 0 : i32
    %c0_i32_0 = arith.constant 0 : i32
    %c0_i32_1 = arith.constant 0 : i32
    return %arg0, %c0_i32, %c0_i32_0 : i32, i32, i32
  }
  func.func @transform_15(%arg0: i32) -> (i32, i32, i32) {
    %c0_i32 = arith.constant 0 : i32
    %c0_i32_0 = arith.constant 0 : i32
    %c0_i32_1 = arith.constant 0 : i32
    return %arg0, %c0_i32, %c0_i32_0 : i32, i32, i32
  }
  func.func @transform_16(%arg0: i32) -> (i32, i32, i32) {
    %c0_i32 = arith.constant 0 : i32
    %c0_i32_0 = arith.constant 0 : i32
    %c0_i32_1 = arith.constant 0 : i32
    return %arg0, %c0_i32, %c0_i32_0 : i32, i32, i32
  }
}

</mosaic_0001>

<bundles_post_ra>
// kernel: bert_gpt_forward.9
= control target key start
LH: loop header
LB: loop body
LE: loop exit
PB: predicated region body
PF: predicated region fallthrough
CT: control target
= control target key end

     0   :  { %9 = vsyncpa [#allocation3], 0  ;;  %s668_s0 = inlined_call_operand.vmem [shape: f32[2,8,32], index: 0, kind: input, shape index: {}]   ;;  %s669_s1 = inlined_call_operand.vmem [shape: f32[1,32], index: 1, kind: input, shape index: {}]   ;;  %s670_s2 = inlined_call_operand.vmem [shape: f32[1,32], index: 2, kind: input, shape index: {}]   ;;  %s671_s3 = inlined_call_operand.vmem [shape: f32[64,32], index: 3, kind: input, shape index: {}]   ;;  %s672_s4 = inlined_call_operand.hbm [shape: f32[2,8,64], index: 4, kind: output, shape index: {}]  }
   0x1   :  { %11 = vsyncpa [#allocation3 + $0x1], 0  ;;  %s532_s15 = smov 0   ;;  %s534_s16 = smov 0  }
   0x2   :  { %s536_s17 = smov 0   ;;  %s538_s18 = smov 0  }
   0x3 LB: > { %s553_s19 = sadd.s32 4294967295, %s502_s18   ;;  %s369_s20 = sadd.s32 4294967294, %s502_s18   ;;  %s502_s18 = sphi %s538_s18, %s678_s18   ;;  %s498_s17 = sphi %s536_s17, %s677_s17   ;;  %s494_s16 = sphi %s534_s16, %s676_s16   ;;  %s490_s15 = sphi %s532_s15, %s675_s15  }
   0x4   : > { %s557_s21 = sadd.s32 1, %s502_s18   ;;  %s113_s22 = sadd.s32 1, %s498_s17 }
   0x5   : > { %s110_s23 = ssub.s32 %s502_s18, %s557_s21  ;;  %p123_p0 = scmp.ne.s32.totalorder %s498_s17, %s494_s16 }
   0x6   : > { %p111_p1 = scmp.eq.s32.totalorder %s110_s23, 0  ;;  %p124_p2 = scmp.eq.s32.totalorder %s553_s19, 1 }
   0x7   : > { %p129_p3 = scmp.ne.s32.totalorder %s494_s16, %s490_s15  ;;  %p130_p4 = scmp.eq.s32.totalorder %s369_s20, 1 }
   0x8   : > { %s568_s24 = scalar_select %p111_p1, %s498_s17, %s113_s22  }
   0x9   : > { %p570_p5 = por %p124_p2, %p123_p0  ;;  %p574_p6 = por %p130_p4, %p129_p3 }
   0xa   : > { %p372_p7 = scmp.ge.s32.totalorder %s502_s18, 1  ;;  %p164_p8 = scmp.lt.s32.totalorder %s502_s18, 3 }
   0xc   : > { %p165_p9 = pnand %p372_p7, %p164_p8 }
   0xd   : > { %p189_p10 = scmp.lt.s32.totalorder (!%p165_p9), %s553_s19, 1  ;;  %s186_s9 = sand.u32 (!%p165_p9), 1, %s494_s16  }
   0xe   : > { %168 = sbr.rel (%p165_p9) target bundleno = 543 (0x21f), region = 36  ;;  %s373_s10 = sshll.u32 (!%p165_p9), %s186_s9, 3 }
   0xf   : > { %s379_s11 = sshll.u32 (!%p165_p9), %s553_s19, 7  ;;  %s188_s12 = scalar_lea.vmem (!%p165_p9), [#allocation2], %s373_s10 }
  0x10   : > { %s310_s13 = sshll.u32 (!%p165_p9), %s188_s12, 4  ;;  %s627_s22 = scalar_lea.hbm (!%p165_p9), %s672_s4, %s379_s11  ;;  %s629_s13 = int_to_ptr.vmem [resolvable:$true] %s310_s13 }
  0x11   : > { %s297_s23 = scalar_lea.sflag (!%p165_p9), [#allocation3], %s186_s9 }
  0x13   : > { %s190_s27 = scalar_select %p189_p10, %s553_s19, 1  ;;  %vm197_vm0 = vcmask 261120   ;;  %v232_v2 = vld [vmem:[%s671_s3 + $0x30] sm:$0xff]  ;;  %v233_v3 = vld [vmem:[%s671_s3 + $0x38] sm:$0xff]  ;;  %v504_v4 = vmov 0.0   ;;  %v230_v12 = vld [vmem:[%s671_s3 + $0x20] sm:$0xff] }
  0x14   : > { %387 = vmatprep.subr.bf16.mxu0 %v504_v4  ;;  %v238_v5 = vpack.c.bf16 %v233_v3, %v232_v2  ;;  %v231_v13 = vld [vmem:[%s671_s3 + $0x28] sm:$0xff]  ;;  %v228_v16 = vld [vmem:[%s671_s3 + $0x10] sm:$0xff]  ;;  %v229_v17 = vld [vmem:[%s671_s3 + $0x18] sm:$0xff]  ;;  %vm505_vm1 = vmmov 0   ;;  %vm294_vm2 = vcmask 523264   ;;  %s506_s19 = smov [#allocation2]  }
  0x15   : > { %s374_s28 = sshll.u32 %s190_s27, 3  ;;  %v237_v14 = vpack.c.bf16 %v231_v13, %v230_v12  ;;  %v236_v18 = vpack.c.bf16 %v229_v17, %v228_v16  ;;  %395 = vmatprep.mubr.msk.bf16.mxu0 %vm505_vm1, %v504_v4  ;;  %v226_v20 = vld [vmem:[%s671_s3] sm:$0xff]  ;;  %v227_v21 = vld [vmem:[%s671_s3 + $0x8] sm:$0xff]  ;;  %s442_s27 = scalar_lea.vmem %s629_s13, 128 }
  0x16   : > { %s192_s5 = scalar_lea.vmem %s668_s0, %s374_s28  ;;  %v252_v6 = vsel %vm197_vm0, %v238_v5, 0  ;;  %v235_v22 = vpack.c.bf16 %v227_v21, %v226_v20  ;;  %v375_v28 = vld [vmem:[%s669_s1] ss:$0 sm:$0xff]  ;;  %p443_p11 = scmp.ne.s32.totalorder %s629_s13, %s442_s27 }
  0x17   : > { %v194_v0 = vld [vmem:[%s192_s5] sm:$0xff]  ;;  %388 = vmatpush3.bf16.xpose.msra.mxu0 %v252_v6  ;;  %v249_v15 = vsel %vm197_vm0, %v237_v14, 0  ;;  %v246_v19 = vsel %vm197_vm0, %v236_v18, 0  ;;  %s446_s28 = sshll.u32 %s506_s19, 4  ;;  %s447_s28 = int_to_ptr.vmem [resolvable:$false] %s446_s28 }
  0x18   : > { %v198_v1 = vsel %vm197_vm0, %v194_v0, 0.0  ;;  %389 = vmatprep.subr.bf16.mxu0 %v504_v4  ;;  %v243_v23 = vsel %vm197_vm0, %v235_v22, 0  ;;  %v376_v30 = vld [vmem:[%s670_s2] ss:$0 sm:$0xff]  ;;  %p444_p12 = pnand %p443_p11, %p570_p5  ;;  %s448_s29 = scalar_lea.vmem %s447_s28, 256 }
  0x19   : > { %199 = vadd.xlane.f32.xlu0 %v198_v1  ;;  %p449_p0 = scmp.lt.s32.totalorder %s629_s13, %s447_s28  ;;  %p450_p1 = scmp.lt.s32.totalorder %s448_s29, %s442_s27 }
  0x1a   : > { %p445_p13 = pneg %p444_p12 }
  0x1b   : > { %p451_p2 = por %p450_p1, %p449_p0 }
  0x1d   : > { %p452_p3 = pnand %p451_p2, %p445_p13 }
  0x1f   : > { %390 = vmatpush3.bf16.xpose.msra.mxu0 %v249_v15 }
  0x20   : > { %391 = vmatprep.subr.bf16.mxu0 %v504_v4 }
  0x27   : > { %392 = vmatpush3.bf16.xpose.msra.mxu0 %v246_v19 }
  0x28   : > { %393 = vmatprep.subr.bf16.mxu0 %v504_v4 }
  0x2f   : > { %394 = vmatpush3.bf16.xpose.msra.mxu0 %v243_v23 }
  0xa2   : > { %v200_v7 = vpop.xlane.xlu0 %199 }
  0xa3   : > { %v202_v8 = vmul.f32 0.03125, %v200_v7 }
  0xa5   : > { %v203_v9 = vsub.f32 %v194_v0, %v202_v8 }
  0xa7   : > { %v204_v10 = vmul.f32 %v203_v9, %v203_v9 }
  0xa9   : > { %v205_v11 = vsel %vm197_vm0, %v204_v10, 0.0 }
  0xaa   : > { %206 = vadd.xlane.f32.xlu0 %v205_v11 }
 0x133   : > { %v207_v24 = vpop.xlane.xlu0 %206 }
 0x134   : > { %v208_v25 = vmul.f32 0.03125, %v207_v24 }
 0x136   : > { %v209_v26 = vadd.f32 1e-05, %v208_v25 }
 0x138   : > { %440 = vrsqrt.f32 %v209_v26 }
 0x145   : > { %v441_v27 = vpop.eup %440 }
 0x146   : > { %v211_v29 = vmul.f32 %v441_v27, %v203_v9 }
 0x148   : > { %v218_v31 = vmul.f32 %v375_v28, %v211_v29 }
 0x14a   : > { %v225_v32 = vadd.f32 %v376_v30, %v218_v31 }
 0x14c   : > { %v234_v33 = vpack.c.bf16 %v225_v32, %v225_v32 }
 0x14e   : > { %396 = vmatmul.mubr.msk.bf16.vlgmr.msra.gmra.mxu0 %vm197_vm0, %v234_v33 }
 0x20e   : > { %v288_v34 = vpop.f32.mrf.mxu0 }
 0x20f   : > { %295 = vst.msk [vmem:[%s188_s12] sm:$0xff] %vm294_vm2, %v288_v34 }
 0x210   : > { %v397_v35 = vpop.f32.mrf.mxu0 }
 0x211   : > { %455 = shalt.err (!%p452_p3)
}
 0x212   : > { %s456_s30 = scalar_lea.hbm %s627_s22, 128  ;;  %s460_s7 = scalar_lea.hbm %s672_s4, 256 }
 0x213   : > { %p457_p4 = scmp.ne.s32.totalorder %s627_s22, %s456_s30  ;;  %p461_p9 = scmp.lt.s32.totalorder %s627_s22, %s672_s4 }
 0x214   : > { %p462_p10 = scmp.lt.s32.totalorder %s460_s7, %s456_s30 }
 0x215   : > { %p458_p7 = pnand %p457_p4, %p570_p5 }
 0x216   : > { %p463_p11 = por %p462_p10, %p461_p9 }
 0x217   : > { %p459_p8 = pneg %p458_p7 }
 0x219   : > { %p464_p12 = pnand %p463_p11, %p459_p8 }
 0x21b   : > { %467 = shalt.err (!%p464_p12)
}
 0x21c   : > { %399 = dma.vmem_to_hbm [thread:$0]  (%p570_p5), %s629_s13, 128, %s627_s22, %s297_s23   ;;  %v291_v36 = vpop.f32.mrf.mxu0 }
 0x21e   : > { %v398_v37 = vpop.f32.mrf.mxu0 }
 0x21f PF: > { %p405_p13 = scmp.ge.s32.totalorder %s502_s18, 2  ;;  %s322_s10 = sand.u32 1, %s490_s15  }
 0x220   : > { %s323_s11 = scalar_lea.sflag [#allocation3], %s322_s10 }
 0x221   : > { %p402_p0 = pnand %p405_p13, %p574_p6 }
 0x223   : > { %p403_p1 = pneg %p402_p0 }
 0x225   : > { %485 = dma.done.wait (%p403_p1), %s323_s11, 128  }
 0x226   : > { %487 = vsyncadd (%p403_p1), %s323_s11, 4294967168  ;;  %p14_p5 = scmp.ge.s32.totalorder %s557_s21, 4   ;;  %s675_s15 = smov %s494_s16 }
 0x227   : > { %s676_s16 = smov %s498_s17  ;;  %s677_s17 = smov %s568_s24 }
 0x228   : > { %s678_s18 = smov %s557_s21  ;;  %16 = sbr.rel (!%p14_p5) target bundleno = 3 (0x3), region = 71 }
 0x22d   :  { %328 = vsyncpa [#allocation3], 1 }
 0x22e   :  { %330 = vsyncpa [#allocation3 + $0x1], 1 }

// kernel: bert_gpt_forward.5
= control target key start
LH: loop header
LB: loop body
LE: loop exit
PB: predicated region body
PF: predicated region fallthrough
CT: control target
= control target key end

     0   :  { %s1939_s21 = smov 0   ;;  %s2224_s0 = inlined_call_operand.vmem [shape: f32[2,1,8], index: 0, kind: input, shape index: {}]   ;;  %s2225_s1 = inlined_call_operand.vmem [shape: f32[2,8,32], index: 1, kind: input, shape index: {}]   ;;  %s2226_s2 = inlined_call_operand.vmem [shape: f32[32,96], index: 2, kind: input, shape index: {}]   ;;  %s2227_s3 = inlined_call_operand.vmem [shape: f32[1,96], index: 3, kind: input, shape index: {}]   ;;  %s2228_s4 = inlined_call_operand.vmem [shape: f32[32,32], index: 4, kind: input, shape index: {}]   ;;  %s2229_s5 = inlined_call_operand.vmem [shape: f32[1,32], index: 5, kind: input, shape index: {}]   ;;  %s2230_s6 = inlined_call_operand.vmem [shape: f32[1,32], index: 6, kind: input, shape index: {}]   ;;  %s2231_s7 = inlined_call_operand.vmem [shape: f32[1,32], index: 7, kind: input, shape index: {}]   ;;  %s2232_s8 = inlined_call_operand.vmem [shape: f32[32,128], index: 8, kind: input, shape index: {}]   ;;  %s2233_s9 = inlined_call_operand.vmem [shape: f32[1,128], index: 9, kind: input, shape index: {}]   ;;  %s2234_s10 = inlined_call_operand.vmem [shape: f32[128,32], index: 10, kind: input, shape index: {}]   ;;  %s2235_s11 = inlined_call_operand.vmem [shape: f32[1,32], index: 11, kind: input, shape index: {}]   ;;  %s2236_s12 = inlined_call_operand.vmem [shape: f32[1,32], index: 12, kind: input, shape index: {}]   ;;  %s2237_s13 = inlined_call_operand.vmem [shape: f32[1,32], index: 13, kind: input, shape index: {}]   ;;  %s2238_s14 = inlined_call_operand.vmem [shape: f32[2,8,32], index: 14, kind: output, shape index: {0}]   ;;  %s2239_s15 = inlined_call_operand.vmem [shape: f32[2,8,32], index: 15, kind: output, shape index: {1}]   ;;  %s2240_s16 = inlined_call_operand.vmem [shape: f32[2,8,32], index: 16, kind: output, shape index: {2}]  }
   0x1   :  { %2241 = sst [smem:[#allocation2_spill]] %s2224_s0 }
   0x2 LB: > { %s1610_s22 = sadd.s32 4294967295, %s1839_s21   ;;  %p1614_p0 = scmp.ge.s32.totalorder %s1839_s21, 1  ;;  %s1839_s21 = sphi %s1939_s21, %s27_s21  }
   0x3   : > { %p474_p1 = scmp.lt.s32.totalorder %s1839_s21, 3 }
   0x5   : > { %p475_p2 = pnand %p1614_p0, %p474_p1 }
   0x6   : > { %p533_p3 = scmp.lt.s32.totalorder (!%p475_p2), %s1610_s22, 1  ;;  %s1843_s24 = smov (!%p475_p2), 64  }
   0x7   : > { %478 = sbr.rel (%p475_p2) target bundleno = 4040 (0xfc8), region = 76  ;;  %s1844_s25 = smov (!%p475_p2), 96  }
   0x8   : > { %s2242_s28 = sld [smem:[#allocation2_spill]] (!%p475_p2)  ;;  %s1846_s30 = smov (!%p475_p2), 120  }
   0x9   : > { %s1847_s17 = smov (!%p475_p2), 56   ;;  %s1848_s18 = smov (!%p475_p2), 80  }
   0xc   : > { %v559_v0 = vld [vmem:[%s2226_s2 + $0x10] sm:$0xff]  ;;  %v560_v1 = vld [vmem:[%s2226_s2 + $0x18] sm:$0xff]  ;;  %v557_v2 = vld [vmem:[%s2226_s2] sm:$0xff]  ;;  %v1841_v3 = vmov 0.0   ;;  %vm1842_vm0 = vmmov 0   ;;  %s2244_s22 = smov (!%p533_p3, %s1610_s22), 1  ;;  %v672_v20 = vlaneseq }
   0xd   : > { %1682 = vmatprep.subr.bf16.mxu1 %v1841_v3  ;;  %v563_v4 = vpack.c.bf16 %v560_v1, %v559_v0  ;;  %v558_v5 = vld [vmem:[%s2226_s2 + $0x8] sm:$0xff]  ;;  %1686 = vmatprep.mubr.msk.bf16.mxu1 %vm1842_vm0, %v1841_v3  ;;  %s1969_s0 = sshll.u32 %s2244_s22, 3  ;;  %vm571_vm1 = vcmask 261120   ;;  %v1619_v9 = vld [vmem:[%s2227_s3] ss:$0 sm:$0xff]  ;;  %vm623_vm2 = vcmask 64512  }
   0xe   : > { %1708 = vmatprep.subr.bf16.mxu0 %v1841_v3  ;;  %1710 = vmatprep.mubr.msk.bf16.mxu0 %vm1842_vm0, %v1841_v3  ;;  %v562_v6 = vpack.c.bf16 %v558_v5, %v557_v2  ;;  %s539_s19 = scalar_lea.vmem %s2225_s1, %s1969_s0  ;;  %vm695_vm3 = vcmask 1043456   ;;  %s535_s29 = scalar_lea.vmem %s2242_s28, %s2244_s22  ;;  %v673_v23 = vshrl.u32 %v672_v20, 7  ;;  %v616_v62 = vld [vmem:[%s2228_s4 + $0x8] sm:$0xff]  ;;  %v615_v5 = vld [vmem:[%s2228_s4] sm:$0xff] }
   0xf   : > { %1683 = vmatpush3.bf16.msra.mxu1 %v563_v4  ;;  %v1975_v7 = vld [vmem:[%s539_s19] sm:$0xff]  ;;  %s1845_s22 = smov 88   ;;  %s1849_s19 = smov 112   ;;  %v854_v63 = vpack.c.bf16 %v616_v62, %v616_v62 }
  0x10   : > { %1684 = vmatprep.subr.bf16.mxu1 %v1841_v3  ;;  %v561_v8 = vpack.c.bf16 %v1975_v7, %v1975_v7  ;;  %v554_v21 = vld [vmem:[%s535_s29] sm:$0x1]  ;;  %v674_v25 = vsub.s32 0, %v673_v23  ;;  %s1850_s28 = smov 48   ;;  %s1851_s29 = smov 72  }
  0x11   : > { %v555_v22 = vsub.f32 1.0, %v554_v21  ;;  %v859_v0 = vsel %vm695_vm3, %v854_v63, 0  ;;  %s543_s26 = scalar_lea.vmem %s2238_s14, %s1969_s0 }
  0x13   : > { %1685 = vmatpush3.bf16.msra.mxu1 %v562_v6  ;;  %v556_v24 = vmul.f32 -1e+09, %v555_v22  ;;  %v740_v6 = vpack.c.bf16 %v615_v5, %v615_v5 }
  0x14   : > { %1690 = vmatprep.subr.bf16.mxu1 %v1841_v3 }
  0x15   : > { %v2008_v26 = vrot.slane %v556_v24, %v674_v25 }
  0x16   : > { %1687 = vmatmul.mubr.msk.bf16.vlgmr.msra.gmra.mxu1 %vm571_vm1, %v561_v8 }
  0x17   : > { %1692 = vmatprep.mubr.msk.bf16.mxu1 %vm1842_vm0, %v1841_v3 }
  0xd6   : > { %v609_v10 = vpop.f32.mrf.mxu1 }
  0xd7   : > { %v1986_v11 = vadd.f32 %v1619_v9, %v609_v10 }
  0xd8   : > { %v1688_v12 = vpop.f32.mrf.mxu1 }
  0xd9   : > { %v1990_v13 = vpack.c.bf16 %v1986_v11, %v1986_v11  ;;  %v905_v12 = vsel %vm695_vm3, %v740_v6, 0 }
  0xda   : > { %v612_v14 = vpop.f32.mrf.mxu1 }
  0xdb   : > { %690 = vrot.lane.b32.xlu1 %v1990_v13, %s1843_s24  ;;  %621 = vrot.lane.b32.xlu0 %v1990_v13, %s1844_s25 }
  0xdc   : > { %v1689_v15 = vpop.f32.mrf.mxu1 }
 0x14d   : > { %v622_v16 = vpop.permute.xlu0 %621  ;;  %v691_v18 = vpop.permute.xlu1 %690 }
 0x14e   : > { %v628_v17 = vsel %vm623_vm2, %v622_v16, 0  ;;  %v697_v19 = vsel %vm695_vm3, %v691_v18, 0 }
 0x14f   : > { %1691 = vmatpush3.bf16.xpose.msra.mxu1 %v628_v17 }
 0x150   : > { %1696 = vmatprep.subr.bf16.mxu1 %v1841_v3 }
 0x156   : > { %1693 = vmatmul.mubr.msk.bf16.vlgmr.msra.gmra.mxu1 %vm623_vm2, %v1990_v13 }
 0x157   : > { %1697 = vmatpush3.bf16.msra.mxu1 %v697_v19  ;;  %1698 = vmatprep.mubr.msk.bf16.mxu1 %vm1842_vm0, %v1841_v3 }
 0x158   : > { %1702 = vmatprep.subr.bf16.mxu1 %v1841_v3 }
 0x216   : > { %v664_v27 = vpop.f32.mrf.mxu1 }
 0x217   : > { %v670_v28 = vmul.f32 0.35355338, %v664_v27 }
 0x218   : > { %v1694_v29 = vpop.f32.mrf.mxu1 }
 0x219   : > { %v677_v30 = vadd.f32 %v2008_v26, %v670_v28 }
 0x21a   : > { %v667_v31 = vpop.f32.mrf.mxu1 }
 0x21b   : > { %v678_v32 = vsel %vm623_vm2, %v677_v30, -inf }
 0x21c   : > { %v1695_v33 = vpop.f32.mrf.mxu1  ;;  %679 = vmax.xlane.f32.xlu0 %v678_v32 }
 0x2a5   : > { %v680_v34 = vpop.xlane.xlu0 %679 }
 0x2a6   : > { %v681_v35 = vsub.f32 %v677_v30, %v680_v34 }
 0x2a8   : > { %v682_v36 = vmul.f32 1.442695, %v681_v35 }
 0x2aa   : > { %1811 = vpow2.f32 %v682_v36 }
 0x2b7   : > { %v1812_v37 = vpop.eup %1811 }
 0x2b8   : > { %v684_v38 = vsel %vm623_vm2, %v1812_v37, 0.0 }
 0x2b9   : > { %685 = vadd.xlane.f32.xlu1 %v684_v38 }
 0x2ca   : > { %743 = vrot.lane.b32.xlu1 %v1990_v13, %s1845_s22  ;;  %s1852_s22 = smov 104  }
 0x2ce   : > { %741 = vrot.lane.b32.xlu1 %v1990_v13, %s1846_s30 }
 0x342   : > { %v686_v39 = vpop.xlane.xlu1 %685 }
 0x343   : > { %1813 = vrcp.f32 %v686_v39 }
 0x346   : > { %v744_v42 = vpop.permute.xlu1 %743 }
 0x347   : > { %v749_v44 = vsel %vm623_vm2, %v744_v42, 0 }
 0x34a   : > { %v742_v45 = vpop.permute.xlu1 %741 }
 0x350   : > { %v1814_v40 = vpop.eup %1813 }
 0x351   : > { %v688_v41 = vmul.f32 %v1814_v40, %v1812_v37 }
 0x353   : > { %v689_v43 = vpack.c.bf16 %v688_v41, %v688_v41 }
 0x355   : > { %1699 = vmatmul.mubr.msk.bf16.vlgmr.msra.gmra.mxu1 %vm623_vm2, %v689_v43 }
 0x356   : > { %1703 = vmatpush3.bf16.xpose.msra.mxu1 %v749_v44  ;;  %1704 = vmatprep.mubr.msk.bf16.mxu1 %vm1842_vm0, %v1841_v3 }
 0x357   : > { %1714 = vmatprep.subr.bf16.mxu1 %v1841_v3 }
 0x35d   : > { %1705 = vmatmul.mubr.msk.bf16.vlgmr.msra.gmra.mxu1 %vm623_vm2, %v742_v45 }
 0x35e   : > { %1716 = vmatprep.mubr.msk.bf16.mxu1 %vm1842_vm0, %v1841_v3  ;;  %1715 = vmatpush3.bf16.msra.mxu1 %v859_v0 }
 0x35f   : > { %1726 = vmatprep.subr.bf16.mxu1 %v1841_v3 }
 0x415   : > { %v733_v46 = vpop.f32.mrf.mxu1 }
 0x416   : > { %v739_v14 = vpack.c.bf16 %v733_v46, %v733_v46 }
 0x417   : > { %v1700_v47 = vpop.f32.mrf.mxu1 }
 0x419   : > { %v736_v48 = vpop.f32.mrf.mxu1 }
 0x41b   : > { %v1701_v49 = vpop.f32.mrf.mxu1 }
 0x41d   : > { %v785_v50 = vpop.f32.mrf.mxu1 }
 0x41e   : > { %v791_v51 = vmul.f32 0.35355338, %v785_v50 }
 0x41f   : > { %v1706_v52 = vpop.f32.mrf.mxu1 }
 0x420   : > { %v792_v53 = vadd.f32 %v791_v51, %v2008_v26 }
 0x421   : > { %v788_v54 = vpop.f32.mrf.mxu1 }
 0x422   : > { %v793_v55 = vsel %vm623_vm2, %v792_v53, -inf }
 0x423   : > { %794 = vmax.xlane.f32.xlu1 %v793_v55  ;;  %v1707_v56 = vpop.f32.mrf.mxu1 }
 0x4ac   : > { %v795_v57 = vpop.xlane.xlu1 %794 }
 0x4ad   : > { %v796_v58 = vsub.f32 %v792_v53, %v795_v57  ;;  %v617_v53 = vld [vmem:[%s2228_s4 + $0x10] sm:$0xff] }
 0x4ae   : > { %v1060_v54 = vpack.c.bf16 %v617_v53, %v617_v53 }
 0x4af   : > { %v797_v59 = vmul.f32 1.442695, %v796_v58 }
 0x4b0   : > { %v1065_v55 = vsel %vm695_vm3, %v1060_v54, 0 }
 0x4b1   : > { %1815 = vpow2.f32 %v797_v59 }
 0x4be   : > { %v1816_v60 = vpop.eup %1815 }
 0x4bf   : > { %v799_v61 = vsel %vm623_vm2, %v1816_v60, 0.0 }
 0x4c0   : > { %800 = vadd.xlane.f32.xlu0 %v799_v61 }
 0x4d6   : > { %805 = vrot.lane.b32.xlu0 %v1990_v13, %s1847_s17  ;;  %s547_s17 = scalar_lea.vmem %s2239_s15, %s1969_s0 }
 0x4da   : > { %949 = vrot.lane.b32.xlu0 %v1990_v13, %s1848_s18  ;;  %s1853_s18 = smov 40  }
 0x4de   : > { %947 = vrot.lane.b32.xlu0 %v1990_v13, %s1849_s19 }
 0x549   : > { %v801_v1 = vpop.xlane.xlu0 %800 }
 0x54a   : > { %1817 = vrcp.f32 %v801_v1 }
 0x54d   : > { %v806_v2 = vpop.permute.xlu0 %805 }
 0x54e   : > { %v811_v4 = vsel %vm695_vm3, %v806_v2, 0 }
 0x54f   : > { %1709 = vmatpush3.bf16.msra.mxu0 %v811_v4 }
 0x550   : > { %1720 = vmatprep.subr.bf16.mxu0 %v1841_v3 }
 0x551   : > { %v950_v15 = vpop.permute.xlu0 %949 }
 0x552   : > { %v955_v19 = vsel %vm623_vm2, %v950_v15, 0 }
 0x555   : > { %v948_v23 = vpop.permute.xlu0 %947 }
 0x557   : > { %v1818_v8 = vpop.eup %1817 }
 0x558   : > { %v803_v9 = vmul.f32 %v1818_v8, %v1816_v60 }
 0x55a   : > { %v804_v10 = vpack.c.bf16 %v803_v9, %v803_v9 }
 0x55c   : > { %1711 = vmatmul.mubr.msk.bf16.vlgmr.msra.gmra.mxu0 %vm623_vm2, %v804_v10 }
 0x55d   : > { %1721 = vmatpush3.bf16.msra.mxu0 %v905_v12  ;;  %1722 = vmatprep.mubr.msk.bf16.mxu0 %vm1842_vm0, %v1841_v3 }
 0x55e   : > { %1732 = vmatprep.subr.bf16.mxu0 %v1841_v3 }
 0x564   : > { %1723 = vmatmul.mubr.msk.bf16.vlgmr.msra.gmra.mxu0 %vm623_vm2, %v739_v14 }
 0x565   : > { %1734 = vmatprep.mubr.msk.bf16.mxu0 %vm1842_vm0, %v1841_v3 }
 0x61c   : > { %v847_v16 = vpop.f32.mrf.mxu0 }
 0x61d   : > { %v853_v17 = vpack.c.bf16 %v847_v16, %v847_v16 }
 0x61e   : > { %v1712_v18 = vpop.f32.mrf.mxu0 }
 0x61f   : > { %1717 = vmatmul.mubr.msk.bf16.vlgmr.msra.gmra.mxu1 %vm623_vm2, %v853_v17  ;;  %v618_v17 = vld [vmem:[%s2228_s4 + $0x18] sm:$0xff] }
 0x620   : > { %1727 = vmatpush3.bf16.xpose.msra.mxu1 %v955_v19  ;;  %v850_v20 = vpop.f32.mrf.mxu0  ;;  %1728 = vmatprep.mubr.msk.bf16.mxu1 %vm1842_vm0, %v1841_v3  ;;  %v1221_v18 = vpack.c.bf16 %v618_v17, %v618_v17  ;;  %v1379_v17 = vld [vmem:[%s2234_s10 + $0x28] sm:$0xff] }
 0x621   : > { %1738 = vmatprep.subr.bf16.mxu1 %v1841_v3 }
 0x622   : > { %v1713_v21 = vpop.f32.mrf.mxu0  ;;  %v1226_v20 = vsel %vm695_vm3, %v1221_v18, 0 }
 0x624   : > { %v2052_v22 = vpop.f32.mrf.mxu0 }
 0x626   : > { %v1724_v24 = vpop.f32.mrf.mxu0 }
 0x627   : > { %1729 = vmatmul.mubr.msk.bf16.vlgmr.msra.gmra.mxu1 %vm623_vm2, %v948_v23 }
 0x628   : > { %v944_v25 = vpop.f32.mrf.mxu0  ;;  %1740 = vmatprep.mubr.msk.bf16.mxu1 %vm1842_vm0, %v1841_v3  ;;  %1739 = vmatpush3.bf16.msra.mxu1 %v1065_v55 }
 0x629   : > { %1750 = vmatprep.subr.bf16.mxu1 %v1841_v3 }
 0x62a   : > { %v1725_v27 = vpop.f32.mrf.mxu0 }
 0x6df   : > { %v2057_v28 = vpop.f32.mrf.mxu1 }
 0x6e0   : > { %v942_v12 = vadd.f32 %v2052_v22, %v2057_v28 }
 0x6e1   : > { %v1718_v29 = vpop.f32.mrf.mxu1 }
 0x6e3   : > { %v898_v30 = vpop.f32.mrf.mxu1 }
 0x6e5   : > { %v1719_v31 = vpop.f32.mrf.mxu1 }
 0x6e7   : > { %v991_v32 = vpop.f32.mrf.mxu1 }
 0x6e8   : > { %v997_v33 = vmul.f32 0.35355338, %v991_v32 }
 0x6e9   : > { %v1730_v34 = vpop.f32.mrf.mxu1 }
 0x6ea   : > { %v998_v35 = vadd.f32 %v997_v33, %v2008_v26  ;;  %v1633_v33 = vld [vmem:[%s2229_s5] ss:$0 sm:$0xff] }
 0x6eb   : > { %v994_v36 = vpop.f32.mrf.mxu1 }
 0x6ec   : > { %v999_v37 = vsel %vm623_vm2, %v998_v35, -inf }
 0x6ed   : > { %1000 = vmax.xlane.f32.xlu1 %v999_v37  ;;  %v1731_v38 = vpop.f32.mrf.mxu1 }
 0x6fe   : > { %1011 = vrot.lane.b32.xlu1 %v1990_v13, %s1850_s28 }
 0x702   : > { %1110 = vrot.lane.b32.xlu1 %v1990_v13, %s1851_s29  ;;  %s551_s29 = scalar_lea.vmem %s2240_s16, %s1969_s0 }
 0x706   : > { %1108 = vrot.lane.b32.xlu1 %v1990_v13, %s1852_s22 }
 0x776   : > { %v1001_v39 = vpop.xlane.xlu1 %1000 }
 0x777   : > { %v1002_v40 = vsub.f32 %v998_v35, %v1001_v39 }
 0x779   : > { %v1003_v41 = vmul.f32 1.442695, %v1002_v40 }
 0x77a   : > { %v1012_v42 = vpop.permute.xlu1 %1011 }
 0x77b   : > { %1819 = vpow2.f32 %v1003_v41  ;;  %v1017_v43 = vsel %vm695_vm3, %v1012_v42, 0 }
 0x77c   : > { %1733 = vmatpush3.bf16.msra.mxu0 %v1017_v43 }
 0x77d   : > { %1744 = vmatprep.subr.bf16.mxu0 %v1841_v3 }
 0x77e   : > { %v1111_v49 = vpop.permute.xlu1 %1110 }
 0x77f   : > { %v1116_v51 = vsel %vm623_vm2, %v1111_v49, 0  ;;  %v1308_v49 = vld [vmem:[%s2232_s8] sm:$0xff] }
 0x782   : > { %v1109_v52 = vpop.permute.xlu1 %1108 }
 0x788   : > { %v1820_v44 = vpop.eup %1819 }
 0x789   : > { %v1005_v45 = vsel %vm623_vm2, %v1820_v44, 0.0 }
 0x78a   : > { %1006 = vadd.xlane.f32.xlu0 %v1005_v45 }
 0x813   : > { %v1007_v46 = vpop.xlane.xlu0 %1006 }
 0x814   : > { %1821 = vrcp.f32 %v1007_v46  ;;  %v1310_v46 = vld [vmem:[%s2232_s8 + $0x10] sm:$0xff] }
 0x821   : > { %v1822_v47 = vpop.eup %1821 }
 0x822   : > { %v1009_v48 = vmul.f32 %v1822_v47, %v1820_v44  ;;  %v1311_v47 = vld [vmem:[%s2232_s8 + $0x18] sm:$0xff] }
 0x824   : > { %v1010_v50 = vpack.c.bf16 %v1009_v48, %v1009_v48  ;;  %v1314_v48 = vpack.c.bf16 %v1311_v47, %v1310_v46 }
 0x826   : > { %1735 = vmatmul.mubr.msk.bf16.vlgmr.msra.gmra.mxu0 %vm623_vm2, %v1010_v50  ;;  %v1309_v50 = vld [vmem:[%s2232_s8 + $0x8] sm:$0xff] }
 0x827   : > { %1745 = vmatpush3.bf16.xpose.msra.mxu0 %v1116_v51  ;;  %1746 = vmatprep.mubr.msk.bf16.mxu0 %vm1842_vm0, %v1841_v3  ;;  %v1313_v51 = vpack.c.bf16 %v1309_v50, %v1308_v49 }
 0x828   : > { %1756 = vmatprep.subr.bf16.mxu0 %v1841_v3 }
 0x82e   : > { %1747 = vmatmul.mubr.msk.bf16.vlgmr.msra.gmra.mxu0 %vm623_vm2, %v1109_v52 }
 0x82f   : > { %1758 = vmatprep.mubr.msk.bf16.mxu0 %vm1842_vm0, %v1841_v3  ;;  %1757 = vmatpush3.bf16.msra.mxu0 %v1226_v20  ;;  %v1377_v20 = vld [vmem:[%s2234_s10 + $0x18] sm:$0xff] }
 0x830   : > { %1770 = vmatprep.subr.bf16.mxu0 %v1841_v3 }
 0x8e6   : > { %v1053_v56 = vpop.f32.mrf.mxu0 }
 0x8e7   : > { %v1059_v57 = vpack.c.bf16 %v1053_v56, %v1053_v56  ;;  %v1634_v56 = vld [vmem:[%s2230_s6] ss:$0 sm:$0xff] }
 0x8e8   : > { %v1736_v58 = vpop.f32.mrf.mxu0 }
 0x8e9   : > { %1741 = vmatmul.mubr.msk.bf16.vlgmr.msra.gmra.mxu1 %vm623_vm2, %v1059_v57  ;;  %v1635_v58 = vld [vmem:[%s2231_s7] ss:$0 sm:$0xff] }
 0x8ea   : > { %v1056_v59 = vpop.f32.mrf.mxu0  ;;  %1752 = vmatprep.mubr.msk.bf16.mxu1 %vm1842_vm0, %v1841_v3 }
 0x8ec   : > { %v1737_v60 = vpop.f32.mrf.mxu0 }
 0x8ee   : > { %v1152_v61 = vpop.f32.mrf.mxu0 }
 0x8ef   : > { %v1158_v62 = vmul.f32 0.35355338, %v1152_v61 }
 0x8f0   : > { %v1748_v63 = vpop.f32.mrf.mxu0 }
 0x8f1   : > { %v1159_v0 = vadd.f32 %v1158_v62, %v2008_v26  ;;  %v1388_v62 = vld [vmem:[%s2234_s10 + $0x70] sm:$0xff]  ;;  %v1389_v63 = vld [vmem:[%s2234_s10 + $0x78] sm:$0xff] }
 0x8f2   : > { %v1155_v1 = vpop.f32.mrf.mxu0 }
 0x8f3   : > { %v1160_v2 = vsel %vm623_vm2, %v1159_v0, -inf  ;;  %v1386_v1 = vld [vmem:[%s2234_s10 + $0x60] sm:$0xff] }
 0x8f4   : > { %1161 = vmax.xlane.f32.xlu1 %v1160_v2  ;;  %v1749_v4 = vpop.f32.mrf.mxu0  ;;  %v1387_v2 = vld [vmem:[%s2234_s10 + $0x68] sm:$0xff] }
 0x8f5   : > { %v1397_v4 = vpack.c.bf16 %v1387_v2, %v1386_v1 }
 0x97d   : > { %v1162_v5 = vpop.xlane.xlu1 %1161 }
 0x97e   : > { %v1163_v6 = vsub.f32 %v1159_v0, %v1162_v5  ;;  %v1398_v0 = vpack.c.bf16 %v1389_v63, %v1388_v62  ;;  %v1384_v5 = vld [vmem:[%s2234_s10 + $0x50] sm:$0xff] }
 0x980   : > { %v1164_v8 = vmul.f32 1.442695, %v1163_v6  ;;  %v1385_v6 = vld [vmem:[%s2234_s10 + $0x58] sm:$0xff] }
 0x982   : > { %1823 = vpow2.f32 %v1164_v8  ;;  %v1396_v8 = vpack.c.bf16 %v1385_v6, %v1384_v5 }
 0x98f   : > { %v1824_v9 = vpop.eup %1823 }
 0x990   : > { %v1166_v10 = vsel %vm623_vm2, %v1824_v9, 0.0 }
 0x991   : > { %1167 = vadd.xlane.f32.xlu0 %v1166_v10  ;;  %v1383_v10 = vld [vmem:[%s2234_s10 + $0x48] sm:$0xff] }
 0x9a7   : > { %1172 = vrot.lane.b32.xlu0 %v1990_v13, %s1853_s18 }
 0x9a9   : > { %v1101_v26 = vpop.f32.mrf.mxu1 }
 0x9aa   : > { %v1107_v14 = vadd.f32 %v1101_v26, %v942_v12  ;;  %v1380_v26 = vld [vmem:[%s2234_s10 + $0x30] sm:$0xff] }
 0x9ab   : > { %v1742_v15 = vpop.f32.mrf.mxu1 }
 0x9ad   : > { %v1104_v16 = vpop.f32.mrf.mxu1 }
 0x9ae   : > { %v1378_v16 = vld [vmem:[%s2234_s10 + $0x20] sm:$0xff] }
 0x9af   : > { %v1743_v19 = vpop.f32.mrf.mxu1  ;;  %v1393_v18 = vpack.c.bf16 %v1379_v17, %v1378_v16 }
 0x9b0   : > { %v1376_v19 = vld [vmem:[%s2234_s10 + $0x10] sm:$0xff] }
 0xa1a   : > { %v1168_v21 = vpop.xlane.xlu0 %1167 }
 0xa1b   : > { %1825 = vrcp.f32 %v1168_v21  ;;  %v1392_v21 = vpack.c.bf16 %v1377_v20, %v1376_v19 }
 0xa1e   : > { %v1173_v13 = vpop.permute.xlu0 %1172 }
 0xa1f   : > { %v1178_v22 = vsel %vm695_vm3, %v1173_v13, 0  ;;  %v1374_v13 = vld [vmem:[%s2234_s10] sm:$0xff] }
 0xa20   : > { %1751 = vmatpush3.bf16.msra.mxu1 %v1178_v22  ;;  %v1375_v22 = vld [vmem:[%s2234_s10 + $0x8] sm:$0xff] }
 0xa21   : > { %1762 = vmatprep.subr.bf16.mxu1 %v1841_v3 }
 0xa28   : > { %v1826_v23 = vpop.eup %1825 }
 0xa29   : > { %v1170_v24 = vmul.f32 %v1826_v23, %v1824_v9  ;;  %v1382_v9 = vld [vmem:[%s2234_s10 + $0x40] sm:$0xff]  ;;  %v1391_v23 = vpack.c.bf16 %v1375_v22, %v1374_v13 }
 0xa2a   : > { %v1395_v12 = vpack.c.bf16 %v1383_v10, %v1382_v9 }
 0xa2b   : > { %v1171_v25 = vpack.c.bf16 %v1170_v24, %v1170_v24  ;;  %v1636_v24 = vld [vmem:[%s2233_s9] ss:$0 sm:$0xff] }
 0xa2d   : > { %1753 = vmatmul.mubr.msk.bf16.vlgmr.msra.gmra.mxu1 %vm623_vm2, %v1171_v25 }
 0xa2e   : > { %1766 = vmatprep.mubr.msk.bf16.mxu1 %vm1842_vm0, %v1841_v3  ;;  %1763 = vmatpush3.bf16.msra.mxu1 %v1314_v48 }
 0xa2f   : > { %1764 = vmatprep.subr.bf16.mxu1 %v1841_v3 }
 0xa32   : > { %1765 = vmatpush3.bf16.msra.mxu1 %v1313_v51 }
 0xaed   : > { %v1214_v27 = vpop.f32.mrf.mxu1 }
 0xaee   : > { %v1220_v28 = vpack.c.bf16 %v1214_v27, %v1214_v27 }
 0xaef   : > { %v1754_v29 = vpop.f32.mrf.mxu1 }
 0xaf0   : > { %1759 = vmatmul.mubr.msk.bf16.vlgmr.msra.gmra.mxu0 %vm623_vm2, %v1220_v28 }
 0xaf1   : > { %v1217_v30 = vpop.f32.mrf.mxu1  ;;  %1786 = vmatprep.mubr.msk.bf16.mxu0 %vm1842_vm0, %v1841_v3  ;;  %1771 = vmatpush3.bf16.msra.mxu0 %v1398_v0 }
 0xaf2   : > { %1772 = vmatprep.subr.bf16.mxu0 %v1841_v3 }
 0xaf3   : > { %v1755_v31 = vpop.f32.mrf.mxu1 }
 0xaf5   : > { %1773 = vmatpush3.bf16.msra.mxu0 %v1397_v4 }
 0xaf6   : > { %1774 = vmatprep.subr.bf16.mxu0 %v1841_v3 }
 0xaf9   : > { %1775 = vmatpush3.bf16.msra.mxu0 %v1396_v8 }
 0xafa   : > { %1776 = vmatprep.subr.bf16.mxu0 %v1841_v3 }
 0xafd   : > { %1777 = vmatpush3.bf16.msra.mxu0 %v1395_v12 }
 0xafe   : > { %1778 = vmatprep.subr.bf16.mxu0 %v1841_v3 }
 0xbb0   : > { %v1262_v32 = vpop.f32.mrf.mxu0 }
 0xbb1   : > { %v1268_v34 = vadd.f32 %v1262_v32, %v1107_v14  ;;  %v1381_v14 = vld [vmem:[%s2234_s10 + $0x38] sm:$0xff] }
 0xbb2   : > { %v1760_v35 = vpop.f32.mrf.mxu0  ;;  %v1394_v15 = vpack.c.bf16 %v1381_v14, %v1380_v26 }
 0xbb3   : > { %v1276_v36 = vadd.f32 %v1633_v33, %v1268_v34 }
 0xbb4   : > { %v1265_v37 = vpop.f32.mrf.mxu0  ;;  %1779 = vmatpush3.bf16.msra.mxu0 %v1394_v15 }
 0xbb5   : > { %v1277_v38 = vadd.f32 %v1276_v36, %v1975_v7  ;;  %1780 = vmatprep.subr.bf16.mxu0 %v1841_v3 }
 0xbb6   : > { %v1761_v39 = vpop.f32.mrf.mxu0 }
 0xbb7   : > { %v1280_v40 = vsel %vm571_vm1, %v1277_v38, 0.0 }
 0xbb8   : > { %1281 = vadd.xlane.f32.xlu0 %v1280_v40  ;;  %1781 = vmatpush3.bf16.msra.mxu0 %v1393_v18  ;;  %v1638_v40 = vld [vmem:[%s2235_s11] ss:$0 sm:$0xff] }
 0xbb9   : > { %1782 = vmatprep.subr.bf16.mxu0 %v1841_v3 }
 0xbbc   : > { %1783 = vmatpush3.bf16.msra.mxu0 %v1392_v21 }
 0xbbd   : > { %1784 = vmatprep.subr.bf16.mxu0 %v1841_v3 }
 0xbc0   : > { %1785 = vmatpush3.bf16.msra.mxu0 %v1391_v23 }
 0xbce   : > { %1482 = vrot.lane.b32.xlu0 %v1986_v11, %s1843_s24 }
 0xc41   : > { %v1282_v41 = vpop.xlane.xlu0 %1281 }
 0xc42   : > { %v1284_v42 = vmul.f32 0.03125, %v1282_v41 }
 0xc44   : > { %v1285_v43 = vsub.f32 %v1277_v38, %v1284_v42 }
 0xc45   : > { %v1483_v44 = vpop.permute.xlu0 %1482 }
 0xc46   : > { %1485 = vst.msk [vmem:[%s551_s29] sm:$0xff] %vm571_vm1, %v1483_v44  ;;  %v1286_v45 = vmul.f32 %v1285_v43, %v1285_v43 }
 0xc48   : > { %v1287_v7 = vsel %vm571_vm1, %v1286_v45, 0.0 }
 0xc49   : > { %1288 = vadd.xlane.f32.xlu1 %v1287_v7 }
 0xcd2   : > { %v1289_v52 = vpop.xlane.xlu1 %1288 }
 0xcd3   : > { %v1290_v53 = vmul.f32 0.03125, %v1289_v52 }
 0xcd5   : > { %v1291_v54 = vadd.f32 1e-05, %v1290_v53 }
 0xcd7   : > { %1827 = vrsqrt.f32 %v1291_v54 }
 0xce4   : > { %v1828_v55 = vpop.eup %1827 }
 0xce5   : > { %v1293_v57 = vmul.f32 %v1828_v55, %v1285_v43 }
 0xce7   : > { %v1300_v59 = vmul.f32 %v1634_v56, %v1293_v57  ;;  %v1639_v57 = vld [vmem:[%s2236_s12] ss:$0 sm:$0xff] }
 0xce9   : > { %v2134_v60 = vadd.f32 %v1635_v58, %v1300_v59 }
 0xceb   : > { %v1312_v61 = vpack.c.bf16 %v2134_v60, %v2134_v60 }
 0xced   : > { %1767 = vmatmul.mubr.msk.bf16.vlgmr.msra.gmra.mxu1 %vm571_vm1, %v1312_v61 }
 0xdad   : > { %v1359_v25 = vpop.f32.mrf.mxu1 }
 0xdae   : > { %v1360_v27 = vadd.f32 %v1636_v24, %v1359_v25 }
 0xdaf   : > { %v1768_v28 = vpop.f32.mrf.mxu1 }
 0xdb0   : > { %v1366_v29 = vmul.f32 0.044715, %v1360_v27  ;;  %v1365_v37 = vmul.f32 0.5, %v1360_v27 }
 0xdb1   : > { %v1362_v30 = vpop.f32.mrf.mxu1 }
 0xdb2   : > { %v1367_v31 = vmul.f32 %v1366_v29, %v1360_v27 }
 0xdb3   : > { %v1769_v32 = vpop.f32.mrf.mxu1 }
 0xdb4   : > { %v1368_v33 = vmul.f32 %v1367_v31, %v1360_v27 }
 0xdb6   : > { %v1369_v34 = vadd.f32 %v1368_v33, %v1360_v27 }
 0xdb8   : > { %v1370_v35 = vmul.f32 0.7978846, %v1369_v34 }
 0xdba   : > { %1829 = vtanh.f32 %v1370_v35 }
 0xdc7   : > { %v1830_v36 = vpop.eup %1829 }
 0xdc8   : > { %v1372_v38 = vadd.f32 1.0, %v1830_v36 }
 0xdca   : > { %v1373_v3 = vmul.f32 %v1372_v38, %v1365_v37 }
 0xdcc   : > { %v1390_v39 = vpack.c.bf16 %v1373_v3, %v1373_v3 }
 0xdce   : > { %1787 = vmatmul.mubr.bf16.vlgmr.msra.gmra.mxu0 %v1390_v39 }
 0xe8e   : > { %v1440_v41 = vpop.f32.mrf.mxu0 }
 0xe8f   : > { %v1441_v42 = vadd.f32 %v1638_v40, %v1440_v41 }
 0xe90   : > { %v1788_v43 = vpop.f32.mrf.mxu0 }
 0xe91   : > { %v1446_v44 = vadd.f32 %v1441_v42, %v2134_v60 }
 0xe92   : > { %v1443_v45 = vpop.f32.mrf.mxu0 }
 0xe93   : > { %v1449_v7 = vsel %vm571_vm1, %v1446_v44, 0.0 }
 0xe94   : > { %1450 = vadd.xlane.f32.xlu1 %v1449_v7  ;;  %v1789_v46 = vpop.f32.mrf.mxu0 }
 0xf1d   : > { %v1451_v47 = vpop.xlane.xlu1 %1450 }
 0xf1e   : > { %v1452_v48 = vmul.f32 0.03125, %v1451_v47 }
 0xf20   : > { %v1453_v49 = vsub.f32 %v1446_v44, %v1452_v48 }
 0xf22   : > { %v1454_v50 = vmul.f32 %v1453_v49, %v1453_v49 }
 0xf24   : > { %v1455_v51 = vsel %vm571_vm1, %v1454_v50, 0.0 }
 0xf25   : > { %1456 = vadd.xlane.f32.xlu1 %v1455_v51 }
 0xf36   : > { %1478 = vrot.lane.b32.xlu1 %v1986_v11, %s1844_s25  ;;  %v1640_v11 = vld [vmem:[%s2237_s13] ss:$0 sm:$0xff] }
 0xfae   : > { %v1457_v52 = vpop.xlane.xlu1 %1456 }
 0xfaf   : > { %v1458_v53 = vmul.f32 0.03125, %v1457_v52 }
 0xfb1   : > { %v1459_v54 = vadd.f32 1e-05, %v1458_v53 }
 0xfb2   : > { %v1479_v55 = vpop.permute.xlu1 %1478 }
 0xfb3   : > { %1831 = vrsqrt.f32 %v1459_v54  ;;  %1481 = vst.msk [vmem:[%s547_s17] sm:$0xff] %vm571_vm1, %v1479_v55 }
 0xfc0   : > { %v1832_v56 = vpop.eup %1831 }
 0xfc1   : > { %v1461_v58 = vmul.f32 %v1832_v56, %v1453_v49 }
 0xfc3   : > { %v1468_v59 = vmul.f32 %v1639_v57, %v1461_v58 }
 0xfc5   : > { %v1475_v60 = vadd.f32 %v1640_v11, %v1468_v59 }
 0xfc7   : > { %1476 = vst.msk [vmem:[%s543_s26] sm:$0xff] %vm571_vm1, %v1475_v60 }
 0xfc8 PF: > { %s27_s21 = sadd.s32 1, %s1839_s21  }
 0xfc9   : > { %p24_p4 = scmp.ge.s32.totalorder %s27_s21, 4  }
 0xfcb   :  { %26 = sbr.rel (!%p24_p4) target bundleno = 2 (0x2), region = 133 }

// kernel: bert_gpt_forward.7
= control target key start
LH: loop header
LB: loop body
LE: loop exit
PB: predicated region body
PF: predicated region fallthrough
CT: control target
= control target key end

     0   :  { %s1904_s21 = smov 0   ;;  %s2180_s0 = inlined_call_operand.vmem [shape: f32[2,1,16], index: 0, kind: input, shape index: {}]   ;;  %s2181_s1 = inlined_call_operand.vmem [shape: f32[2,8,32], index: 1, kind: input, shape index: {}]   ;;  %s2182_s2 = inlined_call_operand.vmem [shape: f32[2,8,32], index: 2, kind: input, shape index: {}]   ;;  %s2183_s3 = inlined_call_operand.vmem [shape: f32[2,8,32], index: 3, kind: input, shape index: {}]   ;;  %s2184_s4 = inlined_call_operand.vmem [shape: f32[32,96], index: 4, kind: input, shape index: {}]   ;;  %s2185_s5 = inlined_call_operand.vmem [shape: f32[1,96], index: 5, kind: input, shape index: {}]   ;;  %s2186_s6 = inlined_call_operand.vmem [shape: f32[32,32], index: 6, kind: input, shape index: {}]   ;;  %s2187_s7 = inlined_call_operand.vmem [shape: f32[1,32], index: 7, kind: input, shape index: {}]   ;;  %s2188_s8 = inlined_call_operand.vmem [shape: f32[1,32], index: 8, kind: input, shape index: {}]   ;;  %s2189_s9 = inlined_call_operand.vmem [shape: f32[1,32], index: 9, kind: input, shape index: {}]   ;;  %s2190_s10 = inlined_call_operand.vmem [shape: f32[32,128], index: 10, kind: input, shape index: {}]   ;;  %s2191_s11 = inlined_call_operand.vmem [shape: f32[1,128], index: 11, kind: input, shape index: {}]   ;;  %s2192_s12 = inlined_call_operand.vmem [shape: f32[128,32], index: 12, kind: input, shape index: {}]   ;;  %s2193_s13 = inlined_call_operand.vmem [shape: f32[1,32], index: 13, kind: input, shape index: {}]   ;;  %s2194_s14 = inlined_call_operand.vmem [shape: f32[1,32], index: 14, kind: input, shape index: {}]   ;;  %s2195_s15 = inlined_call_operand.vmem [shape: f32[1,32], index: 15, kind: input, shape index: {}]   ;;  %s2196_s16 = inlined_call_operand.vmem [shape: f32[2,8,32], index: 16, kind: output, shape index: {}]  }
   0x1   :  { %2197 = sst [smem:[#allocation2_spill]] %s2180_s0 }
   0x2 LB: > { %s1585_s22 = sadd.s32 4294967295, %s1809_s21   ;;  %p1589_p0 = scmp.ge.s32.totalorder %s1809_s21, 1  ;;  %s1809_s21 = sphi %s1904_s21, %s26_s21  }
   0x3   : > { %p487_p1 = scmp.lt.s32.totalorder %s1809_s21, 3 }
   0x5   : > { %p488_p2 = pnand %p1589_p0, %p487_p1 }
   0x6   : > { %p546_p3 = scmp.lt.s32.totalorder (!%p488_p2), %s1585_s22, 1  ;;  %s1813_s29 = smov (!%p488_p2), 64  }
   0x7   : > { %491 = sbr.rel (%p488_p2) target bundleno = 4037 (0xfc5), region = 84  ;;  %s1814_s30 = smov (!%p488_p2), 96  }
   0x8   : > { %s2198_s27 = sld [smem:[#allocation2_spill]] (!%p488_p2)  ;;  %s1818_s19 = smov (!%p488_p2), 104  }
   0xc   : > { %s2200_s22 = smov (!%p546_p3, %s1585_s22), 1  ;;  %vm586_vm0 = vcmask 261120   ;;  %v617_v7 = vld [vmem:[%s2184_s4 + $0x10] sm:$0xff]  ;;  %v618_v8 = vld [vmem:[%s2184_s4 + $0x18] sm:$0xff]  ;;  %v615_v9 = vld [vmem:[%s2184_s4] sm:$0xff]  ;;  %v1811_v10 = vmov 0.0   ;;  %v570_v38 = vlaneseq }
   0xd   : > { %s1915_s23 = sshll.u32 %s2200_s22, 3  ;;  %1657 = vmatprep.subr.bf16.mxu1 %v1811_v10  ;;  %v621_v11 = vpack.c.bf16 %v618_v8, %v617_v7  ;;  %v616_v12 = vld [vmem:[%s2184_s4 + $0x8] sm:$0xff]  ;;  %vm1812_vm1 = vmmov 0   ;;  %1683 = vmatprep.subr.bf16.mxu0 %v1811_v10  ;;  %v1594_v18 = vld [vmem:[%s2188_s8] ss:$0 sm:$0xff]  ;;  %vm687_vm2 = vcmask 64512  }
   0xe   : > { %s552_s26 = scalar_lea.vmem %s2181_s1, %s1915_s23  ;;  %1661 = vmatprep.mubr.msk.bf16.mxu1 %vm1812_vm1, %v1811_v10  ;;  %1685 = vmatprep.mubr.msk.bf16.mxu0 %vm1812_vm1, %v1811_v10  ;;  %v620_v13 = vpack.c.bf16 %v616_v12, %v615_v9  ;;  %v1595_v20 = vld [vmem:[%s2189_s9] ss:$0 sm:$0xff]  ;;  %s556_s18 = scalar_lea.vmem %s2182_s2, %s1915_s23  ;;  %v573_v40 = vshrl.u32 %v570_v38, 7  ;;  %v571_v42 = vand.u32 127, %v570_v38  ;;  %v1815_v47 = vmov -1e+09  }
   0xf   : > { %v1921_v0 = vld [vmem:[%s552_s26] sm:$0xff]  ;;  %1658 = vmatpush3.bf16.msra.mxu1 %v621_v11  ;;  %s560_s24 = scalar_lea.vmem %s2183_s3, %s1915_s23  ;;  %s548_s28 = scalar_lea.vmem %s2198_s27, %s2200_s22  ;;  %vm736_vm4 = vcmask 130048   ;;  %vm913_vm5 = vcmask 1043456  }
  0x10   : > { %v587_v1 = vsel %vm586_vm0, %v1921_v0, 0.0  ;;  %1659 = vmatprep.subr.bf16.mxu1 %v1811_v10  ;;  %v1596_v24 = vld [vmem:[%s2185_s5] ss:$0 sm:$0xff]  ;;  %v574_v43 = vadd.s32 8, %v573_v40  ;;  %v580_v45 = vsub.s32 0, %v573_v40  ;;  %s1816_s22 = smov 120   ;;  %s564_s27 = scalar_lea.vmem %s2196_s16, %s1915_s23 }
  0x11   : > { %588 = vadd.xlane.f32.xlu0 %v587_v1  ;;  %v672_v30 = vld [vmem:[%s556_s18] sm:$0xff] }
  0x12   : > { %v677_v34 = vld [vmem:[%s560_s24] sm:$0xff]  ;;  %vm575_vm3 = vcmp.le.s32.totalorder %v571_v42, %v574_v43 }
  0x13   : > { %1660 = vmatpush3.bf16.msra.mxu1 %v620_v13  ;;  %v567_v39 = vld [vmem:[%s548_s28] sm:$0x1]  ;;  %v576_v48 = vsel %vm575_vm3, 0.0, %v1815_v47 }
  0x14   : > { %1665 = vmatprep.subr.bf16.mxu1 %v1811_v10  ;;  %v568_v41 = vsub.f32 1.0, %v567_v39 }
  0x16   : > { %v569_v44 = vmul.f32 -1e+09, %v568_v41 }
  0x18   : > { %v581_v46 = vrot.slane %v569_v44, %v580_v45 }
  0x1a   : > { %v1986_v49 = vadd.f32 %v581_v46, %v576_v48 }
  0x9a   : > { %v589_v2 = vpop.xlane.xlu0 %588 }
  0x9b   : > { %v591_v3 = vmul.f32 0.03125, %v589_v2 }
  0x9d   : > { %v592_v4 = vsub.f32 %v1921_v0, %v591_v3 }
  0x9f   : > { %v593_v5 = vmul.f32 %v592_v4, %v592_v4 }
  0xa1   : > { %v594_v6 = vsel %vm586_vm0, %v593_v5, 0.0 }
  0xa2   : > { %595 = vadd.xlane.f32.xlu0 %v594_v6 }
 0x12b   : > { %v596_v14 = vpop.xlane.xlu0 %595 }
 0x12c   : > { %v597_v15 = vmul.f32 0.03125, %v596_v14 }
 0x12e   : > { %v598_v16 = vadd.f32 1e-05, %v597_v15 }
 0x130   : > { %1781 = vrsqrt.f32 %v598_v16 }
 0x13d   : > { %v1782_v17 = vpop.eup %1781 }
 0x13e   : > { %v600_v19 = vmul.f32 %v1782_v17, %v592_v4 }
 0x140   : > { %v607_v21 = vmul.f32 %v1594_v18, %v600_v19 }
 0x142   : > { %v614_v22 = vadd.f32 %v1595_v20, %v607_v21 }
 0x144   : > { %v619_v23 = vpack.c.bf16 %v614_v22, %v614_v22 }
 0x146   : > { %1662 = vmatmul.mubr.msk.bf16.vlgmr.msra.gmra.mxu1 %vm586_vm0, %v619_v23 }
 0x147   : > { %1667 = vmatprep.mubr.msk.bf16.mxu1 %vm1812_vm1, %v1811_v10 }
 0x206   : > { %v666_v25 = vpop.f32.mrf.mxu1 }
 0x207   : > { %v667_v26 = vadd.f32 %v1596_v24, %v666_v25  ;;  %v682_v24 = vld [vmem:[%s2186_s6 + $0x8] sm:$0xff] }
 0x208   : > { %v1663_v27 = vpop.f32.mrf.mxu1  ;;  %v909_v25 = vpack.c.bf16 %v682_v24, %v682_v24 }
 0x209   : > { %678 = vrot.lane.b32.xlu0 %v667_v26, %s1813_s29  ;;  %674 = vrot.lane.b32.xlu1 %v667_v26, %s1814_s30  ;;  %v1972_v36 = vpack.c.bf16 %v667_v26, %v667_v26  ;;  %s1817_s29 = smov 112  }
 0x20a   : > { %v669_v28 = vpop.f32.mrf.mxu1  ;;  %v915_v26 = vsel %vm913_vm5, %v909_v25, 0 }
 0x20b   : > { %v681_v28 = vld [vmem:[%s2186_s6] sm:$0xff] }
 0x20c   : > { %v1664_v29 = vpop.f32.mrf.mxu1 }
 0x20d   : > { %v794_v29 = vpack.c.bf16 %v681_v28, %v681_v28 }
 0x27b   : > { %v675_v31 = vpop.permute.xlu1 %674  ;;  %v679_v35 = vpop.permute.xlu0 %678 }
 0x27c   : > { %v1963_v32 = vpack.c.bf16 %v675_v31, %v672_v30  ;;  %v1974_v37 = vpack.c.bf16 %v679_v35, %v677_v34  ;;  %v961_v34 = vsel %vm913_vm5, %v794_v29, 0 }
 0x27e   : > { %v692_v33 = vsel %vm687_vm2, %v1963_v32, 0 }
 0x27f   : > { %1666 = vmatpush3.bf16.xpose.msra.mxu1 %v692_v33 }
 0x280   : > { %1671 = vmatprep.subr.bf16.mxu1 %v1811_v10 }
 0x286   : > { %1668 = vmatmul.mubr.msk.bf16.vlgmr.msra.gmra.mxu1 %vm687_vm2, %v1972_v36 }
 0x287   : > { %1672 = vmatpush3.bf16.msra.mxu1 %v1974_v37  ;;  %1673 = vmatprep.mubr.msk.bf16.mxu1 %vm1812_vm1, %v1811_v10 }
 0x288   : > { %1677 = vmatprep.subr.bf16.mxu1 %v1811_v10 }
 0x346   : > { %v728_v50 = vpop.f32.mrf.mxu1 }
 0x347   : > { %v734_v51 = vmul.f32 0.35355338, %v728_v50 }
 0x348   : > { %v1669_v52 = vpop.f32.mrf.mxu1 }
 0x349   : > { %v735_v53 = vadd.f32 %v734_v51, %v1986_v49 }
 0x34a   : > { %v731_v54 = vpop.f32.mrf.mxu1 }
 0x34b   : > { %v737_v55 = vsel %vm736_vm4, %v735_v53, -inf }
 0x34c   : > { %v1670_v56 = vpop.f32.mrf.mxu1  ;;  %738 = vmax.xlane.f32.xlu1 %v737_v55 }
 0x3d5   : > { %v739_v57 = vpop.xlane.xlu1 %738 }
 0x3d6   : > { %v740_v58 = vsub.f32 %v735_v53, %v739_v57 }
 0x3d8   : > { %v741_v59 = vmul.f32 1.442695, %v740_v58 }
 0x3da   : > { %1783 = vpow2.f32 %v741_v59 }
 0x3e7   : > { %v1784_v60 = vpop.eup %1783 }
 0x3e8   : > { %v743_v61 = vsel %vm736_vm4, %v1784_v60, 0.0 }
 0x3e9   : > { %744 = vadd.xlane.f32.xlu0 %v743_v61 }
 0x3ff   : > { %799 = vrot.lane.b32.xlu0 %v1963_v32, %s1816_s22 }
 0x403   : > { %796 = vrot.lane.b32.xlu0 %v1972_v36, %s1816_s22 }
 0x472   : > { %v745_v62 = vpop.xlane.xlu0 %744 }
 0x473   : > { %1785 = vrcp.f32 %v745_v62 }
 0x476   : > { %v800_v2 = vpop.permute.xlu0 %799 }
 0x477   : > { %v805_v4 = vsel %vm687_vm2, %v800_v2, 0 }
 0x47a   : > { %v797_v5 = vpop.permute.xlu0 %796 }
 0x480   : > { %v1786_v63 = vpop.eup %1785 }
 0x481   : > { %v747_v1 = vmul.f32 %v1786_v63, %v1784_v60 }
 0x483   : > { %v748_v3 = vpack.c.bf16 %v747_v1, %v747_v1 }
 0x485   : > { %1674 = vmatmul.mubr.msk.bf16.vlgmr.msra.gmra.mxu1 %vm736_vm4, %v748_v3 }
 0x486   : > { %1678 = vmatpush3.bf16.xpose.msra.mxu1 %v805_v4  ;;  %1679 = vmatprep.mubr.msk.bf16.mxu1 %vm1812_vm1, %v1811_v10 }
 0x487   : > { %1689 = vmatprep.subr.bf16.mxu1 %v1811_v10 }
 0x48d   : > { %1680 = vmatmul.mubr.msk.bf16.vlgmr.msra.gmra.mxu1 %vm687_vm2, %v797_v5 }
 0x48e   : > { %1691 = vmatprep.mubr.msk.bf16.mxu1 %vm1812_vm1, %v1811_v10  ;;  %1690 = vmatpush3.bf16.msra.mxu1 %v915_v26 }
 0x48f   : > { %1701 = vmatprep.subr.bf16.mxu1 %v1811_v10 }
 0x545   : > { %v787_v6 = vpop.f32.mrf.mxu1 }
 0x546   : > { %v793_v35 = vpack.c.bf16 %v787_v6, %v787_v6 }
 0x547   : > { %v1675_v7 = vpop.f32.mrf.mxu1 }
 0x549   : > { %v790_v8 = vpop.f32.mrf.mxu1 }
 0x54b   : > { %v1676_v9 = vpop.f32.mrf.mxu1 }
 0x54d   : > { %v841_v11 = vpop.f32.mrf.mxu1 }
 0x54e   : > { %v847_v12 = vmul.f32 0.35355338, %v841_v11 }
 0x54f   : > { %v1681_v13 = vpop.f32.mrf.mxu1 }
 0x550   : > { %v848_v14 = vadd.f32 %v847_v12, %v1986_v49 }
 0x551   : > { %v844_v15 = vpop.f32.mrf.mxu1 }
 0x552   : > { %v849_v16 = vsel %vm736_vm4, %v848_v14, -inf }
 0x553   : > { %850 = vmax.xlane.f32.xlu1 %v849_v16  ;;  %v1682_v17 = vpop.f32.mrf.mxu1 }
 0x564   : > { %862 = vrot.lane.b32.xlu1 %v1974_v37, %s1816_s22 }
 0x568   : > { %1005 = vrot.lane.b32.xlu1 %v1963_v32, %s1817_s29 }
 0x56c   : > { %1003 = vrot.lane.b32.xlu1 %v1972_v36, %s1817_s29 }
 0x5dc   : > { %v851_v18 = vpop.xlane.xlu1 %850 }
 0x5dd   : > { %v852_v19 = vsub.f32 %v848_v14, %v851_v18 }
 0x5df   : > { %v853_v20 = vmul.f32 1.442695, %v852_v19 }
 0x5e0   : > { %v863_v21 = vpop.permute.xlu1 %862 }
 0x5e1   : > { %1787 = vpow2.f32 %v853_v20  ;;  %1684 = vmatpush3.bf16.msra.mxu0 %v863_v21 }
 0x5e2   : > { %1695 = vmatprep.subr.bf16.mxu0 %v1811_v10 }
 0x5e4   : > { %v1006_v39 = vpop.permute.xlu1 %1005 }
 0x5e5   : > { %v1011_v43 = vsel %vm687_vm2, %v1006_v39, 0 }
 0x5e8   : > { %v1004_v47 = vpop.permute.xlu1 %1003 }
 0x5ee   : > { %v1788_v22 = vpop.eup %1787 }
 0x5ef   : > { %v855_v23 = vsel %vm736_vm4, %v1788_v22, 0.0 }
 0x5f0   : > { %856 = vadd.xlane.f32.xlu0 %v855_v23 }
 0x606   : > { %1067 = vrot.lane.b32.xlu0 %v1974_v37, %s1817_s29 }
 0x679   : > { %v857_v27 = vpop.xlane.xlu0 %856 }
 0x67a   : > { %1789 = vrcp.f32 %v857_v27 }
 0x67d   : > { %v1068_v38 = vpop.permute.xlu0 %1067 }
 0x687   : > { %v1790_v30 = vpop.eup %1789 }
 0x688   : > { %v859_v31 = vmul.f32 %v1790_v30, %v1788_v22 }
 0x68a   : > { %v860_v33 = vpack.c.bf16 %v859_v31, %v859_v31 }
 0x68c   : > { %1686 = vmatmul.mubr.msk.bf16.vlgmr.msra.gmra.mxu0 %vm736_vm4, %v860_v33 }
 0x68d   : > { %1696 = vmatpush3.bf16.msra.mxu0 %v961_v34  ;;  %1697 = vmatprep.mubr.msk.bf16.mxu0 %vm1812_vm1, %v1811_v10 }
 0x68e   : > { %1707 = vmatprep.subr.bf16.mxu0 %v1811_v10 }
 0x694   : > { %1698 = vmatmul.mubr.msk.bf16.vlgmr.msra.gmra.mxu0 %vm687_vm2, %v793_v35 }
 0x695   : > { %1708 = vmatpush3.bf16.msra.mxu0 %v1068_v38  ;;  %1709 = vmatprep.mubr.msk.bf16.mxu0 %vm1812_vm1, %v1811_v10 }
 0x696   : > { %1719 = vmatprep.subr.bf16.mxu0 %v1811_v10 }
 0x74c   : > { %v902_v40 = vpop.f32.mrf.mxu0 }
 0x74d   : > { %v908_v41 = vpack.c.bf16 %v902_v40, %v902_v40 }
 0x74e   : > { %v1687_v42 = vpop.f32.mrf.mxu0 }
 0x74f   : > { %1692 = vmatmul.mubr.msk.bf16.vlgmr.msra.gmra.mxu1 %vm687_vm2, %v908_v41 }
 0x750   : > { %1702 = vmatpush3.bf16.xpose.msra.mxu1 %v1011_v43  ;;  %v905_v44 = vpop.f32.mrf.mxu0  ;;  %1703 = vmatprep.mubr.msk.bf16.mxu1 %vm1812_vm1, %v1811_v10 }
 0x751   : > { %1713 = vmatprep.subr.bf16.mxu1 %v1811_v10 }
 0x752   : > { %v1688_v45 = vpop.f32.mrf.mxu0 }
 0x754   : > { %v2031_v46 = vpop.f32.mrf.mxu0 }
 0x756   : > { %v1699_v48 = vpop.f32.mrf.mxu0 }
 0x757   : > { %1704 = vmatmul.mubr.msk.bf16.vlgmr.msra.gmra.mxu1 %vm687_vm2, %v1004_v47 }
 0x758   : > { %v1000_v50 = vpop.f32.mrf.mxu0  ;;  %1715 = vmatprep.mubr.msk.bf16.mxu1 %vm1812_vm1, %v1811_v10 }
 0x75a   : > { %v1700_v51 = vpop.f32.mrf.mxu0 }
 0x80f   : > { %v2036_v52 = vpop.f32.mrf.mxu1 }
 0x811   : > { %v1693_v53 = vpop.f32.mrf.mxu1 }
 0x812   : > { %v1610_v53 = vld [vmem:[%s2187_s7] ss:$0 sm:$0xff] }
 0x813   : > { %v954_v54 = vpop.f32.mrf.mxu1 }
 0x815   : > { %v1694_v55 = vpop.f32.mrf.mxu1 }
 0x817   : > { %v1047_v56 = vpop.f32.mrf.mxu1 }
 0x818   : > { %v1053_v57 = vmul.f32 0.35355338, %v1047_v56 }
 0x819   : > { %v1705_v58 = vpop.f32.mrf.mxu1 }
 0x81a   : > { %v1054_v59 = vadd.f32 %v1053_v57, %v1986_v49 }
 0x81b   : > { %v1050_v60 = vpop.f32.mrf.mxu1 }
 0x81c   : > { %v1055_v61 = vsel %vm736_vm4, %v1054_v59, -inf }
 0x81d   : > { %1056 = vmax.xlane.f32.xlu1 %v1055_v61  ;;  %v1706_v62 = vpop.f32.mrf.mxu1 }
 0x8a6   : > { %v1057_v63 = vpop.xlane.xlu1 %1056 }
 0x8a7   : > { %v1058_v1 = vsub.f32 %v1054_v59, %v1057_v63 }
 0x8a9   : > { %v1059_v2 = vmul.f32 1.442695, %v1058_v1 }
 0x8ab   : > { %1791 = vpow2.f32 %v1059_v2 }
 0x8b8   : > { %v1792_v3 = vpop.eup %1791 }
 0x8b9   : > { %v1061_v4 = vsel %vm736_vm4, %v1792_v3, 0.0 }
 0x8ba   : > { %1062 = vadd.xlane.f32.xlu0 %v1061_v4 }
 0x8d0   : > { %1164 = vrot.lane.b32.xlu0 %v1963_v32, %s1818_s19 }
 0x8d4   : > { %1162 = vrot.lane.b32.xlu0 %v1972_v36, %s1818_s19  ;;  %v683_v36 = vld [vmem:[%s2186_s6 + $0x10] sm:$0xff] }
 0x8d5   : > { %v1114_v12 = vpack.c.bf16 %v683_v36, %v683_v36  ;;  %v1611_v36 = vld [vmem:[%s2194_s14] ss:$0 sm:$0xff] }
 0x8d7   : > { %v1119_v13 = vsel %vm913_vm5, %v1114_v12, 0 }
 0x8d8   : > { %1714 = vmatpush3.bf16.msra.mxu1 %v1119_v13  ;;  %v1612_v13 = vld [vmem:[%s2195_s15] ss:$0 sm:$0xff] }
 0x8d9   : > { %1725 = vmatprep.subr.bf16.mxu1 %v1811_v10 }
 0x943   : > { %v1063_v5 = vpop.xlane.xlu0 %1062 }
 0x944   : > { %1793 = vrcp.f32 %v1063_v5  ;;  %v1359_v5 = vld [vmem:[%s2190_s10] sm:$0xff] }
 0x947   : > { %v1165_v8 = vpop.permute.xlu0 %1164 }
 0x948   : > { %v1170_v11 = vsel %vm687_vm2, %v1165_v8, 0 }
 0x94b   : > { %v1163_v32 = vpop.permute.xlu0 %1162 }
 0x951   : > { %v1794_v6 = vpop.eup %1793 }
 0x952   : > { %v1065_v7 = vmul.f32 %v1794_v6, %v1792_v3  ;;  %v1361_v3 = vld [vmem:[%s2190_s10 + $0x10] sm:$0xff]  ;;  %v1360_v6 = vld [vmem:[%s2190_s10 + $0x8] sm:$0xff] }
 0x954   : > { %v1066_v9 = vpack.c.bf16 %v1065_v7, %v1065_v7  ;;  %v1364_v7 = vpack.c.bf16 %v1360_v6, %v1359_v5 }
 0x956   : > { %1710 = vmatmul.mubr.msk.bf16.vlgmr.msra.gmra.mxu0 %vm736_vm4, %v1066_v9 }
 0x957   : > { %1720 = vmatpush3.bf16.xpose.msra.mxu0 %v1170_v11  ;;  %1721 = vmatprep.mubr.msk.bf16.mxu0 %vm1812_vm1, %v1811_v10 }
 0x958   : > { %1731 = vmatprep.subr.bf16.mxu0 %v1811_v10 }
 0x95e   : > { %1722 = vmatmul.mubr.msk.bf16.vlgmr.msra.gmra.mxu0 %vm687_vm2, %v1163_v32 }
 0x95f   : > { %1733 = vmatprep.mubr.msk.bf16.mxu0 %vm1812_vm1, %v1811_v10 }
 0xa16   : > { %v1107_v14 = vpop.f32.mrf.mxu0 }
 0xa17   : > { %v1113_v15 = vpack.c.bf16 %v1107_v14, %v1107_v14 }
 0xa18   : > { %v1711_v16 = vpop.f32.mrf.mxu0 }
 0xa19   : > { %1716 = vmatmul.mubr.msk.bf16.vlgmr.msra.gmra.mxu1 %vm687_vm2, %v1113_v15 }
 0xa1a   : > { %v1110_v17 = vpop.f32.mrf.mxu0  ;;  %1727 = vmatprep.mubr.msk.bf16.mxu1 %vm1812_vm1, %v1811_v10 }
 0xa1b   : > { %v1439_v17 = vld [vmem:[%s2192_s12 + $0x70] sm:$0xff] }
 0xa1c   : > { %v1712_v18 = vpop.f32.mrf.mxu0 }
 0xa1d   : > { %v1440_v18 = vld [vmem:[%s2192_s12 + $0x78] sm:$0xff] }
 0xa1e   : > { %v1206_v19 = vpop.f32.mrf.mxu0 }
 0xa1f   : > { %v1212_v20 = vmul.f32 0.35355338, %v1206_v19  ;;  %v1449_v19 = vpack.c.bf16 %v1440_v18, %v1439_v17 }
 0xa20   : > { %v1723_v21 = vpop.f32.mrf.mxu0 }
 0xa21   : > { %v1213_v22 = vadd.f32 %v1212_v20, %v1986_v49  ;;  %v998_v49 = vadd.f32 %v2031_v46, %v2036_v52  ;;  %v1437_v20 = vld [vmem:[%s2192_s12 + $0x60] sm:$0xff]  ;;  %v1438_v21 = vld [vmem:[%s2192_s12 + $0x68] sm:$0xff] }
 0xa22   : > { %v1209_v23 = vpop.f32.mrf.mxu0 }
 0xa23   : > { %v1214_v24 = vsel %vm736_vm4, %v1213_v22, -inf  ;;  %v1435_v23 = vld [vmem:[%s2192_s12 + $0x50] sm:$0xff] }
 0xa24   : > { %1215 = vmax.xlane.f32.xlu1 %v1214_v24  ;;  %v1724_v25 = vpop.f32.mrf.mxu0  ;;  %v1436_v24 = vld [vmem:[%s2192_s12 + $0x58] sm:$0xff] }
 0xa25   : > { %v1447_v25 = vpack.c.bf16 %v1436_v24, %v1435_v23 }
 0xa35   : > { %1226 = vrot.lane.b32.xlu1 %v1974_v37, %s1818_s19  ;;  %v684_v37 = vld [vmem:[%s2186_s6 + $0x18] sm:$0xff] }
 0xa36   : > { %v1273_v39 = vpack.c.bf16 %v684_v37, %v684_v37 }
 0xa38   : > { %v1278_v41 = vsel %vm913_vm5, %v1273_v39, 0  ;;  %v1425_v39 = vld [vmem:[%s2192_s12] sm:$0xff] }
 0xa39   : > { %1732 = vmatpush3.bf16.msra.mxu0 %v1278_v41 }
 0xa3a   : > { %1745 = vmatprep.subr.bf16.mxu0 %v1811_v10 }
 0xaad   : > { %v1216_v26 = vpop.xlane.xlu1 %1215 }
 0xaae   : > { %v1217_v27 = vsub.f32 %v1213_v22, %v1216_v26  ;;  %v1448_v22 = vpack.c.bf16 %v1438_v21, %v1437_v20  ;;  %v1433_v26 = vld [vmem:[%s2192_s12 + $0x40] sm:$0xff] }
 0xab0   : > { %v1218_v28 = vmul.f32 1.442695, %v1217_v27  ;;  %v1434_v27 = vld [vmem:[%s2192_s12 + $0x48] sm:$0xff] }
 0xab1   : > { %v1227_v29 = vpop.permute.xlu1 %1226 }
 0xab2   : > { %1795 = vpow2.f32 %v1218_v28  ;;  %1726 = vmatpush3.bf16.msra.mxu1 %v1227_v29  ;;  %v1446_v28 = vpack.c.bf16 %v1434_v27, %v1433_v26  ;;  %v1431_v29 = vld [vmem:[%s2192_s12 + $0x30] sm:$0xff] }
 0xab3   : > { %1737 = vmatprep.subr.bf16.mxu1 %v1811_v10 }
 0xabf   : > { %v1796_v30 = vpop.eup %1795 }
 0xac0   : > { %v1220_v31 = vsel %vm736_vm4, %v1796_v30, 0.0 }
 0xac1   : > { %1221 = vadd.xlane.f32.xlu0 %v1220_v31 }
 0xad9   : > { %v1155_v33 = vpop.f32.mrf.mxu1 }
 0xada   : > { %v1161_v34 = vadd.f32 %v1155_v33, %v998_v49  ;;  %v1429_v49 = vld [vmem:[%s2192_s12 + $0x20] sm:$0xff]  ;;  %v1430_v33 = vld [vmem:[%s2192_s12 + $0x28] sm:$0xff] }
 0xadb   : > { %v1717_v35 = vpop.f32.mrf.mxu1 }
 0xadc   : > { %v1427_v35 = vld [vmem:[%s2192_s12 + $0x10] sm:$0xff] }
 0xadd   : > { %v1158_v38 = vpop.f32.mrf.mxu1 }
 0xade   : > { %v1428_v38 = vld [vmem:[%s2192_s12 + $0x18] sm:$0xff] }
 0xadf   : > { %v1718_v40 = vpop.f32.mrf.mxu1  ;;  %v1443_v37 = vpack.c.bf16 %v1428_v38, %v1427_v35 }
 0xae0   : > { %v1426_v40 = vld [vmem:[%s2192_s12 + $0x8] sm:$0xff] }
 0xae1   : > { %v1442_v41 = vpack.c.bf16 %v1426_v40, %v1425_v39 }
 0xb4a   : > { %v1222_v42 = vpop.xlane.xlu0 %1221 }
 0xb4b   : > { %1797 = vrcp.f32 %v1222_v42  ;;  %v1613_v42 = vld [vmem:[%s2191_s11] ss:$0 sm:$0xff] }
 0xb58   : > { %v1798_v43 = vpop.eup %1797 }
 0xb59   : > { %v1224_v44 = vmul.f32 %v1798_v43, %v1796_v30  ;;  %v1432_v30 = vld [vmem:[%s2192_s12 + $0x38] sm:$0xff] }
 0xb5a   : > { %v1445_v31 = vpack.c.bf16 %v1432_v30, %v1431_v29 }
 0xb5b   : > { %v1225_v45 = vpack.c.bf16 %v1224_v44, %v1224_v44 }
 0xb5d   : > { %1728 = vmatmul.mubr.msk.bf16.vlgmr.msra.gmra.mxu1 %vm736_vm4, %v1225_v45 }
 0xb5e   : > { %1741 = vmatprep.mubr.msk.bf16.mxu1 %vm1812_vm1, %v1811_v10 }
 0xc1d   : > { %v1266_v46 = vpop.f32.mrf.mxu1 }
 0xc1e   : > { %v1272_v47 = vpack.c.bf16 %v1266_v46, %v1266_v46 }
 0xc1f   : > { %v1729_v48 = vpop.f32.mrf.mxu1 }
 0xc20   : > { %1734 = vmatmul.mubr.msk.bf16.vlgmr.msra.gmra.mxu0 %vm687_vm2, %v1272_v47 }
 0xc21   : > { %v1269_v50 = vpop.f32.mrf.mxu1  ;;  %1761 = vmatprep.mubr.msk.bf16.mxu0 %vm1812_vm1, %v1811_v10  ;;  %1746 = vmatpush3.bf16.msra.mxu0 %v1449_v19 }
 0xc22   : > { %1747 = vmatprep.subr.bf16.mxu0 %v1811_v10 }
 0xc23   : > { %v1730_v51 = vpop.f32.mrf.mxu1 }
 0xc25   : > { %1748 = vmatpush3.bf16.msra.mxu0 %v1448_v22 }
 0xc26   : > { %1749 = vmatprep.subr.bf16.mxu0 %v1811_v10 }
 0xc29   : > { %1750 = vmatpush3.bf16.msra.mxu0 %v1447_v25 }
 0xc2a   : > { %1751 = vmatprep.subr.bf16.mxu0 %v1811_v10 }
 0xc2d   : > { %1752 = vmatpush3.bf16.msra.mxu0 %v1446_v28 }
 0xc2e   : > { %1753 = vmatprep.subr.bf16.mxu0 %v1811_v10 }
 0xc31   : > { %1754 = vmatpush3.bf16.msra.mxu0 %v1445_v31 }
 0xc32   : > { %1755 = vmatprep.subr.bf16.mxu0 %v1811_v10 }
 0xce0   : > { %v1314_v52 = vpop.f32.mrf.mxu0 }
 0xce1   : > { %v1320_v54 = vadd.f32 %v1314_v52, %v1161_v34  ;;  %v1444_v34 = vpack.c.bf16 %v1430_v33, %v1429_v49 }
 0xce2   : > { %v1735_v55 = vpop.f32.mrf.mxu0 }
 0xce3   : > { %v1328_v56 = vadd.f32 %v1610_v53, %v1320_v54  ;;  %1756 = vmatpush3.bf16.msra.mxu0 %v1444_v34 }
 0xce4   : > { %v1317_v57 = vpop.f32.mrf.mxu0  ;;  %1757 = vmatprep.subr.bf16.mxu0 %v1811_v10 }
 0xce5   : > { %v2084_v58 = vadd.f32 %v1328_v56, %v1921_v0  ;;  %v1362_v0 = vld [vmem:[%s2190_s10 + $0x18] sm:$0xff] }
 0xce6   : > { %v1736_v59 = vpop.f32.mrf.mxu0  ;;  %v1365_v4 = vpack.c.bf16 %v1362_v0, %v1361_v3 }
 0xce7   : > { %v1332_v60 = vsel %vm586_vm0, %v2084_v58, 0.0  ;;  %1758 = vmatpush3.bf16.msra.mxu0 %v1443_v37  ;;  %v1615_v59 = vld [vmem:[%s2193_s13] ss:$0 sm:$0xff] }
 0xce8   : > { %1333 = vadd.xlane.f32.xlu1 %v1332_v60  ;;  %1738 = vmatpush3.bf16.msra.mxu1 %v1365_v4 }
 0xce9   : > { %1739 = vmatprep.subr.bf16.mxu1 %v1811_v10  ;;  %1759 = vmatprep.subr.bf16.mxu0 %v1811_v10 }
 0xceb   : > { %1760 = vmatpush3.bf16.msra.mxu0 %v1442_v41 }
 0xcec   : > { %1740 = vmatpush3.bf16.msra.mxu1 %v1364_v7 }
 0xd71   : > { %v1334_v61 = vpop.xlane.xlu1 %1333 }
 0xd72   : > { %v1335_v62 = vmul.f32 0.03125, %v1334_v61 }
 0xd74   : > { %v1336_v63 = vsub.f32 %v2084_v58, %v1335_v62 }
 0xd76   : > { %v1337_v1 = vmul.f32 %v1336_v63, %v1336_v63 }
 0xd78   : > { %v1338_v2 = vsel %vm586_vm0, %v1337_v1, 0.0 }
 0xd79   : > { %1339 = vadd.xlane.f32.xlu0 %v1338_v2 }
 0xe02   : > { %v1340_v8 = vpop.xlane.xlu0 %1339 }
 0xe03   : > { %v1341_v9 = vmul.f32 0.03125, %v1340_v8 }
 0xe05   : > { %v1342_v11 = vadd.f32 1e-05, %v1341_v9 }
 0xe07   : > { %1799 = vrsqrt.f32 %v1342_v11 }
 0xe14   : > { %v1800_v32 = vpop.eup %1799 }
 0xe15   : > { %v1344_v12 = vmul.f32 %v1800_v32, %v1336_v63 }
 0xe17   : > { %v1351_v14 = vmul.f32 %v1611_v36, %v1344_v12 }
 0xe19   : > { %v1358_v15 = vadd.f32 %v1612_v13, %v1351_v14 }
 0xe1b   : > { %v1363_v16 = vpack.c.bf16 %v1358_v15, %v1358_v15 }
 0xe1d   : > { %1742 = vmatmul.mubr.msk.bf16.vlgmr.msra.gmra.mxu1 %vm586_vm0, %v1363_v16 }
 0xedd   : > { %v1410_v43 = vpop.f32.mrf.mxu1 }
 0xede   : > { %v1411_v44 = vadd.f32 %v1613_v42, %v1410_v43 }
 0xedf   : > { %v1743_v45 = vpop.f32.mrf.mxu1 }
 0xee0   : > { %v1417_v46 = vmul.f32 0.044715, %v1411_v44  ;;  %v1416_v55 = vmul.f32 0.5, %v1411_v44 }
 0xee1   : > { %v1413_v47 = vpop.f32.mrf.mxu1 }
 0xee2   : > { %v1418_v48 = vmul.f32 %v1417_v46, %v1411_v44 }
 0xee3   : > { %v1744_v50 = vpop.f32.mrf.mxu1 }
 0xee4   : > { %v1419_v51 = vmul.f32 %v1418_v48, %v1411_v44 }
 0xee6   : > { %v1420_v52 = vadd.f32 %v1419_v51, %v1411_v44 }
 0xee8   : > { %v1421_v53 = vmul.f32 0.7978846, %v1420_v52 }
 0xeea   : > { %1801 = vtanh.f32 %v1421_v53 }
 0xef7   : > { %v1802_v54 = vpop.eup %1801 }
 0xef8   : > { %v1423_v10 = vadd.f32 1.0, %v1802_v54 }
 0xefa   : > { %v1424_v56 = vmul.f32 %v1423_v10, %v1416_v55 }
 0xefc   : > { %v1441_v57 = vpack.c.bf16 %v1424_v56, %v1424_v56 }
 0xefe   : > { %1762 = vmatmul.mubr.bf16.vlgmr.msra.gmra.mxu0 %v1441_v57 }
 0xfbe   : > { %v1491_v60 = vpop.f32.mrf.mxu0 }
 0xfbf   : > { %v1492_v61 = vadd.f32 %v1615_v59, %v1491_v60 }
 0xfc0   : > { %v1763_v62 = vpop.f32.mrf.mxu0 }
 0xfc1   : > { %v1497_v63 = vadd.f32 %v1492_v61, %v2084_v58 }
 0xfc2   : > { %v1494_v1 = vpop.f32.mrf.mxu0 }
 0xfc3   : > { %1498 = vst.msk [vmem:[%s564_s27] sm:$0xff] %vm586_vm0, %v1497_v63 }
 0xfc4   : > { %v1764_v2 = vpop.f32.mrf.mxu0 }
 0xfc5 PF: > { %s26_s21 = sadd.s32 1, %s1809_s21  }
 0xfc6   : > { %p23_p4 = scmp.ge.s32.totalorder %s26_s21, 4  }
 0xfc8   :  { %25 = sbr.rel (!%p23_p4) target bundleno = 2 (0x2), region = 123 }

// kernel: bert_gpt_forward.6
= control target key start
LH: loop header
LB: loop body
LE: loop exit
PB: predicated region body
PF: predicated region fallthrough
CT: control target
= control target key end

     0   :  { %s2400_s0 = inlined_call_operand.vmem [shape: f32[2,1,8], index: 0, kind: input, shape index: {}]   ;;  %s2401_s1 = inlined_call_operand.vmem [shape: f32[2,8,32], index: 1, kind: input, shape index: {}]   ;;  %s2402_s2 = inlined_call_operand.vmem [shape: f32[32,96], index: 2, kind: input, shape index: {}]   ;;  %s2403_s3 = inlined_call_operand.vmem [shape: f32[1,96], index: 3, kind: input, shape index: {}]   ;;  %s2404_s4 = inlined_call_operand.vmem [shape: f32[32,32], index: 4, kind: input, shape index: {}]   ;;  %s2405_s5 = inlined_call_operand.vmem [shape: f32[1,32], index: 5, kind: input, shape index: {}]   ;;  %s2406_s6 = inlined_call_operand.vmem [shape: f32[1,32], index: 6, kind: input, shape index: {}]   ;;  %s2407_s7 = inlined_call_operand.vmem [shape: f32[1,32], index: 7, kind: input, shape index: {}]   ;;  %s2408_s8 = inlined_call_operand.vmem [shape: f32[32,128], index: 8, kind: input, shape index: {}]   ;;  %s2409_s9 = inlined_call_operand.vmem [shape: f32[1,128], index: 9, kind: input, shape index: {}]   ;;  %s2410_s10 = inlined_call_operand.vmem [shape: f32[128,32], index: 10, kind: input, shape index: {}]   ;;  %s2411_s11 = inlined_call_operand.vmem [shape: f32[1,32], index: 11, kind: input, shape index: {}]   ;;  %s2412_s12 = inlined_call_operand.vmem [shape: f32[1,32], index: 12, kind: input, shape index: {}]   ;;  %s2413_s13 = inlined_call_operand.vmem [shape: f32[1,32], index: 13, kind: input, shape index: {}]   ;;  %s2414_s14 = inlined_call_operand.hbm [shape: f32[2,8,32], index: 14, kind: output, shape index: {0}]   ;;  %s2415_s15 = inlined_call_operand.vmem [shape: f32[2,8,32], index: 15, kind: output, shape index: {1}]   ;;  %s2416_s16 = inlined_call_operand.vmem [shape: f32[2,8,32], index: 16, kind: output, shape index: {2}]  }
   0x1   :  { %2419 = sst [smem:[#allocation7_spill]] %s2400_s0 }
   0x2   :  { %2420 = sst [smem:[#allocation8_spill]] %s2401_s1 }
   0x3   :  { %2421 = sst [smem:[#allocation9_spill]] %s2402_s2 }
   0x4   :  { %2422 = sst [smem:[#allocation10_spill]] %s2403_s3 }
   0x5   :  { %2423 = sst [smem:[#allocation11_spill]] %s2404_s4 }
   0x6   :  { %2424 = sst [smem:[#allocation12_spill]] %s2405_s5 }
   0x7   :  { %22 = vsyncpa [#allocation3], 0 }
   0x8   :  { %24 = vsyncpa [#allocation3 + $0x1], 0  ;;  %s2046_s21 = smov 0   ;;  %s2048_s22 = smov 0  }
   0x9   :  { %s2050_s23 = smov 0   ;;  %s2052_s24 = smov 0  }
   0xa LB: > { %2425 = sst [smem:[#allocation5_spill]] %s1941_s23  ;;  %s2067_s25 = sadd.s32 4294967295, %s1945_s24   ;;  %s1945_s24 = sphi %s2052_s24, %s2440_s24   ;;  %s1941_s23 = sphi %s2050_s23, %s2437_s23   ;;  %s1937_s22 = sphi %s2048_s22, %s2439_s22   ;;  %s1933_s21 = sphi %s2046_s21, %s2438_s21  }
   0xb   : > { %s1630_s26 = sadd.s32 4294967294, %s1945_s24   ;;  %s2071_s27 = sadd.s32 1, %s1945_s24  }
   0xc   : > { %s341_s28 = sadd.s32 1, %s1941_s23  ;;  %s338_s29 = ssub.s32 %s1945_s24, %s2071_s27 }
   0xd   : > { %p351_p0 = scmp.ne.s32.totalorder %s1941_s23, %s1937_s22  ;;  %p339_p1 = scmp.eq.s32.totalorder %s338_s29, 0 }
   0xe   : > { %p352_p2 = scmp.eq.s32.totalorder %s2067_s25, 1  ;;  %p357_p3 = scmp.ne.s32.totalorder %s1937_s22, %s1933_s21 }
   0xf   : > { %p358_p4 = scmp.eq.s32.totalorder %s1630_s26, 1  ;;  %p1633_p7 = scmp.ge.s32.totalorder %s1945_s24, 1 }
  0x10   : > { %s2082_s30 = scalar_select %p339_p1, %s1941_s23, %s341_s28  }
  0x11   : > { %p2084_p5 = por %p352_p2, %p351_p0  ;;  %p2088_p6 = por %p358_p4, %p357_p3 }
  0x12   : > { %2426 = sst [smem:[#allocation6_spill]] %s2082_s30  ;;  %p477_p8 = scmp.lt.s32.totalorder %s1945_s24, 3 }
  0x14   : > { %p478_p9 = pnand %p1633_p7, %p477_p8 }
  0x15   : > { %s2429_s2 = sld [smem:[#allocation9_spill]] (!%p478_p9)  ;;  %p537_p10 = scmp.lt.s32.totalorder (!%p478_p9), %s2067_s25, 1 }
  0x16   : > { %481 = sbr.rel (%p478_p9) target bundleno = 4067 (0xfe3), region = 76  ;;  %s2430_s1 = sld [smem:[#allocation8_spill]] (!%p478_p9) }
  0x17   : > { %s2431_s3 = sld [smem:[#allocation10_spill]] (!%p478_p9)  ;;  %s1949_s29 = smov (!%p478_p9), 64  }
  0x18   : > { %s2418_s23 = smov (!%p478_p9), 96   ;;  %s2432_s26 = sld [smem:[#allocation7_spill]] (!%p478_p9) }
  0x19   : > { %s1952_s30 = smov (!%p478_p9), 120   ;;  %s2433_s4 = sld [smem:[#allocation11_spill]] (!%p478_p9) }
  0x1a   : > { %s2434_s5 = sld [smem:[#allocation12_spill]] (!%p478_p9) }
  0x1b   : > { %v559_v0 = vld [vmem:[%s2429_s2 + $0x10] sm:$0xff]  ;;  %v560_v1 = vld [vmem:[%s2429_s2 + $0x18] sm:$0xff]  ;;  %v557_v2 = vld [vmem:[%s2429_s2] sm:$0xff]  ;;  %v1947_v3 = vmov 0.0   ;;  %vm1948_vm0 = vmmov 0   ;;  %s2111_s18 = scalar_select %p537_p10, %s2067_s25, 1  ;;  %v672_v20 = vlaneseq }
  0x1c   : > { %1703 = vmatprep.subr.bf16.mxu1 %v1947_v3  ;;  %v563_v4 = vpack.c.bf16 %v560_v1, %v559_v0  ;;  %v558_v5 = vld [vmem:[%s2429_s2 + $0x8] sm:$0xff]  ;;  %1707 = vmatprep.mubr.msk.bf16.mxu1 %vm1948_vm0, %v1947_v3  ;;  %vm571_vm1 = vcmask 261120   ;;  %vm623_vm2 = vcmask 64512   ;;  %vm695_vm3 = vcmask 1043456   ;;  %s2435_s2 = smov 96  }
  0x1d   : > { %1729 = vmatprep.subr.bf16.mxu0 %v1947_v3  ;;  %1731 = vmatprep.mubr.msk.bf16.mxu0 %vm1948_vm0, %v1947_v3  ;;  %v562_v6 = vpack.c.bf16 %v558_v5, %v557_v2  ;;  %s2118_s19 = sshll.u32 %s2111_s18, 3  ;;  %v1638_v9 = vld [vmem:[%s2431_s3] ss:$0 sm:$0xff]  ;;  %v673_v23 = vshrl.u32 %v672_v20, 7 }
  0x1e   : > { %1704 = vmatpush3.bf16.msra.mxu1 %v563_v4  ;;  %s543_s20 = scalar_lea.vmem %s2430_s1, %s2118_s19  ;;  %s539_s28 = scalar_lea.vmem %s2432_s26, %s2111_s18 }
  0x1f   : > { %1705 = vmatprep.subr.bf16.mxu1 %v1947_v3  ;;  %v2124_v7 = vld [vmem:[%s543_s20] sm:$0xff]  ;;  %v674_v25 = vsub.s32 0, %v673_v23  ;;  %s1951_s18 = smov 88   ;;  %s1953_s20 = smov 56   ;;  %v616_v62 = vld [vmem:[%s2433_s4 + $0x8] sm:$0xff] }
  0x20   : > { %v561_v8 = vpack.c.bf16 %v2124_v7, %v2124_v7  ;;  %v554_v21 = vld [vmem:[%s539_s28] sm:$0x1]  ;;  %s1954_s26 = smov 80   ;;  %s1955_s28 = smov 112   ;;  %v854_v63 = vpack.c.bf16 %v616_v62, %v616_v62 }
  0x21   : > { %v555_v22 = vsub.f32 1.0, %v554_v21  ;;  %v615_v5 = vld [vmem:[%s2433_s4] sm:$0xff]  ;;  %s1960_s1 = smov [#allocation2]  }
  0x22   : > { %1706 = vmatpush3.bf16.msra.mxu1 %v562_v6  ;;  %v859_v0 = vsel %vm695_vm3, %v854_v63, 0  ;;  %v740_v6 = vpack.c.bf16 %v615_v5, %v615_v5 }
  0x23   : > { %1711 = vmatprep.subr.bf16.mxu1 %v1947_v3  ;;  %v556_v24 = vmul.f32 -1e+09, %v555_v22 }
  0x25   : > { %1708 = vmatmul.mubr.msk.bf16.vlgmr.msra.gmra.mxu1 %vm571_vm1, %v561_v8  ;;  %v2157_v26 = vrot.slane %v556_v24, %v674_v25 }
  0x26   : > { %1713 = vmatprep.mubr.msk.bf16.mxu1 %vm1948_vm0, %v1947_v3 }
  0xe5   : > { %v609_v10 = vpop.f32.mrf.mxu1 }
  0xe6   : > { %v2135_v11 = vadd.f32 %v1638_v9, %v609_v10 }
  0xe7   : > { %v1709_v12 = vpop.f32.mrf.mxu1 }
  0xe8   : > { %v2139_v13 = vpack.c.bf16 %v2135_v11, %v2135_v11  ;;  %v905_v12 = vsel %vm695_vm3, %v740_v6, 0 }
  0xe9   : > { %v612_v14 = vpop.f32.mrf.mxu1 }
  0xea   : > { %690 = vrot.lane.b32.xlu1 %v2139_v13, %s1949_s29  ;;  %621 = vrot.lane.b32.xlu0 %v2139_v13, %s2418_s23 }
  0xeb   : > { %v1710_v15 = vpop.f32.mrf.mxu1 }
 0x15c   : > { %v622_v16 = vpop.permute.xlu0 %621  ;;  %v691_v18 = vpop.permute.xlu1 %690 }
 0x15d   : > { %v628_v17 = vsel %vm623_vm2, %v622_v16, 0  ;;  %v697_v19 = vsel %vm695_vm3, %v691_v18, 0 }
 0x15e   : > { %1712 = vmatpush3.bf16.xpose.msra.mxu1 %v628_v17 }
 0x15f   : > { %1717 = vmatprep.subr.bf16.mxu1 %v1947_v3 }
 0x165   : > { %1714 = vmatmul.mubr.msk.bf16.vlgmr.msra.gmra.mxu1 %vm623_vm2, %v2139_v13 }
 0x166   : > { %1718 = vmatpush3.bf16.msra.mxu1 %v697_v19  ;;  %1719 = vmatprep.mubr.msk.bf16.mxu1 %vm1948_vm0, %v1947_v3 }
 0x167   : > { %1723 = vmatprep.subr.bf16.mxu1 %v1947_v3 }
 0x225   : > { %v664_v27 = vpop.f32.mrf.mxu1 }
 0x226   : > { %v670_v28 = vmul.f32 0.35355338, %v664_v27 }
 0x227   : > { %v1715_v29 = vpop.f32.mrf.mxu1 }
 0x228   : > { %v677_v30 = vadd.f32 %v2157_v26, %v670_v28 }
 0x229   : > { %v667_v31 = vpop.f32.mrf.mxu1 }
 0x22a   : > { %v678_v32 = vsel %vm623_vm2, %v677_v30, -inf }
 0x22b   : > { %v1716_v33 = vpop.f32.mrf.mxu1  ;;  %679 = vmax.xlane.f32.xlu0 %v678_v32 }
 0x2b4   : > { %v680_v34 = vpop.xlane.xlu0 %679 }
 0x2b5   : > { %v681_v35 = vsub.f32 %v677_v30, %v680_v34 }
 0x2b7   : > { %v682_v36 = vmul.f32 1.442695, %v681_v35 }
 0x2b9   : > { %1863 = vpow2.f32 %v682_v36 }
 0x2c6   : > { %v1864_v37 = vpop.eup %1863 }
 0x2c7   : > { %v684_v38 = vsel %vm623_vm2, %v1864_v37, 0.0 }
 0x2c8   : > { %685 = vadd.xlane.f32.xlu1 %v684_v38 }
 0x2d9   : > { %743 = vrot.lane.b32.xlu1 %v2139_v13, %s1951_s18  ;;  %s1957_s18 = smov 72  }
 0x2dd   : > { %741 = vrot.lane.b32.xlu1 %v2139_v13, %s1952_s30  ;;  %s1958_s30 = smov 104  }
 0x351   : > { %v686_v39 = vpop.xlane.xlu1 %685 }
 0x352   : > { %1865 = vrcp.f32 %v686_v39 }
 0x355   : > { %v744_v42 = vpop.permute.xlu1 %743 }
 0x356   : > { %v749_v44 = vsel %vm623_vm2, %v744_v42, 0 }
 0x359   : > { %v742_v45 = vpop.permute.xlu1 %741 }
 0x35f   : > { %v1866_v40 = vpop.eup %1865 }
 0x360   : > { %v688_v41 = vmul.f32 %v1866_v40, %v1864_v37 }
 0x362   : > { %v689_v43 = vpack.c.bf16 %v688_v41, %v688_v41 }
 0x364   : > { %1720 = vmatmul.mubr.msk.bf16.vlgmr.msra.gmra.mxu1 %vm623_vm2, %v689_v43 }
 0x365   : > { %1724 = vmatpush3.bf16.xpose.msra.mxu1 %v749_v44  ;;  %1725 = vmatprep.mubr.msk.bf16.mxu1 %vm1948_vm0, %v1947_v3 }
 0x366   : > { %1735 = vmatprep.subr.bf16.mxu1 %v1947_v3 }
 0x36c   : > { %1726 = vmatmul.mubr.msk.bf16.vlgmr.msra.gmra.mxu1 %vm623_vm2, %v742_v45 }
 0x36d   : > { %1737 = vmatprep.mubr.msk.bf16.mxu1 %vm1948_vm0, %v1947_v3  ;;  %1736 = vmatpush3.bf16.msra.mxu1 %v859_v0 }
 0x36e   : > { %1747 = vmatprep.subr.bf16.mxu1 %v1947_v3 }
 0x424   : > { %v733_v46 = vpop.f32.mrf.mxu1 }
 0x425   : > { %v739_v14 = vpack.c.bf16 %v733_v46, %v733_v46 }
 0x426   : > { %v1721_v47 = vpop.f32.mrf.mxu1 }
 0x428   : > { %v736_v48 = vpop.f32.mrf.mxu1 }
 0x42a   : > { %v1722_v49 = vpop.f32.mrf.mxu1 }
 0x42c   : > { %v785_v50 = vpop.f32.mrf.mxu1 }
 0x42d   : > { %v791_v51 = vmul.f32 0.35355338, %v785_v50 }
 0x42e   : > { %v1727_v52 = vpop.f32.mrf.mxu1 }
 0x42f   : > { %v792_v53 = vadd.f32 %v791_v51, %v2157_v26 }
 0x430   : > { %v788_v54 = vpop.f32.mrf.mxu1 }
 0x431   : > { %v793_v55 = vsel %vm623_vm2, %v792_v53, -inf }
 0x432   : > { %794 = vmax.xlane.f32.xlu1 %v793_v55  ;;  %v1728_v56 = vpop.f32.mrf.mxu1 }
 0x4bb   : > { %v795_v57 = vpop.xlane.xlu1 %794 }
 0x4bc   : > { %v796_v58 = vsub.f32 %v792_v53, %v795_v57  ;;  %v617_v53 = vld [vmem:[%s2433_s4 + $0x10] sm:$0xff] }
 0x4bd   : > { %v1060_v54 = vpack.c.bf16 %v617_v53, %v617_v53 }
 0x4be   : > { %v797_v59 = vmul.f32 1.442695, %v796_v58 }
 0x4bf   : > { %v1065_v55 = vsel %vm695_vm3, %v1060_v54, 0 }
 0x4c0   : > { %1867 = vpow2.f32 %v797_v59 }
 0x4cd   : > { %v1868_v60 = vpop.eup %1867 }
 0x4ce   : > { %v799_v61 = vsel %vm623_vm2, %v1868_v60, 0.0 }
 0x4cf   : > { %800 = vadd.xlane.f32.xlu0 %v799_v61 }
 0x4e5   : > { %805 = vrot.lane.b32.xlu0 %v2139_v13, %s1953_s20  ;;  %s1889_s20 = sshll.u32 %s1960_s1, 4  ;;  %s1890_s20 = int_to_ptr.vmem [resolvable:$false] %s1889_s20 }
 0x4e9   : > { %949 = vrot.lane.b32.xlu0 %v2139_v13, %s1954_s26  ;;  %s1661_s26 = sshll.u32 %s2067_s25, 7  ;;  %s1891_s25 = scalar_lea.vmem %s1890_s20, 256 }
 0x4ed   : > { %947 = vrot.lane.b32.xlu0 %v2139_v13, %s1955_s28  ;;  %s1956_s28 = smov 48  }
 0x558   : > { %v801_v1 = vpop.xlane.xlu0 %800 }
 0x559   : > { %1869 = vrcp.f32 %v801_v1 }
 0x55c   : > { %v806_v2 = vpop.permute.xlu0 %805 }
 0x55d   : > { %v811_v4 = vsel %vm695_vm3, %v806_v2, 0 }
 0x55e   : > { %1730 = vmatpush3.bf16.msra.mxu0 %v811_v4 }
 0x55f   : > { %1741 = vmatprep.subr.bf16.mxu0 %v1947_v3 }
 0x560   : > { %v950_v15 = vpop.permute.xlu0 %949 }
 0x561   : > { %v955_v19 = vsel %vm623_vm2, %v950_v15, 0 }
 0x564   : > { %v948_v23 = vpop.permute.xlu0 %947 }
 0x566   : > { %v1870_v8 = vpop.eup %1869 }
 0x567   : > { %v803_v9 = vmul.f32 %v1870_v8, %v1868_v60 }
 0x569   : > { %v804_v10 = vpack.c.bf16 %v803_v9, %v803_v9 }
 0x56b   : > { %1732 = vmatmul.mubr.msk.bf16.vlgmr.msra.gmra.mxu0 %vm623_vm2, %v804_v10 }
 0x56c   : > { %1742 = vmatpush3.bf16.msra.mxu0 %v905_v12  ;;  %1743 = vmatprep.mubr.msk.bf16.mxu0 %vm1948_vm0, %v1947_v3 }
 0x56d   : > { %1753 = vmatprep.subr.bf16.mxu0 %v1947_v3 }
 0x573   : > { %1744 = vmatmul.mubr.msk.bf16.vlgmr.msra.gmra.mxu0 %vm623_vm2, %v739_v14 }
 0x574   : > { %1755 = vmatprep.mubr.msk.bf16.mxu0 %vm1948_vm0, %v1947_v3 }
 0x62b   : > { %v847_v16 = vpop.f32.mrf.mxu0 }
 0x62c   : > { %v853_v17 = vpack.c.bf16 %v847_v16, %v847_v16 }
 0x62d   : > { %v1733_v18 = vpop.f32.mrf.mxu0 }
 0x62e   : > { %1738 = vmatmul.mubr.msk.bf16.vlgmr.msra.gmra.mxu1 %vm623_vm2, %v853_v17  ;;  %v618_v17 = vld [vmem:[%s2433_s4 + $0x18] sm:$0xff]  ;;  %s1506_s4 = scalar_lea.hbm %s2414_s14, %s1661_s26 }
 0x62f   : > { %1748 = vmatpush3.bf16.xpose.msra.mxu1 %v955_v19  ;;  %v850_v20 = vpop.f32.mrf.mxu0  ;;  %1749 = vmatprep.mubr.msk.bf16.mxu1 %vm1948_vm0, %v1947_v3  ;;  %v1221_v18 = vpack.c.bf16 %v618_v17, %v618_v17  ;;  %v1379_v17 = vld [vmem:[%s2410_s10 + $0x28] sm:$0xff] }
 0x630   : > { %1759 = vmatprep.subr.bf16.mxu1 %v1947_v3 }
 0x631   : > { %v1734_v21 = vpop.f32.mrf.mxu0  ;;  %v1226_v20 = vsel %vm695_vm3, %v1221_v18, 0 }
 0x633   : > { %v2201_v22 = vpop.f32.mrf.mxu0 }
 0x635   : > { %v1745_v24 = vpop.f32.mrf.mxu0 }
 0x636   : > { %1750 = vmatmul.mubr.msk.bf16.vlgmr.msra.gmra.mxu1 %vm623_vm2, %v948_v23 }
 0x637   : > { %v944_v25 = vpop.f32.mrf.mxu0  ;;  %1761 = vmatprep.mubr.msk.bf16.mxu1 %vm1948_vm0, %v1947_v3  ;;  %1760 = vmatpush3.bf16.msra.mxu1 %v1065_v55 }
 0x638   : > { %1771 = vmatprep.subr.bf16.mxu1 %v1947_v3 }
 0x639   : > { %v1746_v27 = vpop.f32.mrf.mxu0 }
 0x6ee   : > { %v2206_v28 = vpop.f32.mrf.mxu1 }
 0x6ef   : > { %v942_v12 = vadd.f32 %v2201_v22, %v2206_v28 }
 0x6f0   : > { %v1739_v29 = vpop.f32.mrf.mxu1 }
 0x6f2   : > { %v898_v30 = vpop.f32.mrf.mxu1 }
 0x6f4   : > { %v1740_v31 = vpop.f32.mrf.mxu1 }
 0x6f6   : > { %v991_v32 = vpop.f32.mrf.mxu1 }
 0x6f7   : > { %v997_v33 = vmul.f32 0.35355338, %v991_v32 }
 0x6f8   : > { %v1751_v34 = vpop.f32.mrf.mxu1 }
 0x6f9   : > { %v998_v35 = vadd.f32 %v997_v33, %v2157_v26  ;;  %v1652_v33 = vld [vmem:[%s2434_s5] ss:$0 sm:$0xff] }
 0x6fa   : > { %v994_v36 = vpop.f32.mrf.mxu1 }
 0x6fb   : > { %v999_v37 = vsel %vm623_vm2, %v998_v35, -inf }
 0x6fc   : > { %1000 = vmax.xlane.f32.xlu1 %v999_v37  ;;  %v1752_v38 = vpop.f32.mrf.mxu1 }
 0x70d   : > { %1011 = vrot.lane.b32.xlu1 %v2139_v13, %s1956_s28  ;;  %s1959_s28 = smov 40  }
 0x711   : > { %1110 = vrot.lane.b32.xlu1 %v2139_v13, %s1957_s18  ;;  %s522_s18 = sand.u32 1, %s1937_s22  }
 0x712   : > { %s1634_s23 = sshll.u32 %s522_s18, 3  ;;  %s1487_s5 = scalar_lea.sflag [#allocation3], %s522_s18 }
 0x715   : > { %1108 = vrot.lane.b32.xlu1 %v2139_v13, %s1958_s30  ;;  %s551_s30 = scalar_lea.vmem %s2416_s16, %s2118_s19 }
 0x785   : > { %v1001_v39 = vpop.xlane.xlu1 %1000 }
 0x786   : > { %v1002_v40 = vsub.f32 %v998_v35, %v1001_v39 }
 0x788   : > { %v1003_v41 = vmul.f32 1.442695, %v1002_v40 }
 0x789   : > { %v1012_v42 = vpop.permute.xlu1 %1011 }
 0x78a   : > { %1871 = vpow2.f32 %v1003_v41  ;;  %v1017_v43 = vsel %vm695_vm3, %v1012_v42, 0 }
 0x78b   : > { %1754 = vmatpush3.bf16.msra.mxu0 %v1017_v43 }
 0x78c   : > { %1765 = vmatprep.subr.bf16.mxu0 %v1947_v3 }
 0x78d   : > { %v1111_v49 = vpop.permute.xlu1 %1110 }
 0x78e   : > { %v1116_v51 = vsel %vm623_vm2, %v1111_v49, 0  ;;  %v1308_v49 = vld [vmem:[%s2408_s8] sm:$0xff] }
 0x791   : > { %v1109_v52 = vpop.permute.xlu1 %1108 }
 0x797   : > { %v1872_v44 = vpop.eup %1871 }
 0x798   : > { %v1005_v45 = vsel %vm623_vm2, %v1872_v44, 0.0 }
 0x799   : > { %1006 = vadd.xlane.f32.xlu0 %v1005_v45 }
 0x822   : > { %v1007_v46 = vpop.xlane.xlu0 %1006 }
 0x823   : > { %1873 = vrcp.f32 %v1007_v46  ;;  %v1310_v46 = vld [vmem:[%s2408_s8 + $0x10] sm:$0xff] }
 0x830   : > { %v1874_v47 = vpop.eup %1873 }
 0x831   : > { %v1009_v48 = vmul.f32 %v1874_v47, %v1872_v44  ;;  %v1311_v47 = vld [vmem:[%s2408_s8 + $0x18] sm:$0xff] }
 0x833   : > { %v1010_v50 = vpack.c.bf16 %v1009_v48, %v1009_v48  ;;  %v1314_v48 = vpack.c.bf16 %v1311_v47, %v1310_v46 }
 0x835   : > { %1756 = vmatmul.mubr.msk.bf16.vlgmr.msra.gmra.mxu0 %vm623_vm2, %v1010_v50  ;;  %v1309_v50 = vld [vmem:[%s2408_s8 + $0x8] sm:$0xff] }
 0x836   : > { %1766 = vmatpush3.bf16.xpose.msra.mxu0 %v1116_v51  ;;  %1767 = vmatprep.mubr.msk.bf16.mxu0 %vm1948_vm0, %v1947_v3  ;;  %v1313_v51 = vpack.c.bf16 %v1309_v50, %v1308_v49 }
 0x837   : > { %1777 = vmatprep.subr.bf16.mxu0 %v1947_v3 }
 0x83d   : > { %1768 = vmatmul.mubr.msk.bf16.vlgmr.msra.gmra.mxu0 %vm623_vm2, %v1109_v52 }
 0x83e   : > { %1779 = vmatprep.mubr.msk.bf16.mxu0 %vm1948_vm0, %v1947_v3  ;;  %1778 = vmatpush3.bf16.msra.mxu0 %v1226_v20  ;;  %v1377_v20 = vld [vmem:[%s2410_s10 + $0x18] sm:$0xff] }
 0x83f   : > { %1791 = vmatprep.subr.bf16.mxu0 %v1947_v3 }
 0x8f5   : > { %v1053_v56 = vpop.f32.mrf.mxu0 }
 0x8f6   : > { %v1059_v57 = vpack.c.bf16 %v1053_v56, %v1053_v56  ;;  %v1653_v56 = vld [vmem:[%s2406_s6] ss:$0 sm:$0xff] }
 0x8f7   : > { %v1757_v58 = vpop.f32.mrf.mxu0 }
 0x8f8   : > { %1762 = vmatmul.mubr.msk.bf16.vlgmr.msra.gmra.mxu1 %vm623_vm2, %v1059_v57  ;;  %v1654_v58 = vld [vmem:[%s2407_s7] ss:$0 sm:$0xff] }
 0x8f9   : > { %v1056_v59 = vpop.f32.mrf.mxu0  ;;  %1773 = vmatprep.mubr.msk.bf16.mxu1 %vm1948_vm0, %v1947_v3 }
 0x8fb   : > { %v1758_v60 = vpop.f32.mrf.mxu0 }
 0x8fd   : > { %v1152_v61 = vpop.f32.mrf.mxu0 }
 0x8fe   : > { %v1158_v62 = vmul.f32 0.35355338, %v1152_v61 }
 0x8ff   : > { %v1769_v63 = vpop.f32.mrf.mxu0 }
 0x900   : > { %v1159_v0 = vadd.f32 %v1158_v62, %v2157_v26  ;;  %v1388_v62 = vld [vmem:[%s2410_s10 + $0x70] sm:$0xff]  ;;  %v1389_v63 = vld [vmem:[%s2410_s10 + $0x78] sm:$0xff] }
 0x901   : > { %v1155_v1 = vpop.f32.mrf.mxu0 }
 0x902   : > { %v1160_v2 = vsel %vm623_vm2, %v1159_v0, -inf  ;;  %v1386_v1 = vld [vmem:[%s2410_s10 + $0x60] sm:$0xff] }
 0x903   : > { %1161 = vmax.xlane.f32.xlu1 %v1160_v2  ;;  %v1770_v4 = vpop.f32.mrf.mxu0  ;;  %v1387_v2 = vld [vmem:[%s2410_s10 + $0x68] sm:$0xff] }
 0x904   : > { %v1397_v4 = vpack.c.bf16 %v1387_v2, %v1386_v1 }
 0x98c   : > { %v1162_v5 = vpop.xlane.xlu1 %1161 }
 0x98d   : > { %v1163_v6 = vsub.f32 %v1159_v0, %v1162_v5  ;;  %v1398_v0 = vpack.c.bf16 %v1389_v63, %v1388_v62  ;;  %v1384_v5 = vld [vmem:[%s2410_s10 + $0x50] sm:$0xff] }
 0x98f   : > { %v1164_v8 = vmul.f32 1.442695, %v1163_v6  ;;  %v1385_v6 = vld [vmem:[%s2410_s10 + $0x58] sm:$0xff] }
 0x991   : > { %1875 = vpow2.f32 %v1164_v8  ;;  %v1396_v8 = vpack.c.bf16 %v1385_v6, %v1384_v5 }
 0x99e   : > { %v1876_v9 = vpop.eup %1875 }
 0x99f   : > { %v1166_v10 = vsel %vm623_vm2, %v1876_v9, 0.0 }
 0x9a0   : > { %1167 = vadd.xlane.f32.xlu0 %v1166_v10  ;;  %v1383_v10 = vld [vmem:[%s2410_s10 + $0x48] sm:$0xff] }
 0x9b6   : > { %1172 = vrot.lane.b32.xlu0 %v2139_v13, %s1959_s28  ;;  %s547_s28 = scalar_lea.vmem %s2415_s15, %s2118_s19  ;;  %s524_s19 = scalar_lea.vmem [#allocation2], %s1634_s23 }
 0x9b8   : > { %v1101_v26 = vpop.f32.mrf.mxu1 }
 0x9b9   : > { %v1107_v14 = vadd.f32 %v1101_v26, %v942_v12  ;;  %v1380_v26 = vld [vmem:[%s2410_s10 + $0x30] sm:$0xff] }
 0x9ba   : > { %v1763_v15 = vpop.f32.mrf.mxu1 }
 0x9bc   : > { %v1104_v16 = vpop.f32.mrf.mxu1 }
 0x9bd   : > { %v1378_v16 = vld [vmem:[%s2410_s10 + $0x20] sm:$0xff] }
 0x9be   : > { %v1764_v19 = vpop.f32.mrf.mxu1  ;;  %v1393_v18 = vpack.c.bf16 %v1379_v17, %v1378_v16 }
 0x9bf   : > { %v1376_v19 = vld [vmem:[%s2410_s10 + $0x10] sm:$0xff] }
 0xa29   : > { %v1168_v21 = vpop.xlane.xlu0 %1167 }
 0xa2a   : > { %1877 = vrcp.f32 %v1168_v21  ;;  %v1392_v21 = vpack.c.bf16 %v1377_v20, %v1376_v19 }
 0xa2d   : > { %v1173_v13 = vpop.permute.xlu0 %1172 }
 0xa2e   : > { %v1178_v22 = vsel %vm695_vm3, %v1173_v13, 0  ;;  %v1374_v13 = vld [vmem:[%s2410_s10] sm:$0xff] }
 0xa2f   : > { %1772 = vmatpush3.bf16.msra.mxu1 %v1178_v22  ;;  %v1375_v22 = vld [vmem:[%s2410_s10 + $0x8] sm:$0xff] }
 0xa30   : > { %1783 = vmatprep.subr.bf16.mxu1 %v1947_v3 }
 0xa37   : > { %v1878_v23 = vpop.eup %1877 }
 0xa38   : > { %v1170_v24 = vmul.f32 %v1878_v23, %v1876_v9  ;;  %v1382_v9 = vld [vmem:[%s2410_s10 + $0x40] sm:$0xff]  ;;  %v1391_v23 = vpack.c.bf16 %v1375_v22, %v1374_v13 }
 0xa39   : > { %v1395_v12 = vpack.c.bf16 %v1383_v10, %v1382_v9 }
 0xa3a   : > { %v1171_v25 = vpack.c.bf16 %v1170_v24, %v1170_v24  ;;  %v1655_v24 = vld [vmem:[%s2409_s9] ss:$0 sm:$0xff] }
 0xa3c   : > { %1774 = vmatmul.mubr.msk.bf16.vlgmr.msra.gmra.mxu1 %vm623_vm2, %v1171_v25 }
 0xa3d   : > { %1787 = vmatprep.mubr.msk.bf16.mxu1 %vm1948_vm0, %v1947_v3  ;;  %1784 = vmatpush3.bf16.msra.mxu1 %v1314_v48 }
 0xa3e   : > { %1785 = vmatprep.subr.bf16.mxu1 %v1947_v3 }
 0xa41   : > { %1786 = vmatpush3.bf16.msra.mxu1 %v1313_v51 }
 0xafc   : > { %v1214_v27 = vpop.f32.mrf.mxu1 }
 0xafd   : > { %v1220_v28 = vpack.c.bf16 %v1214_v27, %v1214_v27 }
 0xafe   : > { %v1775_v29 = vpop.f32.mrf.mxu1 }
 0xaff   : > { %1780 = vmatmul.mubr.msk.bf16.vlgmr.msra.gmra.mxu0 %vm623_vm2, %v1220_v28 }
 0xb00   : > { %v1217_v30 = vpop.f32.mrf.mxu1  ;;  %1807 = vmatprep.mubr.msk.bf16.mxu0 %vm1948_vm0, %v1947_v3  ;;  %1792 = vmatpush3.bf16.msra.mxu0 %v1398_v0 }
 0xb01   : > { %1793 = vmatprep.subr.bf16.mxu0 %v1947_v3 }
 0xb02   : > { %v1776_v31 = vpop.f32.mrf.mxu1 }
 0xb04   : > { %1794 = vmatpush3.bf16.msra.mxu0 %v1397_v4 }
 0xb05   : > { %1795 = vmatprep.subr.bf16.mxu0 %v1947_v3 }
 0xb08   : > { %1796 = vmatpush3.bf16.msra.mxu0 %v1396_v8 }
 0xb09   : > { %1797 = vmatprep.subr.bf16.mxu0 %v1947_v3 }
 0xb0c   : > { %1798 = vmatpush3.bf16.msra.mxu0 %v1395_v12 }
 0xb0d   : > { %1799 = vmatprep.subr.bf16.mxu0 %v1947_v3 }
 0xbbf   : > { %v1262_v32 = vpop.f32.mrf.mxu0 }
 0xbc0   : > { %v1268_v34 = vadd.f32 %v1262_v32, %v1107_v14  ;;  %v1381_v14 = vld [vmem:[%s2410_s10 + $0x38] sm:$0xff] }
 0xbc1   : > { %v1781_v35 = vpop.f32.mrf.mxu0  ;;  %v1394_v15 = vpack.c.bf16 %v1381_v14, %v1380_v26 }
 0xbc2   : > { %v1276_v36 = vadd.f32 %v1652_v33, %v1268_v34 }
 0xbc3   : > { %v1265_v37 = vpop.f32.mrf.mxu0  ;;  %1800 = vmatpush3.bf16.msra.mxu0 %v1394_v15 }
 0xbc4   : > { %v1277_v38 = vadd.f32 %v1276_v36, %v2124_v7  ;;  %1801 = vmatprep.subr.bf16.mxu0 %v1947_v3 }
 0xbc5   : > { %v1782_v39 = vpop.f32.mrf.mxu0 }
 0xbc6   : > { %v1280_v40 = vsel %vm571_vm1, %v1277_v38, 0.0 }
 0xbc7   : > { %1281 = vadd.xlane.f32.xlu0 %v1280_v40  ;;  %1802 = vmatpush3.bf16.msra.mxu0 %v1393_v18  ;;  %v1657_v40 = vld [vmem:[%s2411_s11] ss:$0 sm:$0xff] }
 0xbc8   : > { %1803 = vmatprep.subr.bf16.mxu0 %v1947_v3 }
 0xbcb   : > { %1804 = vmatpush3.bf16.msra.mxu0 %v1392_v21 }
 0xbcc   : > { %1805 = vmatprep.subr.bf16.mxu0 %v1947_v3 }
 0xbcf   : > { %1806 = vmatpush3.bf16.msra.mxu0 %v1391_v23 }
 0xbdd   : > { %1482 = vrot.lane.b32.xlu0 %v2135_v11, %s1949_s29  ;;  %s1508_s29 = sshll.u32 %s524_s19, 4  ;;  %s1509_s29 = int_to_ptr.vmem [resolvable:$true] %s1508_s29 }
 0xbde   : > { %p1892_p0 = scmp.lt.s32.totalorder %s1509_s29, %s1890_s20 }
 0xc50   : > { %v1282_v41 = vpop.xlane.xlu0 %1281 }
 0xc51   : > { %v1284_v42 = vmul.f32 0.03125, %v1282_v41 }
 0xc53   : > { %v1285_v43 = vsub.f32 %v1277_v38, %v1284_v42 }
 0xc54   : > { %v1483_v44 = vpop.permute.xlu0 %1482 }
 0xc55   : > { %1485 = vst.msk [vmem:[%s551_s30] sm:$0xff] %vm571_vm1, %v1483_v44  ;;  %v1286_v45 = vmul.f32 %v1285_v43, %v1285_v43  ;;  %s1885_s30 = scalar_lea.vmem %s1509_s29, 128 }
 0xc56   : > { %p1886_p11 = scmp.ne.s32.totalorder %s1509_s29, %s1885_s30  ;;  %p1893_p1 = scmp.lt.s32.totalorder %s1891_s25, %s1885_s30 }
 0xc57   : > { %v1287_v7 = vsel %vm571_vm1, %v1286_v45, 0.0 }
 0xc58   : > { %1288 = vadd.xlane.f32.xlu1 %v1287_v7  ;;  %p1887_p12 = pnand %p1886_p11, %p2084_p5  ;;  %p1894_p2 = por %p1893_p1, %p1892_p0 }
 0xc5a   : > { %p1888_p13 = pneg %p1887_p12 }
 0xc5c   : > { %p1895_p3 = pnand %p1894_p2, %p1888_p13 }
 0xce1   : > { %v1289_v52 = vpop.xlane.xlu1 %1288 }
 0xce2   : > { %v1290_v53 = vmul.f32 0.03125, %v1289_v52 }
 0xce4   : > { %v1291_v54 = vadd.f32 1e-05, %v1290_v53 }
 0xce6   : > { %1879 = vrsqrt.f32 %v1291_v54 }
 0xcf3   : > { %v1880_v55 = vpop.eup %1879 }
 0xcf4   : > { %v1293_v57 = vmul.f32 %v1880_v55, %v1285_v43 }
 0xcf6   : > { %v1300_v59 = vmul.f32 %v1653_v56, %v1293_v57  ;;  %v1658_v57 = vld [vmem:[%s2412_s12] ss:$0 sm:$0xff] }
 0xcf8   : > { %v2283_v60 = vadd.f32 %v1654_v58, %v1300_v59  ;;  %v1659_v58 = vld [vmem:[%s2413_s13] ss:$0 sm:$0xff] }
 0xcfa   : > { %v1312_v61 = vpack.c.bf16 %v2283_v60, %v2283_v60 }
 0xcfc   : > { %1788 = vmatmul.mubr.msk.bf16.vlgmr.msra.gmra.mxu1 %vm571_vm1, %v1312_v61 }
 0xdbc   : > { %v1359_v25 = vpop.f32.mrf.mxu1 }
 0xdbd   : > { %v1360_v27 = vadd.f32 %v1655_v24, %v1359_v25 }
 0xdbe   : > { %v1789_v28 = vpop.f32.mrf.mxu1 }
 0xdbf   : > { %v1366_v29 = vmul.f32 0.044715, %v1360_v27  ;;  %v1365_v37 = vmul.f32 0.5, %v1360_v27 }
 0xdc0   : > { %v1362_v30 = vpop.f32.mrf.mxu1 }
 0xdc1   : > { %v1367_v31 = vmul.f32 %v1366_v29, %v1360_v27 }
 0xdc2   : > { %v1790_v32 = vpop.f32.mrf.mxu1 }
 0xdc3   : > { %v1368_v33 = vmul.f32 %v1367_v31, %v1360_v27 }
 0xdc5   : > { %v1369_v34 = vadd.f32 %v1368_v33, %v1360_v27 }
 0xdc7   : > { %v1370_v35 = vmul.f32 0.7978846, %v1369_v34 }
 0xdc9   : > { %1881 = vtanh.f32 %v1370_v35 }
 0xdd6   : > { %v1882_v36 = vpop.eup %1881 }
 0xdd7   : > { %v1372_v38 = vadd.f32 1.0, %v1882_v36 }
 0xdd9   : > { %v1373_v3 = vmul.f32 %v1372_v38, %v1365_v37 }
 0xddb   : > { %v1390_v39 = vpack.c.bf16 %v1373_v3, %v1373_v3 }
 0xddd   : > { %1808 = vmatmul.mubr.bf16.vlgmr.msra.gmra.mxu0 %v1390_v39 }
 0xe9d   : > { %v1440_v41 = vpop.f32.mrf.mxu0 }
 0xe9e   : > { %v1441_v42 = vadd.f32 %v1657_v40, %v1440_v41 }
 0xe9f   : > { %v1809_v43 = vpop.f32.mrf.mxu0 }
 0xea0   : > { %v1446_v44 = vadd.f32 %v1441_v42, %v2283_v60 }
 0xea1   : > { %v1443_v45 = vpop.f32.mrf.mxu0 }
 0xea2   : > { %v1449_v7 = vsel %vm571_vm1, %v1446_v44, 0.0 }
 0xea3   : > { %1450 = vadd.xlane.f32.xlu1 %v1449_v7  ;;  %v1810_v46 = vpop.f32.mrf.mxu0 }
 0xf2c   : > { %v1451_v47 = vpop.xlane.xlu1 %1450 }
 0xf2d   : > { %v1452_v48 = vmul.f32 0.03125, %v1451_v47 }
 0xf2f   : > { %v1453_v49 = vsub.f32 %v1446_v44, %v1452_v48 }
 0xf31   : > { %v1454_v50 = vmul.f32 %v1453_v49, %v1453_v49 }
 0xf33   : > { %v1455_v51 = vsel %vm571_vm1, %v1454_v50, 0.0 }
 0xf34   : > { %1456 = vadd.xlane.f32.xlu1 %v1455_v51 }
 0xf45   : > { %1478 = vrot.lane.b32.xlu1 %v2135_v11, %s2435_s2 }
 0xfbd   : > { %v1457_v52 = vpop.xlane.xlu1 %1456 }
 0xfbe   : > { %v1458_v53 = vmul.f32 0.03125, %v1457_v52 }
 0xfc0   : > { %v1459_v54 = vadd.f32 1e-05, %v1458_v53 }
 0xfc1   : > { %v1479_v55 = vpop.permute.xlu1 %1478 }
 0xfc2   : > { %1883 = vrsqrt.f32 %v1459_v54  ;;  %1481 = vst.msk [vmem:[%s547_s28] sm:$0xff] %vm571_vm1, %v1479_v55 }
 0xfcf   : > { %v1884_v56 = vpop.eup %1883 }
 0xfd0   : > { %v1461_v11 = vmul.f32 %v1884_v56, %v1453_v49 }
 0xfd2   : > { %v1468_v59 = vmul.f32 %v1658_v57, %v1461_v11 }
 0xfd4   : > { %v1475_v60 = vadd.f32 %v1659_v58, %v1468_v59 }
 0xfd6   : > { %1476 = vst.msk [vmem:[%s524_s19] sm:$0xff] %vm571_vm1, %v1475_v60 }
 0xfd7   : > { %1898 = shalt.err (!%p1895_p3)
}
 0xfd8   : > { %s1899_s3 = scalar_lea.hbm %s1506_s4, 128  ;;  %s1903_s2 = scalar_lea.hbm %s2414_s14, 256 }
 0xfd9   : > { %p1900_p4 = scmp.ne.s32.totalorder %s1506_s4, %s1899_s3  ;;  %p1904_p9 = scmp.lt.s32.totalorder %s1506_s4, %s2414_s14 }
 0xfda   : > { %p1905_p10 = scmp.lt.s32.totalorder %s1903_s2, %s1899_s3 }
 0xfdb   : > { %p1901_p7 = pnand %p1900_p4, %p2084_p5 }
 0xfdc   : > { %p1906_p11 = por %p1905_p10, %p1904_p9 }
 0xfdd   : > { %p1902_p8 = pneg %p1901_p7 }
 0xfdf   : > { %p1907_p12 = pnand %p1906_p11, %p1902_p8 }
 0xfe1   : > { %1910 = shalt.err (!%p1907_p12)
}
 0xfe2   : > { %1811 = dma.vmem_to_hbm [thread:$0]  (%p2084_p5), %s1509_s29, 128, %s1506_s4, %s1487_s5  }
 0xfe3 PF: > { %p1817_p13 = scmp.ge.s32.totalorder %s1945_s24, 2  ;;  %s1526_s28 = sand.u32 1, %s1933_s21  }
 0xfe4   : > { %s1527_s30 = scalar_lea.sflag [#allocation3], %s1526_s28 }
 0xfe5   : > { %p1814_p0 = pnand %p1817_p13, %p2088_p6 }
 0xfe7   : > { %p1815_p1 = pneg %p1814_p0 }
 0xfe9   : > { %1928 = dma.done.wait (%p1815_p1), %s1527_s30, 128  }
 0xfea   : > { %1930 = vsyncadd (%p1815_p1), %s1527_s30, 4294967168  ;;  %s2436_s1 = sld [smem:[#allocation5_spill]]  ;;  %p27_p2 = scmp.ge.s32.totalorder %s2071_s27, 4  }
 0xfeb   : > { %s2437_s23 = sld [smem:[#allocation6_spill]]  ;;  %s2438_s21 = smov %s1937_s22 }
 0xfec   : > { %s2440_s24 = smov %s2071_s27  ;;  %29 = sbr.rel (!%p27_p2) target bundleno = 10 (0xa), region = 138 }
 0xff0   : > { %s2439_s22 = smov %s2436_s1 }
 0xff1   :  { %1546 = vsyncpa [#allocation3], 1 }
 0xff2   :  { %1548 = vsyncpa [#allocation3 + $0x1], 1 }

</bundles_post_ra>
